<compile_context>
chip_gen: v7x
topology: tpu7x:2x2x1
jax: 0.10.0
libtpu: 0.0.40
codegen_flags: <defaults>
</compile_context>

<pallas_src>
import functools
import math

import jax
import jax.numpy as jnp
from jax.experimental import pallas as pl
from jax.experimental.pallas import tpu as pltpu

LANE = 128  # TPU lane width


def _round_up(x, m):
    return (x + m - 1) // m * m


def _conv_block_kernel(x_ref, w1_ref, s1_ref, b1_ref, w2_ref, s2_ref, b2_ref,
                       o_ref, xpad1_ref, xpad2_ref, slab1_ref, slab2_ref):
    """Fused ConvBlock for one batch tile. Everything between the single HBM read
    of `x` and the single HBM write of the output stays in VMEM.

    x_ref    : (B, H, W, Cin)        unpadded input tile
    w1_ref   : (9*C1P, C2P)          stage-1 weights, rows ordered (kh, kw, cin)
    w2_ref   : (9*C2P, C2P)          stage-2 weights
    s*_ref   : (1, C2P)              fused BN scale
    b*_ref   : (1, C2P)              fused (conv bias + BN) shift
    o_ref    : (B, H, W, C2P)        output tile (channel-padded, lane-dense)
    xpad*_ref: (B, H+2, W+2, C*P)    zero-halo activation scratch
    slab*_ref: (B*H*W, 9*C*P)        im2col scratch
    """
    B, Hp, Wp, _ = xpad1_ref.shape
    H, W = Hp - 2, Wp - 2
    C2P = o_ref.shape[-1]
    Cin = x_ref.shape[-1]
    M = B * H * W

    def conv_bn_lrelu(xpad_ref, slab_ref, w_ref, s_ref, b_ref):
        cp = xpad_ref.shape[-1]
        # im2col: 9 shifted taps written into lane-aligned column blocks of the slab.
        t = 0
        for kh in range(3):
            for kw in range(3):
                tap = xpad_ref[:, kh:kh + H, kw:kw + W, :].reshape(M, cp)
                slab_ref[:, t * cp:(t + 1) * cp] = tap
                t += 1
        # Single MXU matmul per stage: (M, 9*cp) x (9*cp, C2P), f32 accumulation.
        acc = jnp.dot(slab_ref[...], w_ref[...],
                      preferred_element_type=jnp.float32)
        y = acc * s_ref[...] + b_ref[...]                    # fused BN affine (+ bias)
        return jnp.where(y >= 0, y, jnp.float32(0.01) * y)   # LeakyReLU(0.01)

    # ---- stage 1: build zero halo (+ channel padding) in VMEM, no HBM pad ----
    xpad1_ref[...] = jnp.zeros(xpad1_ref.shape, xpad1_ref.dtype)
    xpad1_ref[:, 1:H + 1, 1:W + 1, :Cin] = x_ref[...].astype(xpad1_ref.dtype)
    y1 = conv_bn_lrelu(xpad1_ref, slab1_ref, w1_ref, s1_ref, b1_ref)
    # TODO(synk): training-mode Dropout(p) would mask y1 here with
    # pltpu.prng_seed + pltpu.prng_random_bits; eval-mode dropout is the identity.

    # ---- stage 2: intermediate activation never leaves VMEM ----
    xpad2_ref[...] = jnp.zeros(xpad2_ref.shape, xpad2_ref.dtype)
    xpad2_ref[:, 1:H + 1, 1:W + 1, :] = (
        y1.reshape(B, H, W, C2P).astype(xpad2_ref.dtype))
    y2 = conv_bn_lrelu(xpad2_ref, slab2_ref, w2_ref, s2_ref, b2_ref)

    o_ref[...] = y2.reshape(B, H, W, C2P).astype(o_ref.dtype)


def conv_block_nhwc(x_nhwc, params, *, b_tile=1, compute_dtype=jnp.float32):
    """Fused ConvBlock on NHWC input. Returns (N, H, W, C2P) with padded channels.

    compute_dtype=jnp.bfloat16 halves DMA/MXU input cost (recommended on v5e);
    accumulation and BN/LeakyReLU stay in f32 either way.
    """
    N, H, W, Cin = x_nhwc.shape
    C2P = params["w1"].shape[-1]
    C1P = params["w1"].shape[0] // 9
    assert N % b_tile == 0, (N, b_tile)
    M = b_tile * H * W

    return pl.pallas_call(
        _conv_block_kernel,
        out_shape=jax.ShapeDtypeStruct((N, H, W, C2P), jnp.float32),
        grid_spec=pltpu.PrefetchScalarGridSpec(
            num_scalar_prefetch=0,
            grid=(N // b_tile,),
            in_specs=[
                pl.BlockSpec((b_tile, H, W, Cin), lambda n: (n, 0, 0, 0)),
                pl.BlockSpec((9 * C1P, C2P), lambda n: (0, 0)),
                pl.BlockSpec((1, C2P), lambda n: (0, 0)),
                pl.BlockSpec((1, C2P), lambda n: (0, 0)),
                pl.BlockSpec((9 * C2P, C2P), lambda n: (0, 0)),
                pl.BlockSpec((1, C2P), lambda n: (0, 0)),
                pl.BlockSpec((1, C2P), lambda n: (0, 0)),
            ],
            out_specs=pl.BlockSpec((b_tile, H, W, C2P), lambda n: (n, 0, 0, 0)),
            scratch_shapes=[
                pltpu.VMEM((b_tile, H + 2, W + 2, C1P), compute_dtype),
                pltpu.VMEM((b_tile, H + 2, W + 2, C2P), compute_dtype),
                pltpu.VMEM((M, 9 * C1P), compute_dtype),
                pltpu.VMEM((M, 9 * C2P), compute_dtype),
            ],
        ),
        compiler_params=pltpu.CompilerParams(
            dimension_semantics=("parallel",),
            vmem_limit_bytes=32 * 1024 * 1024,
        ),
    )(
        x_nhwc.astype(compute_dtype),
        params["w1"].astype(compute_dtype), params["s1"], params["b1"],
        params["w2"].astype(compute_dtype), params["s2"], params["b2"],
    )


@functools.partial(jax.jit, static_argnames=("out_channels", "b_tile"))
def conv_block_forward(x_nchw, params, out_channels, b_tile=1):
    x = jnp.transpose(x_nchw, (0, 2, 3, 1))        # NCHW -> NHWC
    y = conv_block_nhwc(x, params, b_tile=b_tile)  # (N, H, W, C2P)
    y = y[..., :out_channels]                      # drop lane padding
    return jnp.transpose(y, (0, 3, 1, 2))          # NHWC -> NCHW


def init_conv_block_params(key, in_channels, out_channels, eps=1e-5):
    """Mirror the PyTorch module's init; return kernel-ready (padded) params and
    the raw torch-layout params for a reference check."""
    k1, k2, k3, k4 = jax.random.split(key, 4)

    # Conv2d: kaiming_normal_(fan_out, relu) -> std = sqrt(2 / (Cout*3*3)); OIHW.
    std = math.sqrt(2.0 / (out_channels * 9))
    w1_oihw = jax.random.normal(k1, (out_channels, in_channels, 3, 3), jnp.float32) * std
    w2_oihw = jax.random.normal(k3, (out_channels, out_channels, 3, 3), jnp.float32) * std
    # Conv bias keeps torch default U(-1/sqrt(fan_in), 1/sqrt(fan_in)).
    bound1 = 1.0 / math.sqrt(in_channels * 9)
    b1 = jax.random.uniform(k2, (out_channels,), jnp.float32, -bound1, bound1)
    bound2 = 1.0 / math.sqrt(out_channels * 9)
    b2 = jax.random.uniform(k4, (out_channels,), jnp.float32, -bound2, bound2)

    # BatchNorm2d eval mode: gamma=1, beta=0, running_mean=0, running_var=1.
    gamma = jnp.ones((out_channels,), jnp.float32)
    beta = jnp.zeros((out_channels,), jnp.float32)
    mean = jnp.zeros((out_channels,), jnp.float32)
    var = jnp.ones((out_channels,), jnp.float32)

    def fuse(conv_bias):
        bn_scale = gamma / jnp.sqrt(var + eps)
        # BN(conv(x) + b) = bn_scale*conv(x) + (beta + bn_scale*(b - mean))
        return bn_scale, beta + bn_scale * (conv_bias - mean)

    s1, sh1 = fuse(b1)
    s2, sh2 = fuse(b2)

    c1p = _round_up(in_channels, LANE)
    c2p = _round_up(out_channels, LANE)

    def prep_w(w_oihw, cin_pad, cout_pad):
        w = jnp.transpose(w_oihw, (2, 3, 1, 0))                      # OIHW -> HWIO
        w = jnp.pad(w, ((0, 0), (0, 0),
                        (0, cin_pad - w.shape[2]), (0, cout_pad - w.shape[3])))
        return w.reshape(9 * cin_pad, cout_pad)                      # rows = (kh, kw, cin)

    def prep_v(v, cout_pad):
        return jnp.pad(v, (0, cout_pad - v.shape[0])).reshape(1, cout_pad)

    params = dict(
        w1=prep_w(w1_oihw, c1p, c2p), s1=prep_v(s1, c2p), b1=prep_v(sh1, c2p),
        w2=prep_w(w2_oihw, c2p, c2p), s2=prep_v(s2, c2p), b2=prep_v(sh2, c2p),
    )
    raw = dict(w1_oihw=w1_oihw, b1=b1, w2_oihw=w2_oihw, b2=b2)
    return params, raw


def _reference_forward(x_nchw, raw, eps=1e-5):
    """Pure-JAX reference of the PyTorch module (eval mode)."""
    def stage(x, w_oihw, bias):
        y = jax.lax.conv_general_dilated(
            x, w_oihw, window_strides=(1, 1), padding="SAME",
            dimension_numbers=("NCHW", "OIHW", "NCHW"))
        y = y + bias.reshape(1, -1, 1, 1)
        y = y / jnp.sqrt(1.0 + eps)                 # BN eval: mean=0, var=1, g=1, b=0
        return jnp.where(y >= 0, y, 0.01 * y)       # LeakyReLU(0.01); dropout = identity
    return stage(stage(x_nchw, raw["w1_oihw"], raw["b1"]), raw["w2_oihw"], raw["b2"])


if __name__ == "__main__":
    key = jax.random.PRNGKey(0)
    kx, kp = jax.random.split(key)

    N, Cin, Cout, H, W = 2, 4, 8, 16, 16
    x = jax.random.normal(kx, (N, Cin, H, W), jnp.float32)

    params, raw = init_conv_block_params(kp, Cin, Cout)
    out = conv_block_forward(x, params, out_channels=Cout)
    out = jax.block_until_ready(out)

    assert out.shape == (N, Cout, H, W), out.shape
    assert out.dtype == jnp.float32
    assert bool(jnp.all(jnp.isfinite(out)))

    ref = jax.block_until_ready(_reference_forward(x, raw))
    max_err = float(jnp.max(jnp.abs(out - ref)))
    assert max_err < 1e-1, f"mismatch vs reference: max_err={max_err}"

    print("KERNEL_OK")
</pallas_src>

<mosaic_0001>
module attributes {stable_mosaic.version = 11 : i64} {
  func.func @_conv_block_kernel(%arg0: i32, %arg1: memref<1x16x16x4xf32, #tpu.memory_space<vmem>>, %arg2: memref<1152x128xf32, #tpu.memory_space<vmem>>, %arg3: memref<1x128xf32, #tpu.memory_space<vmem>>, %arg4: memref<1x128xf32, #tpu.memory_space<vmem>>, %arg5: memref<1152x128xf32, #tpu.memory_space<vmem>>, %arg6: memref<1x128xf32, #tpu.memory_space<vmem>>, %arg7: memref<1x128xf32, #tpu.memory_space<vmem>>, %arg8: memref<1x16x16x128xf32, #tpu.memory_space<vmem>>, %arg9: memref<1x18x18x128xf32, #tpu.memory_space<vmem>>, %arg10: memref<1x18x18x128xf32, #tpu.memory_space<vmem>>, %arg11: memref<256x1152xf32, #tpu.memory_space<vmem>>, %arg12: memref<256x1152xf32, #tpu.memory_space<vmem>>) attributes {dimension_semantics = [#tpu.dimension_semantics<parallel>], iteration_bounds = array<i64: 2>, scalar_prefetch = 0 : i64, scratch_operands = 4 : i64, tpu.core_type = #tpu.core_type<tc>, window_params = [{transform_indices = @transform_0, window_bounds = array<i64: 1, 16, 16, 4>}, {pipeline_mode = #tpu.pipeline_mode<synchronous>, transform_indices = @transform_1, window_bounds = array<i64: 1152, 128>}, {pipeline_mode = #tpu.pipeline_mode<synchronous>, transform_indices = @transform_2, window_bounds = array<i64: 1, 128>}, {pipeline_mode = #tpu.pipeline_mode<synchronous>, transform_indices = @transform_3, window_bounds = array<i64: 1, 128>}, {pipeline_mode = #tpu.pipeline_mode<synchronous>, transform_indices = @transform_4, window_bounds = array<i64: 1152, 128>}, {pipeline_mode = #tpu.pipeline_mode<synchronous>, transform_indices = @transform_5, window_bounds = array<i64: 1, 128>}, {pipeline_mode = #tpu.pipeline_mode<synchronous>, transform_indices = @transform_6, window_bounds = array<i64: 1, 128>}, {transform_indices = @transform_7, window_bounds = array<i64: 1, 16, 16, 128>}]} {
    %cst = arith.constant 0.000000e+00 : f32
    %0 = vector.broadcast %cst : f32 to vector<1x18x18x128xf32>
    %c0 = arith.constant 0 : index
    %c0_0 = arith.constant 0 : index
    %c0_1 = arith.constant 0 : index
    %c0_2 = arith.constant 0 : index
    %1 = vector.load %arg9[%c0, %c0_0, %c0_1, %c0_2] : memref<1x18x18x128xf32, #tpu.memory_space<vmem>>, vector<1x18x18x128xf32>
    tpu.vector_store %arg9[%c0, %c0_0, %c0_1, %c0_2], %0 {strides = array<i32>} : memref<1x18x18x128xf32, #tpu.memory_space<vmem>>, vector<1x18x18x128xf32>,
    %c0_3 = arith.constant 0 : index
    %c0_4 = arith.constant 0 : index
    %c0_5 = arith.constant 0 : index
    %c0_6 = arith.constant 0 : index
    %2 = vector.load %arg1[%c0_3, %c0_4, %c0_5, %c0_6] : memref<1x16x16x4xf32, #tpu.memory_space<vmem>>, vector<1x16x16x4xf32>
    %c0_7 = arith.constant 0 : index
    %c1 = arith.constant 1 : index
    %c1_8 = arith.constant 1 : index
    %c0_9 = arith.constant 0 : index
    %3 = vector.load %arg9[%c0_7, %c1, %c1_8, %c0_9] : memref<1x18x18x128xf32, #tpu.memory_space<vmem>>, vector<1x16x16x4xf32>
    tpu.vector_store %arg9[%c0_7, %c1, %c1_8, %c0_9], %2 {strides = array<i32>} : memref<1x18x18x128xf32, #tpu.memory_space<vmem>>, vector<1x16x16x4xf32>,
    %c0_10 = arith.constant 0 : index
    %c0_11 = arith.constant 0 : index
    %c0_12 = arith.constant 0 : index
    %c0_13 = arith.constant 0 : index
    %4 = vector.load %arg9[%c0_10, %c0_11, %c0_12, %c0_13] : memref<1x18x18x128xf32, #tpu.memory_space<vmem>>, vector<1x16x16x128xf32>
    %5 = vector.shape_cast %4 : vector<1x16x16x128xf32> to vector<256x128xf32>
    %c0_14 = arith.constant 0 : index
    %c0_15 = arith.constant 0 : index
    %6 = vector.load %arg11[%c0_14, %c0_15] : memref<256x1152xf32, #tpu.memory_space<vmem>>, vector<256x128xf32>
    tpu.vector_store %arg11[%c0_14, %c0_15], %5 {strides = array<i32>} : memref<256x1152xf32, #tpu.memory_space<vmem>>, vector<256x128xf32>,
    %c0_16 = arith.constant 0 : index
    %c0_17 = arith.constant 0 : index
    %c1_18 = arith.constant 1 : index
    %c0_19 = arith.constant 0 : index
    %7 = vector.load %arg9[%c0_16, %c0_17, %c1_18, %c0_19] : memref<1x18x18x128xf32, #tpu.memory_space<vmem>>, vector<1x16x16x128xf32>
    %8 = vector.shape_cast %7 : vector<1x16x16x128xf32> to vector<256x128xf32>
    %c0_20 = arith.constant 0 : index
    %c128 = arith.constant 128 : index
    %9 = vector.load %arg11[%c0_20, %c128] : memref<256x1152xf32, #tpu.memory_space<vmem>>, vector<256x128xf32>
    tpu.vector_store %arg11[%c0_20, %c128], %8 {strides = array<i32>} : memref<256x1152xf32, #tpu.memory_space<vmem>>, vector<256x128xf32>,
    %c0_21 = arith.constant 0 : index
    %c0_22 = arith.constant 0 : index
    %c2 = arith.constant 2 : index
    %c0_23 = arith.constant 0 : index
    %10 = vector.load %arg9[%c0_21, %c0_22, %c2, %c0_23] : memref<1x18x18x128xf32, #tpu.memory_space<vmem>>, vector<1x16x16x128xf32>
    %11 = vector.shape_cast %10 : vector<1x16x16x128xf32> to vector<256x128xf32>
    %c0_24 = arith.constant 0 : index
    %c256 = arith.constant 256 : index
    %12 = vector.load %arg11[%c0_24, %c256] : memref<256x1152xf32, #tpu.memory_space<vmem>>, vector<256x128xf32>
    tpu.vector_store %arg11[%c0_24, %c256], %11 {strides = array<i32>} : memref<256x1152xf32, #tpu.memory_space<vmem>>, vector<256x128xf32>,
    %c0_25 = arith.constant 0 : index
    %c1_26 = arith.constant 1 : index
    %c0_27 = arith.constant 0 : index
    %c0_28 = arith.constant 0 : index
    %13 = vector.load %arg9[%c0_25, %c1_26, %c0_27, %c0_28] : memref<1x18x18x128xf32, #tpu.memory_space<vmem>>, vector<1x16x16x128xf32>
    %14 = vector.shape_cast %13 : vector<1x16x16x128xf32> to vector<256x128xf32>
    %c0_29 = arith.constant 0 : index
    %c384 = arith.constant 384 : index
    %15 = vector.load %arg11[%c0_29, %c384] : memref<256x1152xf32, #tpu.memory_space<vmem>>, vector<256x128xf32>
    tpu.vector_store %arg11[%c0_29, %c384], %14 {strides = array<i32>} : memref<256x1152xf32, #tpu.memory_space<vmem>>, vector<256x128xf32>,
    %c0_30 = arith.constant 0 : index
    %c1_31 = arith.constant 1 : index
    %c1_32 = arith.constant 1 : index
    %c0_33 = arith.constant 0 : index
    %16 = vector.load %arg9[%c0_30, %c1_31, %c1_32, %c0_33] : memref<1x18x18x128xf32, #tpu.memory_space<vmem>>, vector<1x16x16x128xf32>
    %17 = vector.shape_cast %16 : vector<1x16x16x128xf32> to vector<256x128xf32>
    %c0_34 = arith.constant 0 : index
    %c512 = arith.constant 512 : index
    %18 = vector.load %arg11[%c0_34, %c512] : memref<256x1152xf32, #tpu.memory_space<vmem>>, vector<256x128xf32>
    tpu.vector_store %arg11[%c0_34, %c512], %17 {strides = array<i32>} : memref<256x1152xf32, #tpu.memory_space<vmem>>, vector<256x128xf32>,
    %c0_35 = arith.constant 0 : index
    %c1_36 = arith.constant 1 : index
    %c2_37 = arith.constant 2 : index
    %c0_38 = arith.constant 0 : index
    %19 = vector.load %arg9[%c0_35, %c1_36, %c2_37, %c0_38] : memref<1x18x18x128xf32, #tpu.memory_space<vmem>>, vector<1x16x16x128xf32>
    %20 = vector.shape_cast %19 : vector<1x16x16x128xf32> to vector<256x128xf32>
    %c0_39 = arith.constant 0 : index
    %c640 = arith.constant 640 : index
    %21 = vector.load %arg11[%c0_39, %c640] : memref<256x1152xf32, #tpu.memory_space<vmem>>, vector<256x128xf32>
    tpu.vector_store %arg11[%c0_39, %c640], %20 {strides = array<i32>} : memref<256x1152xf32, #tpu.memory_space<vmem>>, vector<256x128xf32>,
    %c0_40 = arith.constant 0 : index
    %c2_41 = arith.constant 2 : index
    %c0_42 = arith.constant 0 : index
    %c0_43 = arith.constant 0 : index
    %22 = vector.load %arg9[%c0_40, %c2_41, %c0_42, %c0_43] : memref<1x18x18x128xf32, #tpu.memory_space<vmem>>, vector<1x16x16x128xf32>
    %23 = vector.shape_cast %22 : vector<1x16x16x128xf32> to vector<256x128xf32>
    %c0_44 = arith.constant 0 : index
    %c768 = arith.constant 768 : index
    %24 = vector.load %arg11[%c0_44, %c768] : memref<256x1152xf32, #tpu.memory_space<vmem>>, vector<256x128xf32>
    tpu.vector_store %arg11[%c0_44, %c768], %23 {strides = array<i32>} : memref<256x1152xf32, #tpu.memory_space<vmem>>, vector<256x128xf32>,
    %c0_45 = arith.constant 0 : index
    %c2_46 = arith.constant 2 : index
    %c1_47 = arith.constant 1 : index
    %c0_48 = arith.constant 0 : index
    %25 = vector.load %arg9[%c0_45, %c2_46, %c1_47, %c0_48] : memref<1x18x18x128xf32, #tpu.memory_space<vmem>>, vector<1x16x16x128xf32>
    %26 = vector.shape_cast %25 : vector<1x16x16x128xf32> to vector<256x128xf32>
    %c0_49 = arith.constant 0 : index
    %c896 = arith.constant 896 : index
    %27 = vector.load %arg11[%c0_49, %c896] : memref<256x1152xf32, #tpu.memory_space<vmem>>, vector<256x128xf32>
    tpu.vector_store %arg11[%c0_49, %c896], %26 {strides = array<i32>} : memref<256x1152xf32, #tpu.memory_space<vmem>>, vector<256x128xf32>,
    %c0_50 = arith.constant 0 : index
    %c2_51 = arith.constant 2 : index
    %c2_52 = arith.constant 2 : index
    %c0_53 = arith.constant 0 : index
    %28 = vector.load %arg9[%c0_50, %c2_51, %c2_52, %c0_53] : memref<1x18x18x128xf32, #tpu.memory_space<vmem>>, vector<1x16x16x128xf32>
    %29 = vector.shape_cast %28 : vector<1x16x16x128xf32> to vector<256x128xf32>
    %c0_54 = arith.constant 0 : index
    %c1024 = arith.constant 1024 : index
    %30 = vector.load %arg11[%c0_54, %c1024] : memref<256x1152xf32, #tpu.memory_space<vmem>>, vector<256x128xf32>
    tpu.vector_store %arg11[%c0_54, %c1024], %29 {strides = array<i32>} : memref<256x1152xf32, #tpu.memory_space<vmem>>, vector<256x128xf32>,
    %c0_55 = arith.constant 0 : index
    %c0_56 = arith.constant 0 : index
    %31 = vector.load %arg11[%c0_55, %c0_56] : memref<256x1152xf32, #tpu.memory_space<vmem>>, vector<256x1152xf32>
    %c0_57 = arith.constant 0 : index
    %c0_58 = arith.constant 0 : index
    %32 = vector.load %arg2[%c0_57, %c0_58] : memref<1152x128xf32, #tpu.memory_space<vmem>>, vector<1152x128xf32>
    %cst_59 = arith.constant dense<0.000000e+00> : vector<256x128xf32>
    %33 = tpu.matmul %31, %32, %cst_59 {dimension_numbers = #tpu.dot_dimension_numbers<[1], [0], [0], [1], [0, 0, 1, 1], [], []>} : vector<256x1152xf32>, vector<1152x128xf32>, vector<256x128xf32> -> vector<256x128xf32>
    %c0_60 = arith.constant 0 : index
    %c0_61 = arith.constant 0 : index
    %34 = vector.load %arg3[%c0_60, %c0_61] : memref<1x128xf32, #tpu.memory_space<vmem>>, vector<1x128xf32>
    %35 = vector.broadcast %34 : vector<1x128xf32> to vector<256x128xf32>
    %36 = arith.mulf %33, %35 : vector<256x128xf32>
    %c0_62 = arith.constant 0 : index
    %c0_63 = arith.constant 0 : index
    %37 = vector.load %arg4[%c0_62, %c0_63] : memref<1x128xf32, #tpu.memory_space<vmem>>, vector<1x128xf32>
    %38 = vector.broadcast %37 : vector<1x128xf32> to vector<256x128xf32>
    %39 = arith.addf %36, %38 : vector<256x128xf32>
    %cst_64 = arith.constant 0.000000e+00 : f32
    %40 = vector.broadcast %cst_64 : f32 to vector<256x128xf32>
    %41 = arith.cmpf oge, %39, %40 : vector<256x128xf32>
    %cst_65 = arith.constant 0.00999999977 : f32
    %42 = vector.broadcast %cst_65 : f32 to vector<256x128xf32>
    %43 = arith.mulf %42, %39 : vector<256x128xf32>
    %44 = arith.select %41, %39, %43 : vector<256x128xi1>, vector<256x128xf32>
    %cst_66 = arith.constant 0.000000e+00 : f32
    %45 = vector.broadcast %cst_66 : f32 to vector<1x18x18x128xf32>
    %c0_67 = arith.constant 0 : index
    %c0_68 = arith.constant 0 : index
    %c0_69 = arith.constant 0 : index
    %c0_70 = arith.constant 0 : index
    %46 = vector.load %arg10[%c0_67, %c0_68, %c0_69, %c0_70] : memref<1x18x18x128xf32, #tpu.memory_space<vmem>>, vector<1x18x18x128xf32>
    tpu.vector_store %arg10[%c0_67, %c0_68, %c0_69, %c0_70], %45 {strides = array<i32>} : memref<1x18x18x128xf32, #tpu.memory_space<vmem>>, vector<1x18x18x128xf32>,
    %47 = vector.shape_cast %44 : vector<256x128xf32> to vector<1x16x16x128xf32>
    %c0_71 = arith.constant 0 : index
    %c1_72 = arith.constant 1 : index
    %c1_73 = arith.constant 1 : index
    %c0_74 = arith.constant 0 : index
    %48 = vector.load %arg10[%c0_71, %c1_72, %c1_73, %c0_74] : memref<1x18x18x128xf32, #tpu.memory_space<vmem>>, vector<1x16x16x128xf32>
    tpu.vector_store %arg10[%c0_71, %c1_72, %c1_73, %c0_74], %47 {strides = array<i32>} : memref<1x18x18x128xf32, #tpu.memory_space<vmem>>, vector<1x16x16x128xf32>,
    %c0_75 = arith.constant 0 : index
    %c0_76 = arith.constant 0 : index
    %c0_77 = arith.constant 0 : index
    %c0_78 = arith.constant 0 : index
    %49 = vector.load %arg10[%c0_75, %c0_76, %c0_77, %c0_78] : memref<1x18x18x128xf32, #tpu.memory_space<vmem>>, vector<1x16x16x128xf32>
    %50 = vector.shape_cast %49 : vector<1x16x16x128xf32> to vector<256x128xf32>
    %c0_79 = arith.constant 0 : index
    %c0_80 = arith.constant 0 : index
    %51 = vector.load %arg12[%c0_79, %c0_80] : memref<256x1152xf32, #tpu.memory_space<vmem>>, vector<256x128xf32>
    tpu.vector_store %arg12[%c0_79, %c0_80], %50 {strides = array<i32>} : memref<256x1152xf32, #tpu.memory_space<vmem>>, vector<256x128xf32>,
    %c0_81 = arith.constant 0 : index
    %c0_82 = arith.constant 0 : index
    %c1_83 = arith.constant 1 : index
    %c0_84 = arith.constant 0 : index
    %52 = vector.load %arg10[%c0_81, %c0_82, %c1_83, %c0_84] : memref<1x18x18x128xf32, #tpu.memory_space<vmem>>, vector<1x16x16x128xf32>
    %53 = vector.shape_cast %52 : vector<1x16x16x128xf32> to vector<256x128xf32>
    %c0_85 = arith.constant 0 : index
    %c128_86 = arith.constant 128 : index
    %54 = vector.load %arg12[%c0_85, %c128_86] : memref<256x1152xf32, #tpu.memory_space<vmem>>, vector<256x128xf32>
    tpu.vector_store %arg12[%c0_85, %c128_86], %53 {strides = array<i32>} : memref<256x1152xf32, #tpu.memory_space<vmem>>, vector<256x128xf32>,
    %c0_87 = arith.constant 0 : index
    %c0_88 = arith.constant 0 : index
    %c2_89 = arith.constant 2 : index
    %c0_90 = arith.constant 0 : index
    %55 = vector.load %arg10[%c0_87, %c0_88, %c2_89, %c0_90] : memref<1x18x18x128xf32, #tpu.memory_space<vmem>>, vector<1x16x16x128xf32>
    %56 = vector.shape_cast %55 : vector<1x16x16x128xf32> to vector<256x128xf32>
    %c0_91 = arith.constant 0 : index
    %c256_92 = arith.constant 256 : index
    %57 = vector.load %arg12[%c0_91, %c256_92] : memref<256x1152xf32, #tpu.memory_space<vmem>>, vector<256x128xf32>
    tpu.vector_store %arg12[%c0_91, %c256_92], %56 {strides = array<i32>} : memref<256x1152xf32, #tpu.memory_space<vmem>>, vector<256x128xf32>,
    %c0_93 = arith.constant 0 : index
    %c1_94 = arith.constant 1 : index
    %c0_95 = arith.constant 0 : index
    %c0_96 = arith.constant 0 : index
    %58 = vector.load %arg10[%c0_93, %c1_94, %c0_95, %c0_96] : memref<1x18x18x128xf32, #tpu.memory_space<vmem>>, vector<1x16x16x128xf32>
    %59 = vector.shape_cast %58 : vector<1x16x16x128xf32> to vector<256x128xf32>
    %c0_97 = arith.constant 0 : index
    %c384_98 = arith.constant 384 : index
    %60 = vector.load %arg12[%c0_97, %c384_98] : memref<256x1152xf32, #tpu.memory_space<vmem>>, vector<256x128xf32>
    tpu.vector_store %arg12[%c0_97, %c384_98], %59 {strides = array<i32>} : memref<256x1152xf32, #tpu.memory_space<vmem>>, vector<256x128xf32>,
    %c0_99 = arith.constant 0 : index
    %c1_100 = arith.constant 1 : index
    %c1_101 = arith.constant 1 : index
    %c0_102 = arith.constant 0 : index
    %61 = vector.load %arg10[%c0_99, %c1_100, %c1_101, %c0_102] : memref<1x18x18x128xf32, #tpu.memory_space<vmem>>, vector<1x16x16x128xf32>
    %62 = vector.shape_cast %61 : vector<1x16x16x128xf32> to vector<256x128xf32>
    %c0_103 = arith.constant 0 : index
    %c512_104 = arith.constant 512 : index
    %63 = vector.load %arg12[%c0_103, %c512_104] : memref<256x1152xf32, #tpu.memory_space<vmem>>, vector<256x128xf32>
    tpu.vector_store %arg12[%c0_103, %c512_104], %62 {strides = array<i32>} : memref<256x1152xf32, #tpu.memory_space<vmem>>, vector<256x128xf32>,
    %c0_105 = arith.constant 0 : index
    %c1_106 = arith.constant 1 : index
    %c2_107 = arith.constant 2 : index
    %c0_108 = arith.constant 0 : index
    %64 = vector.load %arg10[%c0_105, %c1_106, %c2_107, %c0_108] : memref<1x18x18x128xf32, #tpu.memory_space<vmem>>, vector<1x16x16x128xf32>
    %65 = vector.shape_cast %64 : vector<1x16x16x128xf32> to vector<256x128xf32>
    %c0_109 = arith.constant 0 : index
    %c640_110 = arith.constant 640 : index
    %66 = vector.load %arg12[%c0_109, %c640_110] : memref<256x1152xf32, #tpu.memory_space<vmem>>, vector<256x128xf32>
    tpu.vector_store %arg12[%c0_109, %c640_110], %65 {strides = array<i32>} : memref<256x1152xf32, #tpu.memory_space<vmem>>, vector<256x128xf32>,
    %c0_111 = arith.constant 0 : index
    %c2_112 = arith.constant 2 : index
    %c0_113 = arith.constant 0 : index
    %c0_114 = arith.constant 0 : index
    %67 = vector.load %arg10[%c0_111, %c2_112, %c0_113, %c0_114] : memref<1x18x18x128xf32, #tpu.memory_space<vmem>>, vector<1x16x16x128xf32>
    %68 = vector.shape_cast %67 : vector<1x16x16x128xf32> to vector<256x128xf32>
    %c0_115 = arith.constant 0 : index
    %c768_116 = arith.constant 768 : index
    %69 = vector.load %arg12[%c0_115, %c768_116] : memref<256x1152xf32, #tpu.memory_space<vmem>>, vector<256x128xf32>
    tpu.vector_store %arg12[%c0_115, %c768_116], %68 {strides = array<i32>} : memref<256x1152xf32, #tpu.memory_space<vmem>>, vector<256x128xf32>,
    %c0_117 = arith.constant 0 : index
    %c2_118 = arith.constant 2 : index
    %c1_119 = arith.constant 1 : index
    %c0_120 = arith.constant 0 : index
    %70 = vector.load %arg10[%c0_117, %c2_118, %c1_119, %c0_120] : memref<1x18x18x128xf32, #tpu.memory_space<vmem>>, vector<1x16x16x128xf32>
    %71 = vector.shape_cast %70 : vector<1x16x16x128xf32> to vector<256x128xf32>
    %c0_121 = arith.constant 0 : index
    %c896_122 = arith.constant 896 : index
    %72 = vector.load %arg12[%c0_121, %c896_122] : memref<256x1152xf32, #tpu.memory_space<vmem>>, vector<256x128xf32>
    tpu.vector_store %arg12[%c0_121, %c896_122], %71 {strides = array<i32>} : memref<256x1152xf32, #tpu.memory_space<vmem>>, vector<256x128xf32>,
    %c0_123 = arith.constant 0 : index
    %c2_124 = arith.constant 2 : index
    %c2_125 = arith.constant 2 : index
    %c0_126 = arith.constant 0 : index
    %73 = vector.load %arg10[%c0_123, %c2_124, %c2_125, %c0_126] : memref<1x18x18x128xf32, #tpu.memory_space<vmem>>, vector<1x16x16x128xf32>
    %74 = vector.shape_cast %73 : vector<1x16x16x128xf32> to vector<256x128xf32>
    %c0_127 = arith.constant 0 : index
    %c1024_128 = arith.constant 1024 : index
    %75 = vector.load %arg12[%c0_127, %c1024_128] : memref<256x1152xf32, #tpu.memory_space<vmem>>, vector<256x128xf32>
    tpu.vector_store %arg12[%c0_127, %c1024_128], %74 {strides = array<i32>} : memref<256x1152xf32, #tpu.memory_space<vmem>>, vector<256x128xf32>,
    %c0_129 = arith.constant 0 : index
    %c0_130 = arith.constant 0 : index
    %76 = vector.load %arg12[%c0_129, %c0_130] : memref<256x1152xf32, #tpu.memory_space<vmem>>, vector<256x1152xf32>
    %c0_131 = arith.constant 0 : index
    %c0_132 = arith.constant 0 : index
    %77 = vector.load %arg5[%c0_131, %c0_132] : memref<1152x128xf32, #tpu.memory_space<vmem>>, vector<1152x128xf32>
    %cst_133 = arith.constant dense<0.000000e+00> : vector<256x128xf32>
    %78 = tpu.matmul %76, %77, %cst_133 {dimension_numbers = #tpu.dot_dimension_numbers<[1], [0], [0], [1], [0, 0, 1, 1], [], []>} : vector<256x1152xf32>, vector<1152x128xf32>, vector<256x128xf32> -> vector<256x128xf32>
    %c0_134 = arith.constant 0 : index
    %c0_135 = arith.constant 0 : index
    %79 = vector.load %arg6[%c0_134, %c0_135] : memref<1x128xf32, #tpu.memory_space<vmem>>, vector<1x128xf32>
    %80 = vector.broadcast %79 : vector<1x128xf32> to vector<256x128xf32>
    %81 = arith.mulf %78, %80 : vector<256x128xf32>
    %c0_136 = arith.constant 0 : index
    %c0_137 = arith.constant 0 : index
    %82 = vector.load %arg7[%c0_136, %c0_137] : memref<1x128xf32, #tpu.memory_space<vmem>>, vector<1x128xf32>
    %83 = vector.broadcast %82 : vector<1x128xf32> to vector<256x128xf32>
    %84 = arith.addf %81, %83 : vector<256x128xf32>
    %cst_138 = arith.constant 0.000000e+00 : f32
    %85 = vector.broadcast %cst_138 : f32 to vector<256x128xf32>
    %86 = arith.cmpf oge, %84, %85 : vector<256x128xf32>
    %cst_139 = arith.constant 0.00999999977 : f32
    %87 = vector.broadcast %cst_139 : f32 to vector<256x128xf32>
    %88 = arith.mulf %87, %84 : vector<256x128xf32>
    %89 = arith.select %86, %84, %88 : vector<256x128xi1>, vector<256x128xf32>
    %90 = vector.shape_cast %89 : vector<256x128xf32> to vector<1x16x16x128xf32>
    %c0_140 = arith.constant 0 : index
    %c0_141 = arith.constant 0 : index
    %c0_142 = arith.constant 0 : index
    %c0_143 = arith.constant 0 : index
    %91 = vector.load %arg8[%c0_140, %c0_141, %c0_142, %c0_143] : memref<1x16x16x128xf32, #tpu.memory_space<vmem>>, vector<1x16x16x128xf32>
    tpu.vector_store %arg8[%c0_140, %c0_141, %c0_142, %c0_143], %90 {strides = array<i32>} : memref<1x16x16x128xf32, #tpu.memory_space<vmem>>, vector<1x16x16x128xf32>,
    return
  }
  func.func @transform_0(%arg0: i32) -> (i32, i32, i32, i32) {
    %c0_i32 = arith.constant 0 : i32
    %c0_i32_0 = arith.constant 0 : i32
    %c0_i32_1 = arith.constant 0 : i32
    %c0_i32_2 = arith.constant 0 : i32
    return %arg0, %c0_i32, %c0_i32_0, %c0_i32_1 : i32, i32, i32, i32
  }
  func.func @transform_1(%arg0: i32) -> (i32, i32) {
    %c0_i32 = arith.constant 0 : i32
    %c0_i32_0 = arith.constant 0 : i32
    %c0_i32_1 = arith.constant 0 : i32
    return %c0_i32, %c0_i32_0 : i32, i32
  }
  func.func @transform_2(%arg0: i32) -> (i32, i32) {
    %c0_i32 = arith.constant 0 : i32
    %c0_i32_0 = arith.constant 0 : i32
    %c0_i32_1 = arith.constant 0 : i32
    return %c0_i32, %c0_i32_0 : i32, i32
  }
  func.func @transform_3(%arg0: i32) -> (i32, i32) {
    %c0_i32 = arith.constant 0 : i32
    %c0_i32_0 = arith.constant 0 : i32
    %c0_i32_1 = arith.constant 0 : i32
    return %c0_i32, %c0_i32_0 : i32, i32
  }
  func.func @transform_4(%arg0: i32) -> (i32, i32) {
    %c0_i32 = arith.constant 0 : i32
    %c0_i32_0 = arith.constant 0 : i32
    %c0_i32_1 = arith.constant 0 : i32
    return %c0_i32, %c0_i32_0 : i32, i32
  }
  func.func @transform_5(%arg0: i32) -> (i32, i32) {
    %c0_i32 = arith.constant 0 : i32
    %c0_i32_0 = arith.constant 0 : i32
    %c0_i32_1 = arith.constant 0 : i32
    return %c0_i32, %c0_i32_0 : i32, i32
  }
  func.func @transform_6(%arg0: i32) -> (i32, i32) {
    %c0_i32 = arith.constant 0 : i32
    %c0_i32_0 = arith.constant 0 : i32
    %c0_i32_1 = arith.constant 0 : i32
    return %c0_i32, %c0_i32_0 : i32, i32
  }
  func.func @transform_7(%arg0: i32) -> (i32, i32, i32, i32) {
    %c0_i32 = arith.constant 0 : i32
    %c0_i32_0 = arith.constant 0 : i32
    %c0_i32_1 = arith.constant 0 : i32
    %c0_i32_2 = arith.constant 0 : i32
    return %arg0, %c0_i32, %c0_i32_0, %c0_i32_1 : i32, i32, i32, i32
  }
}

</mosaic_0001>

<bundles_post_ra>
// kernel: conv_block_forward.1
= control target key start
LH: loop header
LB: loop body
LE: loop exit
PB: predicated region body
PF: predicated region fallthrough
CT: control target
= control target key end

     0   :  { %12 = vsyncpa [#allocation7], 0  ;;  %s8118_s0 = inlined_call_operand.vmem [shape: f32[2,16,16,4], index: 0, kind: input, shape index: {}]   ;;  %s8119_s1 = inlined_call_operand.hbm [shape: f32[1152,128], index: 1, kind: input, shape index: {}]   ;;  %s8120_s2 = inlined_call_operand.vmem [shape: f32[1,128], index: 2, kind: input, shape index: {}]   ;;  %s8121_s3 = inlined_call_operand.vmem [shape: f32[1,128], index: 3, kind: input, shape index: {}]   ;;  %s8122_s4 = inlined_call_operand.hbm [shape: f32[1152,128], index: 4, kind: input, shape index: {}]   ;;  %s8123_s5 = inlined_call_operand.vmem [shape: f32[1,128], index: 5, kind: input, shape index: {}]   ;;  %s8124_s6 = inlined_call_operand.vmem [shape: f32[1,128], index: 6, kind: input, shape index: {}]   ;;  %s8125_s7 = inlined_call_operand.vmem [shape: f32[2,16,16,128], index: 7, kind: output, shape index: {}]  }
   0x1   :  { %13 = vsyncpa [#allocation9], 0  ;;  %s6519_s24 = smov 0  }
   0x2 LB: > { %s6525_s25 = sadd.s32 4294967295, %s6471_s24   ;;  %p5243_p0 = scmp.ge.s32.totalorder %s6471_s24, 1  ;;  %s6471_s24 = sphi %s6519_s24, %s19_s24  }
   0x3   : > { %p202_p1 = scmp.lt.s32.totalorder %s6471_s24, 3  ;;  %s6473_s26 = smov [#allocation6]  }
   0x4   : > { %s214_s27 = sshll.u32 %s6473_s26, 4  ;;  %p8126_p3 = scmp.eq.s32.totalorder %s6525_s25, 0  ;;  %s215_s27 = int_to_ptr.vmem [resolvable:$true] %s214_s27 }
   0x5   : > { %p6529_p2 = pnand %p5243_p0, %p202_p1  ;;  %s6474_s29 = smov [#allocation8]  }
   0x6   : > { %s233_s30 = sshll.u32 %s6474_s29, 4  ;;  %s6401_s11 = scalar_lea.hbm %s8119_s1, 18432  ;;  %s6542_s30 = int_to_ptr.vmem [resolvable:$true] %s233_s30 }
   0x7   : > { %s8165_s28 = scalar_select %p6529_p2, 1, 0 }
   0x8   : > { %p6374_p4 = pneg %p6529_p2  ;;  %p6402_p6 = scmp.ne.s32.totalorder %s8119_s1, %s6401_s11 }
   0x9   : > { %p6408_p10 = scmp.lt.u32.totalorder %s6401_s11, %s8119_s1 }
   0xa   : > { %p6538_p5 = pnand %p8126_p3, %p6374_p4 }
   0xc   : > { %p6403_p7 = pneg %p6538_p5 }
   0xe   : > { %p6404_p8 = pnand %p6403_p7, %p6402_p6 }
  0x10   : > { %p6405_p9 = pneg %p6404_p8 }
  0x12   : > { %p6410_p11 = pnand %p6408_p10, %p6405_p9 }
  0x14   : > { %6413 = shalt.err (!%p6410_p11)
}
  0x15   : > { %s6414_s16 = scalar_lea.vmem %s215_s27, 18432  ;;  %p6422_p1 = scmp.lt.s32.totalorder %s215_s27, %s215_s27 }
  0x16   : > { %p6415_p12 = scmp.ne.s32.totalorder %s215_s27, %s6414_s16  ;;  %p6423_p4 = scmp.lt.s32.totalorder %s6414_s16, %s6414_s16 }
  0x18   : > { %p6417_p13 = pnand %p6415_p12, %p6403_p7  ;;  %p6424_p3 = por %p6423_p4, %p6422_p1 }
  0x1a   : > { %p6418_p0 = pneg %p6417_p13 }
  0x1c   : > { %p6425_p2 = pnand %p6424_p3, %p6418_p0 }
  0x1e   : > { %6428 = shalt.err (!%p6425_p2)
}
  0x1f   : > { %s6475_s17 = smov 128   ;;  %s6476_s18 = smov 8  }
  0x20   : > { %6377 = dma.hbm_to_vmem [thread:$0]  (!%p6538_p5), %s8119_s1, 18432, %s215_s27, [#allocation7], %s6475_s17, %s6475_s17, %s6476_s18  }
  0x21   : > { %s6429_s23 = scalar_lea.hbm %s8122_s4, 18432 }
  0x22   : > { %p6430_p6 = scmp.ne.s32.totalorder %s8122_s4, %s6429_s23  ;;  %p6436_p8 = scmp.lt.u32.totalorder %s6429_s23, %s8122_s4 }
  0x24   : > { %p6432_p2 = pnand %p6430_p6, %p6403_p7 }
  0x26   : > { %p6433_p3 = pneg %p6432_p2 }
  0x28   : > { %p6438_p9 = pnand %p6436_p8, %p6433_p3 }
  0x2a   : > { %6441 = shalt.err (!%p6438_p9)
}
  0x2b   : > { %s6442_s27 = scalar_lea.vmem %s6542_s30, 18432  ;;  %p6450_p13 = scmp.lt.s32.totalorder %s6542_s30, %s6542_s30 }
  0x2c   : > { %p6443_p10 = scmp.ne.s32.totalorder %s6542_s30, %s6442_s27  ;;  %p6451_p0 = scmp.lt.s32.totalorder %s6442_s27, %s6442_s27 }
  0x2e   : > { %p6445_p11 = pnand %p6443_p10, %p6403_p7  ;;  %p6452_p1 = por %p6451_p0, %p6450_p13 }
  0x30   : > { %p6446_p12 = pneg %p6445_p11 }
  0x32   : > { %p6453_p4 = pnand %p6452_p1, %p6446_p12 }
  0x34   : > { %6456 = shalt.err (!%p6453_p4)
}
  0x35   : > { %6380 = dma.hbm_to_vmem [thread:$0]  (!%p6538_p5), %s8122_s4, 18432, %s6542_s30, [#allocation9], %s6475_s17, %s6475_s17, %s6476_s18  }
  0x36   : > { %p8167_p6 = scmp.ne.s32.totalorder %s8165_s28, 0 }
  0x38   : > { %263 = sbr.rel (%p8167_p6) target bundleno = 1489 (0x5d1), region = 48 }
  0x3f   : > { %p8168_p2 = scmp.eq.s32.totalorder %s6525_s25, 0 }
  0x41   : > { %6462 = dma.done.wait (%p8168_p2), [#allocation7], 18432   ;;  %p8169_p7 = pmov %p8168_p2 }
  0x42   : > { %p8170_p3 = pmov %p8168_p2 }
  0x43   : > { %6464 = vsyncadd (%p8169_p7), [#allocation7], 4294948864 }
  0x44   : > { %6466 = dma.done.wait (%p8170_p3), [#allocation9], 18432   ;;  %p8171_p8 = pmov %p8168_p2 }
  0x45   : > { %v8128_v0 = vmov 0.0|0.0   ;;  %v6478_v1 = vmov 0.0   ;;  %p299_p5 = scmp.lt.s32.totalorder %s6525_s25, 1  ;;  %v1294_v2 = vld [vmem:[#allocation6] sm:$0xff]  ;;  %v1295_v3 = vld [vmem:[#allocation6 + $0x8] sm:$0xff]  ;;  %v1296_v4 = vld [vmem:[#allocation6 + $0x10] sm:$0xff] }
  0x46   : > { %6468 = vsyncadd (%p8171_p8), [#allocation9], 4294948864  ;;  %5518 = vmatprep.subr.bf16.mxu0 %v8128_v0  ;;  %309 = vst [vmem:[#allocation2] sm:$0xff] %v6478_v1  ;;  %v5519_v5 = vpack.c.bf16 %v1295_v3, %v1294_v2  ;;  %v1297_v6 = vld [vmem:[#allocation6 + $0x18] sm:$0xff]  ;;  %v1298_v8 = vld [vmem:[#allocation6 + $0x20] sm:$0xff]  ;;  %vm396_vm0 = vcmask 31744  }
  0x47   : > { %310 = vst [vmem:[#allocation2 + $0x8] sm:$0xff] %v6478_v1  ;;  %311 = vst [vmem:[#allocation2 + $0x10] sm:$0x3] %v6478_v1  ;;  %s8222_s25 = smov (!%p299_p5, %s6525_s25), 1  ;;  %v5522_v7 = vpack.c.bf16 %v1297_v6, %v1296_v4  ;;  %v1299_v9 = vld [vmem:[#allocation6 + $0x28] sm:$0xff]  ;;  %v1300_v11 = vld [vmem:[#allocation6 + $0x30] sm:$0xff] }
  0x48   : > { %312 = vst [vmem:[#allocation2 + $0x18] sm:$0xff] %v6478_v1  ;;  %313 = vst [vmem:[#allocation2 + $0x20] sm:$0xff] %v6478_v1  ;;  %5520 = vmatpush1.bf16.msra.mxu0 %v5519_v5  ;;  %s5260_s28 = sshll.u32 %s8222_s25, 8  ;;  %v5525_v10 = vpack.c.bf16 %v1299_v9, %v1298_v8  ;;  %v1301_v12 = vld [vmem:[#allocation6 + $0x38] sm:$0xff]  ;;  %v1302_v15 = vld [vmem:[#allocation6 + $0x40] sm:$0xff] }
  0x49   : > { %314 = vst [vmem:[#allocation2 + $0x28] sm:$0x3] %v6478_v1  ;;  %315 = vst [vmem:[#allocation2 + $0x30] sm:$0xff] %v6478_v1  ;;  %5521 = vmatprep.subr.bf16.mxu0 %v8128_v0  ;;  %s6722_s13 = scalar_lea.vmem %s8118_s0, %s5260_s28  ;;  %v5528_v14 = vpack.c.bf16 %v1301_v12, %v1300_v11  ;;  %v1303_v16 = vld [vmem:[#allocation6 + $0x48] sm:$0xff]  ;;  %v1304_v24 = vld [vmem:[#allocation6 + $0x50] sm:$0xff]  ;;  %s7997_s26 = scalar_lea.vmem %s8125_s7, %s5260_s28 }
  0x4a   : > { %316 = vst [vmem:[#allocation2 + $0x38] sm:$0xff] %v6478_v1  ;;  %317 = vst [vmem:[#allocation2 + $0x40] sm:$0x3] %v6478_v1  ;;  %v363_v17 = vld [vmem:[%s6722_s13] sm:$0xff]  ;;  %v364_v18 = vld [vmem:[%s6722_s13 + $0x8] sm:$0xff]  ;;  %v5531_v22 = vpack.c.bf16 %v1303_v16, %v1302_v15 }
  0x4b   : > { %318 = vst [vmem:[#allocation2 + $0x48] sm:$0xff] %v6478_v1  ;;  %319 = vst [vmem:[#allocation2 + $0x50] sm:$0xff] %v6478_v1  ;;  %v365_v19 = vld [vmem:[%s6722_s13 + $0x10] sm:$0xff]  ;;  %v366_v20 = vld [vmem:[%s6722_s13 + $0x18] sm:$0xff] }
  0x4c   : > { %320 = vst [vmem:[#allocation2 + $0x58] sm:$0x3] %v6478_v1  ;;  %321 = vst [vmem:[#allocation2 + $0x60] sm:$0xff] %v6478_v1  ;;  %5523 = vmatpush1.bf16.msra.mxu0 %v5522_v7  ;;  %v367_v21 = vld [vmem:[%s6722_s13 + $0x20] sm:$0xff]  ;;  %v368_v23 = vld [vmem:[%s6722_s13 + $0x28] sm:$0xff] }
  0x4d   : > { %322 = vst [vmem:[#allocation2 + $0x68] sm:$0xff] %v6478_v1  ;;  %323 = vst [vmem:[#allocation2 + $0x70] sm:$0x3] %v6478_v1  ;;  %5524 = vmatprep.subr.bf16.mxu0 %v8128_v0  ;;  %v1305_v25 = vld [vmem:[#allocation6 + $0x58] sm:$0xff]  ;;  %v369_v26 = vld [vmem:[%s6722_s13 + $0x30] sm:$0xff] }
  0x4e   : > { %324 = vst [vmem:[#allocation2 + $0x78] sm:$0xff] %v6478_v1  ;;  %325 = vst [vmem:[#allocation2 + $0x80] sm:$0xff] %v6478_v1  ;;  %v493_v13 = vld [vmem:[#allocation2 + $0x1] sm:$0xff]  ;;  %v370_v27 = vld [vmem:[%s6722_s13 + $0x38] sm:$0xff]  ;;  %v5534_v31 = vpack.c.bf16 %v1305_v25, %v1304_v24 }
  0x4f   : > { %326 = vst [vmem:[#allocation2 + $0x88] sm:$0x3] %v6478_v1  ;;  %327 = vst [vmem:[#allocation2 + $0x90] sm:$0xff] %v6478_v1  ;;  %1502 = vmatprep.mubr.f32.mxu0 %v493_v13  ;;  %v371_v28 = vld [vmem:[%s6722_s13 + $0x40] sm:$0xff]  ;;  %v372_v29 = vld [vmem:[%s6722_s13 + $0x48] sm:$0xff] }
  0x50   : > { %328 = vst [vmem:[#allocation2 + $0x98] sm:$0xff] %v6478_v1  ;;  %329 = vst [vmem:[#allocation2 + $0xa0] sm:$0x3] %v6478_v1  ;;  %5526 = vmatpush1.bf16.msra.mxu0 %v5525_v10  ;;  %v373_v30 = vld [vmem:[%s6722_s13 + $0x50] sm:$0xff]  ;;  %v374_v32 = vld [vmem:[%s6722_s13 + $0x58] sm:$0xff] }
  0x51   : > { %330 = vst [vmem:[#allocation2 + $0xa8] sm:$0xff] %v6478_v1  ;;  %331 = vst [vmem:[#allocation2 + $0xb0] sm:$0xff] %v6478_v1  ;;  %5527 = vmatprep.subr.bf16.mxu0 %v8128_v0  ;;  %v1306_v33 = vld [vmem:[#allocation6 + $0x60] sm:$0xff]  ;;  %v1307_v34 = vld [vmem:[#allocation6 + $0x68] sm:$0xff] }
  0x52   : > { %332 = vst [vmem:[#allocation2 + $0xb8] sm:$0x3] %v6478_v1  ;;  %333 = vst [vmem:[#allocation2 + $0xc0] sm:$0xff] %v6478_v1  ;;  %v375_v35 = vld [vmem:[%s6722_s13 + $0x60] sm:$0xff]  ;;  %v5537_v36 = vpack.c.bf16 %v1307_v34, %v1306_v33  ;;  %v1308_v37 = vld [vmem:[#allocation6 + $0x70] sm:$0xff] }
  0x53   : > { %334 = vst [vmem:[#allocation2 + $0xc8] sm:$0xff] %v6478_v1  ;;  %335 = vst [vmem:[#allocation2 + $0xd0] sm:$0x3] %v6478_v1  ;;  %v1309_v38 = vld [vmem:[#allocation6 + $0x78] sm:$0xff]  ;;  %v1310_v40 = vld [vmem:[#allocation6 + $0x80] sm:$0xff] }
  0x54   : > { %336 = vst [vmem:[#allocation2 + $0xd8] sm:$0xff] %v6478_v1  ;;  %337 = vst [vmem:[#allocation2 + $0xe0] sm:$0xff] %v6478_v1  ;;  %5529 = vmatpush1.bf16.msra.mxu0 %v5528_v14  ;;  %v5540_v39 = vpack.c.bf16 %v1309_v38, %v1308_v37  ;;  %v1311_v41 = vld [vmem:[#allocation6 + $0x88] sm:$0xff]  ;;  %v377_v43 = vld [vmem:[%s6722_s13 + $0x70] sm:$0xff] }
  0x55   : > { %338 = vst [vmem:[#allocation2 + $0xe8] sm:$0x3] %v6478_v1  ;;  %339 = vst [vmem:[#allocation2 + $0xf0] sm:$0xff] %v6478_v1  ;;  %5530 = vmatprep.subr.bf16.mxu0 %v8128_v0  ;;  %v376_v42 = vld [vmem:[%s6722_s13 + $0x68] sm:$0xff]  ;;  %v5543_v44 = vpack.c.bf16 %v1311_v41, %v1310_v40  ;;  %v1312_v45 = vld [vmem:[#allocation6 + $0x90] sm:$0xff] }
  0x56   : > { %340 = vst [vmem:[#allocation2 + $0xf8] sm:$0xff] %v6478_v1  ;;  %341 = vst [vmem:[#allocation2 + $0x100] sm:$0x3] %v6478_v1  ;;  %v378_v46 = vld [vmem:[%s6722_s13 + $0x78] sm:$0xff]  ;;  %v379_v47 = vld [vmem:[%s6722_s13 + $0x80] sm:$0xff] }
  0x57   : > { %342 = vst [vmem:[#allocation2 + $0x108] sm:$0xff] %v6478_v1  ;;  %343 = vst [vmem:[#allocation2 + $0x110] sm:$0xff] %v6478_v1  ;;  %v1313_v48 = vld [vmem:[#allocation6 + $0x98] sm:$0xff]  ;;  %v380_v49 = vld [vmem:[%s6722_s13 + $0x88] sm:$0xff] }
  0x58   : > { %344 = vst [vmem:[#allocation2 + $0x118] sm:$0x3] %v6478_v1  ;;  %345 = vst [vmem:[#allocation2 + $0x120] sm:$0xff] %v6478_v1  ;;  %5532 = vmatpush1.bf16.msra.mxu0 %v5531_v22  ;;  %v381_v50 = vld [vmem:[%s6722_s13 + $0x90] sm:$0xff]  ;;  %v382_v51 = vld [vmem:[%s6722_s13 + $0x98] sm:$0xff]  ;;  %v5546_v53 = vpack.c.bf16 %v1313_v48, %v1312_v45 }
  0x59   : > { %346 = vst [vmem:[#allocation2 + $0x128] sm:$0xff] %v6478_v1  ;;  %347 = vst [vmem:[#allocation2 + $0x130] sm:$0x3] %v6478_v1  ;;  %5533 = vmatprep.subr.bf16.mxu0 %v8128_v0  ;;  %v383_v52 = vld [vmem:[%s6722_s13 + $0xa0] sm:$0xff]  ;;  %v384_v55 = vld [vmem:[%s6722_s13 + $0xa8] sm:$0xff] }
  0x5a   : > { %348 = vst [vmem:[#allocation2 + $0x138] sm:$0xff] %v6478_v1  ;;  %349 = vst [vmem:[#allocation2 + $0x140] sm:$0xff] %v6478_v1  ;;  %v1314_v54 = vld [vmem:[#allocation6 + $0xa0] sm:$0xff]  ;;  %v385_v56 = vld [vmem:[%s6722_s13 + $0xb0] sm:$0xff] }
  0x5b   : > { %350 = vst [vmem:[#allocation2 + $0x148] sm:$0x3] %v6478_v1  ;;  %351 = vst [vmem:[#allocation2 + $0x150] sm:$0xff] %v6478_v1  ;;  %v1315_v57 = vld [vmem:[#allocation6 + $0xa8] sm:$0xff]  ;;  %v386_v58 = vld [vmem:[%s6722_s13 + $0xb8] sm:$0xff] }
  0x5c   : > { %352 = vst [vmem:[#allocation2 + $0x158] sm:$0xff] %v6478_v1  ;;  %353 = vst [vmem:[#allocation2 + $0x160] sm:$0x3] %v6478_v1  ;;  %5535 = vmatpush1.bf16.msra.mxu0 %v5534_v31  ;;  %v387_v59 = vld [vmem:[%s6722_s13 + $0xc0] sm:$0xff]  ;;  %v388_v60 = vld [vmem:[%s6722_s13 + $0xc8] sm:$0xff]  ;;  %v5549_v61 = vpack.c.bf16 %v1315_v57, %v1314_v54 }
  0x5d   : > { %354 = vst [vmem:[#allocation2 + $0x168] sm:$0xff] %v6478_v1  ;;  %355 = vst [vmem:[#allocation2 + $0x170] sm:$0xff] %v6478_v1  ;;  %5536 = vmatprep.subr.bf16.mxu0 %v8128_v0  ;;  %v1316_v62 = vld [vmem:[#allocation6 + $0xb0] sm:$0xff]  ;;  %v1317_v63 = vld [vmem:[#allocation6 + $0xb8] sm:$0xff] }
  0x5e   : > { %356 = vst [vmem:[#allocation2 + $0x178] sm:$0x3] %v6478_v1  ;;  %357 = vst [vmem:[#allocation2 + $0x180] sm:$0xff] %v6478_v1  ;;  %v5552_v2 = vpack.c.bf16 %v1317_v63, %v1316_v62  ;;  %v1318_v3 = vld [vmem:[#allocation6 + $0xc0] sm:$0xff]  ;;  %v1319_v4 = vld [vmem:[#allocation6 + $0xc8] sm:$0xff] }
  0x5f   : > { %358 = vst [vmem:[#allocation2 + $0x188] sm:$0xff] %v6478_v1  ;;  %359 = vst [vmem:[#allocation2 + $0x190] sm:$0x3] %v6478_v1  ;;  %v5555_v5 = vpack.c.bf16 %v1319_v4, %v1318_v3  ;;  %v389_v6 = vld [vmem:[%s6722_s13 + $0xd0] sm:$0xff]  ;;  %v390_v7 = vld [vmem:[%s6722_s13 + $0xd8] sm:$0xff] }
  0x60   : > { %360 = vst [vmem:[#allocation2 + $0x198] sm:$0xff] %v6478_v1  ;;  %361 = vst [vmem:[#allocation2 + $0x1a0] sm:$0xff] %v6478_v1  ;;  %5538 = vmatpush1.bf16.msra.mxu0 %v5537_v36  ;;  %v1320_v8 = vld [vmem:[#allocation6 + $0xd0] sm:$0xff]  ;;  %v1321_v9 = vld [vmem:[#allocation6 + $0xd8] sm:$0xff] }
  0x61   : > { %362 = vst [vmem:[#allocation2 + $0x1a8] sm:$0x3] %v6478_v1  ;;  %2737 = vst [vmem:[#allocation3] sm:$0xff] %v6478_v1  ;;  %5539 = vmatprep.subr.bf16.mxu0 %v8128_v0  ;;  %v391_v10 = vld [vmem:[%s6722_s13 + $0xe0] sm:$0xff]  ;;  %v5558_v11 = vpack.c.bf16 %v1321_v9, %v1320_v8  ;;  %v1323_v13 = vld [vmem:[#allocation6 + $0xe8] sm:$0xff] }
  0x62   : > { %2738 = vst [vmem:[#allocation3 + $0x8] sm:$0xff] %v6478_v1  ;;  %2739 = vst [vmem:[#allocation3 + $0x10] sm:$0x3] %v6478_v1  ;;  %v1322_v12 = vld [vmem:[#allocation6 + $0xe0] sm:$0xff]  ;;  %v392_v14 = vld [vmem:[%s6722_s13 + $0xe8] sm:$0xff] }
  0x63   : > { %2740 = vst [vmem:[#allocation3 + $0x18] sm:$0xff] %v6478_v1  ;;  %2741 = vst [vmem:[#allocation3 + $0x20] sm:$0xff] %v6478_v1  ;;  %v5561_v15 = vpack.c.bf16 %v1323_v13, %v1322_v12  ;;  %v1324_v16 = vld [vmem:[#allocation6 + $0xf0] sm:$0xff]  ;;  %v1329_v24 = vld [vmem:[#allocation6 + $0x118] sm:$0xff] }
  0x64   : > { %2742 = vst [vmem:[#allocation3 + $0x28] sm:$0x3] %v6478_v1  ;;  %2743 = vst [vmem:[#allocation3 + $0x30] sm:$0xff] %v6478_v1  ;;  %5541 = vmatpush1.bf16.msra.mxu0 %v5540_v39  ;;  %v494_v22 = vld [vmem:[#allocation2 + $0x9] sm:$0xff]  ;;  %v1333_v33 = vld [vmem:[#allocation6 + $0x138] sm:$0xff] }
  0x65   : > { %2744 = vst [vmem:[#allocation3 + $0x38] sm:$0xff] %v6478_v1  ;;  %2745 = vst [vmem:[#allocation3 + $0x40] sm:$0x3] %v6478_v1  ;;  %5542 = vmatprep.subr.bf16.mxu0 %v8128_v0  ;;  %v1334_v36 = vld [vmem:[#allocation6 + $0x140] sm:$0xff]  ;;  %v1335_v37 = vld [vmem:[#allocation6 + $0x148] sm:$0xff] }
  0x66   : > { %2746 = vst [vmem:[#allocation3 + $0x48] sm:$0xff] %v6478_v1  ;;  %2747 = vst [vmem:[#allocation3 + $0x50] sm:$0xff] %v6478_v1  ;;  %v5579_v39 = vpack.c.bf16 %v1335_v37, %v1334_v36  ;;  %v1339_v48 = vld [vmem:[#allocation6 + $0x168] sm:$0xff]  ;;  %v1342_v57 = vld [vmem:[#allocation6 + $0x180] sm:$0xff] }
  0x67   : > { %2748 = vst [vmem:[#allocation3 + $0x58] sm:$0x3] %v6478_v1  ;;  %2749 = vst [vmem:[#allocation3 + $0x60] sm:$0xff] %v6478_v1  ;;  %v1344_v62 = vld [vmem:[#allocation6 + $0x190] sm:$0xff]  ;;  %v1345_v63 = vld [vmem:[#allocation6 + $0x198] sm:$0xff] }
  0x68   : > { %2750 = vst [vmem:[#allocation3 + $0x68] sm:$0xff] %v6478_v1  ;;  %2751 = vst [vmem:[#allocation3 + $0x70] sm:$0x3] %v6478_v1  ;;  %5544 = vmatpush1.bf16.msra.mxu0 %v5543_v44  ;;  %v5594_v3 = vpack.c.bf16 %v1345_v63, %v1344_v62 }
  0x69   : > { %2752 = vst [vmem:[#allocation3 + $0x78] sm:$0xff] %v6478_v1  ;;  %2753 = vst [vmem:[#allocation3 + $0x80] sm:$0xff] %v6478_v1  ;;  %5545 = vmatprep.subr.bf16.mxu0 %v8128_v0 }
  0x6a   : > { %2754 = vst [vmem:[#allocation3 + $0x88] sm:$0x3] %v6478_v1  ;;  %2755 = vst [vmem:[#allocation3 + $0x90] sm:$0xff] %v6478_v1 }
  0x6b   : > { %2756 = vst [vmem:[#allocation3 + $0x98] sm:$0xff] %v6478_v1  ;;  %2757 = vst [vmem:[#allocation3 + $0xa0] sm:$0x3] %v6478_v1 }
  0x6c   : > { %2758 = vst [vmem:[#allocation3 + $0xa8] sm:$0xff] %v6478_v1  ;;  %2759 = vst [vmem:[#allocation3 + $0xb0] sm:$0xff] %v6478_v1  ;;  %5547 = vmatpush1.bf16.msra.mxu0 %v5546_v53  ;;  %v1341_v53 = vld [vmem:[#allocation6 + $0x178] sm:$0xff] }
  0x6d   : > { %2760 = vst [vmem:[#allocation3 + $0xb8] sm:$0x3] %v6478_v1  ;;  %2761 = vst [vmem:[#allocation3 + $0xc0] sm:$0xff] %v6478_v1  ;;  %5548 = vmatprep.subr.bf16.mxu0 %v8128_v0 }
  0x6e   : > { %2762 = vst [vmem:[#allocation3 + $0xc8] sm:$0xff] %v6478_v1  ;;  %2763 = vst [vmem:[#allocation3 + $0xd0] sm:$0x3] %v6478_v1 }
  0x6f   : > { %2764 = vst [vmem:[#allocation3 + $0xd8] sm:$0xff] %v6478_v1  ;;  %2765 = vst [vmem:[#allocation3 + $0xe0] sm:$0xff] %v6478_v1 }
  0x70   : > { %2766 = vst [vmem:[#allocation3 + $0xe8] sm:$0x3] %v6478_v1  ;;  %2767 = vst [vmem:[#allocation3 + $0xf0] sm:$0xff] %v6478_v1  ;;  %5550 = vmatpush1.bf16.msra.mxu0 %v5549_v61 }
  0x71   : > { %2768 = vst [vmem:[#allocation3 + $0xf8] sm:$0xff] %v6478_v1  ;;  %2769 = vst [vmem:[#allocation3 + $0x100] sm:$0x3] %v6478_v1  ;;  %5551 = vmatprep.subr.bf16.mxu0 %v8128_v0 }
  0x72   : > { %2770 = vst [vmem:[#allocation3 + $0x108] sm:$0xff] %v6478_v1  ;;  %2771 = vst [vmem:[#allocation3 + $0x110] sm:$0xff] %v6478_v1 }
  0x73   : > { %2772 = vst [vmem:[#allocation3 + $0x118] sm:$0x3] %v6478_v1  ;;  %2773 = vst [vmem:[#allocation3 + $0x120] sm:$0xff] %v6478_v1 }
  0x74   : > { %2774 = vst [vmem:[#allocation3 + $0x128] sm:$0xff] %v6478_v1  ;;  %2775 = vst [vmem:[#allocation3 + $0x130] sm:$0x3] %v6478_v1  ;;  %5553 = vmatpush1.bf16.msra.mxu0 %v5552_v2 }
  0x75   : > { %2776 = vst [vmem:[#allocation3 + $0x138] sm:$0xff] %v6478_v1  ;;  %2777 = vst [vmem:[#allocation3 + $0x140] sm:$0xff] %v6478_v1  ;;  %5554 = vmatprep.subr.bf16.mxu0 %v8128_v0 }
  0x76   : > { %2778 = vst [vmem:[#allocation3 + $0x148] sm:$0x3] %v6478_v1  ;;  %2779 = vst [vmem:[#allocation3 + $0x150] sm:$0xff] %v6478_v1 }
  0x77   : > { %2780 = vst [vmem:[#allocation3 + $0x158] sm:$0xff] %v6478_v1  ;;  %2781 = vst [vmem:[#allocation3 + $0x160] sm:$0x3] %v6478_v1 }
  0x78   : > { %2782 = vst [vmem:[#allocation3 + $0x168] sm:$0xff] %v6478_v1  ;;  %2783 = vst [vmem:[#allocation3 + $0x170] sm:$0xff] %v6478_v1  ;;  %5556 = vmatpush1.bf16.msra.mxu0 %v5555_v5  ;;  %v1346_v5 = vld [vmem:[#allocation6 + $0x1a0] sm:$0xff] }
  0x79   : > { %2784 = vst [vmem:[#allocation3 + $0x178] sm:$0x3] %v6478_v1  ;;  %2785 = vst [vmem:[#allocation3 + $0x180] sm:$0xff] %v6478_v1  ;;  %5557 = vmatprep.subr.bf16.mxu0 %v8128_v0 }
  0x7a   : > { %2786 = vst [vmem:[#allocation3 + $0x188] sm:$0xff] %v6478_v1  ;;  %2787 = vst [vmem:[#allocation3 + $0x190] sm:$0x3] %v6478_v1 }
  0x7b   : > { %2788 = vst [vmem:[#allocation3 + $0x198] sm:$0xff] %v6478_v1  ;;  %2789 = vst [vmem:[#allocation3 + $0x1a0] sm:$0xff] %v6478_v1 }
  0x7c   : > { %2790 = vst [vmem:[#allocation3 + $0x1a8] sm:$0x3] %v6478_v1  ;;  %397 = vst.msk [vmem:[#allocation2 + $0x19] sm:$0xff] %vm396_vm0, %v363_v17  ;;  %5559 = vmatpush1.bf16.msra.mxu0 %v5558_v11  ;;  %v1325_v17 = vld [vmem:[#allocation6 + $0xf8] sm:$0xff] }
  0x7d   : > { %398 = vst.msk [vmem:[#allocation2 + $0x21] sm:$0xff] %vm396_vm0, %v364_v18  ;;  %399 = vst.msk [vmem:[#allocation2 + $0x31] sm:$0xff] %vm396_vm0, %v365_v19  ;;  %5560 = vmatprep.subr.bf16.mxu0 %v8128_v0  ;;  %v5564_v18 = vpack.c.bf16 %v1325_v17, %v1324_v16  ;;  %v1326_v19 = vld [vmem:[#allocation6 + $0x100] sm:$0xff]  ;;  %v1349_v11 = vld [vmem:[#allocation6 + $0x1b8] sm:$0xff] }
  0x7e   : > { %400 = vst.msk [vmem:[#allocation2 + $0x39] sm:$0xff] %vm396_vm0, %v366_v20  ;;  %401 = vst.msk [vmem:[#allocation2 + $0x49] sm:$0xff] %vm396_vm0, %v367_v21  ;;  %v1327_v20 = vld [vmem:[#allocation6 + $0x108] sm:$0xff] }
  0x7f   : > { %402 = vst.msk [vmem:[#allocation2 + $0x51] sm:$0xff] %vm396_vm0, %v368_v23  ;;  %403 = vst.msk [vmem:[#allocation2 + $0x61] sm:$0xff] %vm396_vm0, %v369_v26  ;;  %v5567_v21 = vpack.c.bf16 %v1327_v20, %v1326_v19  ;;  %v1328_v23 = vld [vmem:[#allocation6 + $0x110] sm:$0xff]  ;;  %v1351_v16 = vld [vmem:[#allocation6 + $0x1c8] sm:$0xff] }
  0x80   : > { %404 = vst.msk [vmem:[#allocation2 + $0x69] sm:$0xff] %vm396_vm0, %v370_v27  ;;  %405 = vst.msk [vmem:[#allocation2 + $0x79] sm:$0xff] %vm396_vm0, %v371_v28  ;;  %5562 = vmatpush1.bf16.msra.mxu0 %v5561_v15  ;;  %v5570_v25 = vpack.c.bf16 %v1329_v24, %v1328_v23  ;;  %v1330_v27 = vld [vmem:[#allocation6 + $0x120] sm:$0xff]  ;;  %v1331_v28 = vld [vmem:[#allocation6 + $0x128] sm:$0xff] }
  0x81   : > { %406 = vst.msk [vmem:[#allocation2 + $0x81] sm:$0xff] %vm396_vm0, %v372_v29  ;;  %407 = vst.msk [vmem:[#allocation2 + $0x91] sm:$0xff] %vm396_vm0, %v373_v30  ;;  %5563 = vmatprep.subr.bf16.mxu0 %v8128_v0  ;;  %v5573_v30 = vpack.c.bf16 %v1331_v28, %v1330_v27  ;;  %v1350_v15 = vld [vmem:[#allocation6 + $0x1c0] sm:$0xff]  ;;  %v1352_v20 = vld [vmem:[#allocation6 + $0x1d0] sm:$0xff] }
  0x82   : > { %408 = vst.msk [vmem:[#allocation2 + $0x99] sm:$0xff] %vm396_vm0, %v374_v32  ;;  %409 = vst.msk [vmem:[#allocation2 + $0xa9] sm:$0xff] %vm396_vm0, %v375_v35  ;;  %v1332_v32 = vld [vmem:[#allocation6 + $0x130] sm:$0xff]  ;;  %v1355_v27 = vld [vmem:[#allocation6 + $0x1e8] sm:$0xff] }
  0x83   : > { %410 = vst.msk [vmem:[#allocation2 + $0xb1] sm:$0xff] %vm396_vm0, %v376_v42  ;;  %411 = vst.msk [vmem:[#allocation2 + $0xc1] sm:$0xff] %vm396_vm0, %v377_v43  ;;  %v6799_v26 = vld [vmem:[#allocation2 + $0x19] sm:$0xff]  ;;  %v1336_v42 = vld [vmem:[#allocation6 + $0x150] sm:$0xff] }
  0x84   : > { %412 = vst.msk [vmem:[#allocation2 + $0xc9] sm:$0xff] %vm396_vm0, %v378_v46  ;;  %413 = vst.msk [vmem:[#allocation2 + $0xd9] sm:$0xff] %vm396_vm0, %v379_v47  ;;  %5565 = vmatpush1.bf16.msra.mxu0 %v5564_v18  ;;  %v6804_v29 = vld [vmem:[#allocation2 + $0x18] sm:$0xff]  ;;  %v6806_v31 = vld [vmem:[#allocation2 + $0x21] sm:$0xff]  ;;  %v5603_v18 = vpack.c.bf16 %v1351_v16, %v1350_v15 }
  0x85   : > { %414 = vst.msk [vmem:[#allocation2 + $0xe1] sm:$0xff] %vm396_vm0, %v380_v49  ;;  %415 = vst.msk [vmem:[#allocation2 + $0xf1] sm:$0xff] %vm396_vm0, %v381_v50  ;;  %5566 = vmatprep.subr.bf16.mxu0 %v8128_v0  ;;  %v6811_v34 = vld [vmem:[#allocation2 + $0x20] sm:$0xff]  ;;  %v6813_v35 = vld [vmem:[#allocation2 + $0x31] sm:$0xff] }
  0x86   : > { %416 = vst.msk [vmem:[#allocation2 + $0xf9] sm:$0xff] %vm396_vm0, %v382_v51  ;;  %417 = vst.msk [vmem:[#allocation2 + $0x109] sm:$0xff] %vm396_vm0, %v383_v52  ;;  %v6818_v38 = vld [vmem:[#allocation2 + $0x30] sm:$0xff]  ;;  %v6822_v41 = vld [vmem:[#allocation2 + $0x39] sm:$0xff] }
  0x87   : > { %418 = vst.msk [vmem:[#allocation2 + $0x111] sm:$0xff] %vm396_vm0, %v384_v55  ;;  %419 = vst.msk [vmem:[#allocation2 + $0x121] sm:$0xff] %vm396_vm0, %v385_v56  ;;  %1503 = vmatmul.mubr.f32.vlgmr.msra.gmra.mrb[0].mxu0 %v6478_v1  ;;  %v6820_v40 = vld [vmem:[#allocation2 + $0x32] sm:$0xff]  ;;  %v6830_v46 = vld [vmem:[#allocation2 + $0x49] sm:$0xff] }
  0x88   : > { %420 = vst.msk [vmem:[#allocation2 + $0x129] sm:$0xff] %vm396_vm0, %v386_v58  ;;  %421 = vst.msk [vmem:[#allocation2 + $0x139] sm:$0xff] %vm396_vm0, %v387_v59  ;;  %5568 = vmatpush1.bf16.msra.mxu0 %v5567_v21  ;;  %1507 = vmatprep.mubr.f32.mxu0 %v494_v22  ;;  %v1337_v43 = vld [vmem:[#allocation6 + $0x158] sm:$0xff]  ;;  %v1338_v47 = vld [vmem:[#allocation6 + $0x160] sm:$0xff] }
  0x89   : > { %422 = vst.msk [vmem:[#allocation2 + $0x141] sm:$0xff] %vm396_vm0, %v388_v60  ;;  %423 = vst.msk [vmem:[#allocation2 + $0x151] sm:$0xff] %vm396_vm0, %v389_v6  ;;  %5569 = vmatprep.subr.bf16.mxu0 %v8128_v0  ;;  %5390 = vmatprep.mubr.f32.mxu1 %v6820_v40  ;;  %v6828_v44 = vld [vmem:[#allocation2 + $0x38] sm:$0xff]  ;;  %v5582_v45 = vpack.c.bf16 %v1337_v43, %v1336_v42  ;;  %v6835_v49 = vld [vmem:[#allocation2 + $0x48] sm:$0xff]  ;;  %v5585_v50 = vpack.c.bf16 %v1339_v48, %v1338_v47 }
  0x8a   : > { %424 = vst.msk [vmem:[#allocation2 + $0x159] sm:$0xff] %vm396_vm0, %v390_v7  ;;  %425 = vst.msk [vmem:[#allocation2 + $0x169] sm:$0xff] %vm396_vm0, %v391_v10  ;;  %v6837_v51 = vld [vmem:[#allocation2 + $0x51] sm:$0xff]  ;;  %v6844_v56 = vld [vmem:[#allocation2 + $0x61] sm:$0xff] }
  0x8b   : > { %426 = vst.msk [vmem:[#allocation2 + $0x171] sm:$0xff] %vm396_vm0, %v392_v14  ;;  %1508 = vmatmul.mubr.f32.gmra.mrb[2].mxu0 %v6478_v1  ;;  %v5576_v1 = vpack.c.bf16 %v1333_v33, %v1332_v32  ;;  %v1340_v52 = vld [vmem:[#allocation6 + $0x170] sm:$0xff]  ;;  %v1343_v58 = vld [vmem:[#allocation6 + $0x188] sm:$0xff]  ;;  %v6849_v59 = vld [vmem:[#allocation2 + $0x60] sm:$0xff] }
  0x8c   : > { %1512 = vmatprep.mubr.f32.mxu0 %v6799_v26  ;;  %5571 = vmatpush1.bf16.msra.mxu0 %v5570_v25  ;;  %v6842_v54 = vld [vmem:[#allocation2 + $0x50] sm:$0xff]  ;;  %v5588_v55 = vpack.c.bf16 %v1341_v53, %v1340_v52  ;;  %v5591_v60 = vpack.c.bf16 %v1343_v58, %v1342_v57  ;;  %v6856_v2 = vld [vmem:[#allocation2 + $0x68] sm:$0xff]  ;;  %v6858_v4 = vld [vmem:[#allocation2 + $0x79] sm:$0xff] }
  0x8d   : > { %5572 = vmatprep.subr.bf16.mxu0 %v8128_v0  ;;  %v6851_v61 = vld [vmem:[#allocation2 + $0x69] sm:$0xff]  ;;  %v6863_v7 = vld [vmem:[#allocation2 + $0x78] sm:$0xff]  ;;  %v6865_v9 = vld [vmem:[#allocation2 + $0x81] sm:$0xff] }
  0x8e   : > { %v1347_v6 = vld [vmem:[#allocation6 + $0x1a8] sm:$0xff]  ;;  %v1348_v10 = vld [vmem:[#allocation6 + $0x1b0] sm:$0xff]  ;;  %v6870_v12 = vld [vmem:[#allocation2 + $0x80] sm:$0xff] }
  0x8f   : > { %1513 = vmatmul.mubr.f32.gmra.mrb[4].mxu0 %v6804_v29  ;;  %v5597_v8 = vpack.c.bf16 %v1347_v6, %v1346_v5  ;;  %v5600_v13 = vpack.c.bf16 %v1349_v11, %v1348_v10  ;;  %v6872_v14 = vld [vmem:[#allocation2 + $0x91] sm:$0xff]  ;;  %v6879_v19 = vld [vmem:[#allocation2 + $0x99] sm:$0xff]  ;;  %v6886_v24 = vld [vmem:[#allocation2 + $0xa9] sm:$0xff] }
  0x90   : > { %1517 = vmatprep.mubr.f32.mxu0 %v6806_v31  ;;  %5574 = vmatpush1.bf16.msra.mxu0 %v5573_v30  ;;  %v6877_v17 = vld [vmem:[#allocation2 + $0x90] sm:$0xff]  ;;  %v1353_v21 = vld [vmem:[#allocation6 + $0x1d8] sm:$0xff]  ;;  %v1354_v25 = vld [vmem:[#allocation6 + $0x1e0] sm:$0xff] }
  0x91   : > { %5575 = vmatprep.subr.bf16.mxu0 %v8128_v0  ;;  %v6884_v22 = vld [vmem:[#allocation2 + $0x98] sm:$0xff]  ;;  %v5606_v23 = vpack.c.bf16 %v1353_v21, %v1352_v20  ;;  %v6891_v28 = vld [vmem:[#allocation2 + $0xa8] sm:$0xff]  ;;  %v5609_v30 = vpack.c.bf16 %v1355_v27, %v1354_v25  ;;  %v1356_v33 = vld [vmem:[#allocation6 + $0x1f0] sm:$0xff] }
  0x92   : > { %v6893_v32 = vld [vmem:[#allocation2 + $0xb1] sm:$0xff]  ;;  %v6905_v42 = vld [vmem:[#allocation2 + $0xc0] sm:$0xff]  ;;  %v6907_v43 = vld [vmem:[#allocation2 + $0xc9] sm:$0xff] }
  0x93   : > { %1518 = vmatmul.mubr.f32.gmra.mrb[6].mxu0 %v6811_v34  ;;  %v6898_v36 = vld [vmem:[#allocation2 + $0xb0] sm:$0xff]  ;;  %v6914_v47 = vld [vmem:[#allocation2 + $0xd9] sm:$0xff]  ;;  %v6942_v62 = vld [vmem:[#allocation2 + $0x108] sm:$0xff] }
  0x94   : > { %1522 = vmatprep.mubr.f32.mxu0 %v6813_v35  ;;  %5577 = vmatpush1.bf16.msra.mxu0 %v5576_v1  ;;  %v1357_v1 = vld [vmem:[#allocation6 + $0x1f8] sm:$0xff]  ;;  %v6924_v52 = vld [vmem:[#allocation2 + $0xe0] sm:$0xff]  ;;  %v6960_v10 = vld [vmem:[#allocation2 + $0x128] sm:$0xff] }
  0x95   : > { %5578 = vmatprep.subr.bf16.mxu0 %v8128_v0  ;;  %v5612_v37 = vpack.c.bf16 %v1357_v1, %v1356_v33  ;;  %v6918_v48 = vld [vmem:[#allocation2 + $0xd8] sm:$0xff]  ;;  %v6950_v5 = vld [vmem:[#allocation2 + $0x121] sm:$0xff]  ;;  %v6978_v20 = vld [vmem:[#allocation2 + $0x150] sm:$0xff] }
  0x96   : > { %v6926_v53 = vld [vmem:[#allocation2 + $0xf1] sm:$0xff]  ;;  %v6932_v57 = vld [vmem:[#allocation2 + $0xf9] sm:$0xff]  ;;  %8173 = vst [vmem:[#allocation13_spill] sm:$0xff] %v6950_v5  ;;  %v6968_v15 = vld [vmem:[#allocation2 + $0x141] sm:$0xff] }
  0x97   : > { %1523 = vmatmul.mubr.f32.gmra.mrb[8].mxu0 %v6818_v38  ;;  %v6936_v58 = vld [vmem:[#allocation2 + $0xf8] sm:$0xff]  ;;  %v6954_v6 = vld [vmem:[#allocation2 + $0x120] sm:$0xff]  ;;  %8176 = vst [vmem:[#allocation16_spill] sm:$0xff] %v6968_v15  ;;  %v6988_v27 = vld [vmem:[#allocation2 + $0x169] sm:$0xff] }
  0x98   : > { %1527 = vmatprep.mubr.f32.mxu0 %v6822_v41  ;;  %5580 = vmatpush1.bf16.msra.mxu0 %v5579_v39  ;;  %v6900_v39 = vld [vmem:[#allocation2 + $0xc1] sm:$0xff]  ;;  %v6944_v63 = vld [vmem:[#allocation2 + $0x111] sm:$0xff]  ;;  %v6962_v11 = vld [vmem:[#allocation2 + $0x139] sm:$0xff]  ;;  %8179 = vst [vmem:[#allocation19_spill] sm:$0xff] %v6988_v27 }
  0x99   : > { %5581 = vmatprep.subr.bf16.mxu0 %v8128_v0  ;;  %8172 = vst [vmem:[#allocation12_spill] sm:$0xff] %v6944_v63  ;;  %8175 = vst [vmem:[#allocation15_spill] sm:$0xff] %v6962_v11  ;;  %v6972_v16 = vld [vmem:[#allocation2 + $0x140] sm:$0xff]  ;;  %v6986_v25 = vld [vmem:[#allocation2 + $0x158] sm:$0xff] }
  0x9a   : > { %v6980_v21 = vld [vmem:[#allocation2 + $0x159] sm:$0xff]  ;;  %v6994_v33 = vld [vmem:[#allocation2 + $0x168] sm:$0xff]  ;;  %v6996_v1 = vld [vmem:[#allocation2 + $0x171] sm:$0xff] }
  0x9b   : > { %1528 = vmatmul.mubr.f32.gmra.mrb[10].mxu0 %v6828_v44  ;;  %8178 = vst [vmem:[#allocation18_spill] sm:$0xff] %v6980_v21  ;;  %8180 = vst [vmem:[#allocation20_spill] sm:$0xff] %v6996_v1 }
  0x9c   : > { %1532 = vmatprep.mubr.f32.mxu0 %v6830_v46  ;;  %5583 = vmatpush1.bf16.msra.mxu0 %v5582_v45  ;;  %v6912_v45 = vld [vmem:[#allocation2 + $0xc8] sm:$0xff] }
  0x9d   : > { %5584 = vmatprep.subr.bf16.mxu0 %v8128_v0 }
  0x9f   : > { %1533 = vmatmul.mubr.f32.gmra.mrb[12].mxu0 %v6835_v49 }
  0xa0   : > { %1537 = vmatprep.mubr.f32.mxu0 %v6837_v51  ;;  %5586 = vmatpush1.bf16.msra.mxu0 %v5585_v50  ;;  %v6920_v50 = vld [vmem:[#allocation2 + $0xe1] sm:$0xff] }
  0xa1   : > { %5587 = vmatprep.subr.bf16.mxu0 %v8128_v0 }
  0xa3   : > { %1538 = vmatmul.mubr.f32.gmra.mrb[14].mxu0 %v6842_v54 }
  0xa4   : > { %1542 = vmatprep.mubr.f32.mxu0 %v6844_v56  ;;  %5589 = vmatpush1.bf16.msra.mxu0 %v5588_v55  ;;  %v6930_v55 = vld [vmem:[#allocation2 + $0xf0] sm:$0xff] }
  0xa5   : > { %5590 = vmatprep.subr.bf16.mxu0 %v8128_v0 }
  0xa7   : > { %1543 = vmatmul.mubr.f32.gmra.mrb[16].mxu0 %v6849_v59 }
  0xa8   : > { %1547 = vmatprep.mubr.f32.mxu0 %v6851_v61  ;;  %5592 = vmatpush1.bf16.msra.mxu0 %v5591_v60  ;;  %v6938_v60 = vld [vmem:[#allocation2 + $0x109] sm:$0xff] }
  0xa9   : > { %5593 = vmatprep.subr.bf16.mxu0 %v8128_v0 }
  0xab   : > { %1548 = vmatmul.mubr.f32.gmra.mrb[18].mxu0 %v6856_v2 }
  0xac   : > { %1552 = vmatprep.mubr.f32.mxu0 %v6858_v4  ;;  %5595 = vmatpush1.bf16.msra.mxu0 %v5594_v3  ;;  %v6948_v3 = vld [vmem:[#allocation2 + $0x110] sm:$0xff] }
  0xad   : > { %5596 = vmatprep.subr.bf16.mxu0 %v8128_v0 }
  0xaf   : > { %1553 = vmatmul.mubr.f32.gmra.mrb[20].mxu0 %v6863_v7 }
  0xb0   : > { %1557 = vmatprep.mubr.f32.mxu0 %v6865_v9  ;;  %5598 = vmatpush1.bf16.msra.mxu0 %v5597_v8  ;;  %v6956_v8 = vld [vmem:[#allocation2 + $0x129] sm:$0xff] }
  0xb1   : > { %5599 = vmatprep.subr.bf16.mxu0 %v8128_v0  ;;  %8174 = vst [vmem:[#allocation14_spill] sm:$0xff] %v6956_v8 }
  0xb3   : > { %1558 = vmatmul.mubr.f32.gmra.mrb[22].mxu0 %v6870_v12 }
  0xb4   : > { %1562 = vmatprep.mubr.f32.mxu0 %v6872_v14  ;;  %5601 = vmatpush1.bf16.msra.mxu0 %v5600_v13  ;;  %v6966_v13 = vld [vmem:[#allocation2 + $0x138] sm:$0xff] }
  0xb5   : > { %5602 = vmatprep.subr.bf16.mxu0 %v8128_v0 }
  0xb7   : > { %1563 = vmatmul.mubr.f32.gmra.mrb[24].mxu0 %v6877_v17 }
  0xb8   : > { %1567 = vmatprep.mubr.f32.mxu0 %v6879_v19  ;;  %5604 = vmatpush1.bf16.msra.mxu0 %v5603_v18  ;;  %v6974_v18 = vld [vmem:[#allocation2 + $0x151] sm:$0xff] }
  0xb9   : > { %5605 = vmatprep.subr.bf16.mxu0 %v8128_v0  ;;  %8177 = vst [vmem:[#allocation17_spill] sm:$0xff] %v6974_v18 }
  0xbb   : > { %1568 = vmatmul.mubr.f32.gmra.mrb[26].mxu0 %v6884_v22 }
  0xbc   : > { %1572 = vmatprep.mubr.f32.mxu0 %v6886_v24  ;;  %5607 = vmatpush1.bf16.msra.mxu0 %v5606_v23  ;;  %v393_v23 = vld [vmem:[%s6722_s13 + $0xf0] sm:$0xff] }
  0xbd   : > { %5608 = vmatprep.subr.bf16.mxu0 %v8128_v0  ;;  %427 = vst.msk [vmem:[#allocation2 + $0x181] sm:$0xff] %vm396_vm0, %v393_v23  ;;  %v1358_v23 = vld [vmem:[#allocation6 + $0x200] sm:$0xff] }
  0xbf   : > { %1573 = vmatmul.mubr.f32.gmra.mrb[28].mxu0 %v6891_v28 }
  0xc0   : > { %1577 = vmatprep.mubr.f32.mxu0 %v6893_v32  ;;  %5610 = vmatpush1.bf16.msra.mxu0 %v5609_v30  ;;  %v394_v30 = vld [vmem:[%s6722_s13 + $0xf8] sm:$0xff] }
  0xc1   : > { %5611 = vmatprep.subr.bf16.mxu0 %v8128_v0  ;;  %428 = vst.msk [vmem:[#allocation2 + $0x189] sm:$0xff] %vm396_vm0, %v394_v30  ;;  %v557_v30 = vld [vmem:[#allocation2 + $0x2] sm:$0xff] }
  0xc3   : > { %1578 = vmatmul.mubr.f32.gmra.mrb[30].mxu0 %v6898_v36 }
  0xc4   : > { %1582 = vmatprep.mubr.f32.mxu0 %v6900_v39  ;;  %5613 = vmatpush1.bf16.msra.mxu0 %v5612_v37  ;;  %v7000_v37 = vld [vmem:[#allocation2 + $0x170] sm:$0xff] }
  0xc5   : > { %5614 = vmatprep.subr.bf16.mxu0 %v8128_v0  ;;  %v1359_v0 = vld [vmem:[#allocation6 + $0x208] sm:$0xff] }
  0xc7   : > { %1583 = vmatmul.mubr.f32.gmra.mrb[32].mxu0 %v6905_v42 }
  0xc8   : > { %1587 = vmatprep.mubr.f32.mxu0 %v6907_v43 }
  0xcb   : > { %1588 = vmatmul.mubr.f32.gmra.mrb[34].mxu0 %v6912_v45 }
  0xcc   : > { %1592 = vmatprep.mubr.f32.mxu0 %v6914_v47 }
  0xcf   : > { %1593 = vmatmul.mubr.f32.gmra.mrb[36].mxu0 %v6918_v48 }
  0xd0   : > { %1597 = vmatprep.mubr.f32.mxu0 %v6920_v50 }
  0xd3   : > { %1598 = vmatmul.mubr.f32.gmra.mrb[38].mxu0 %v6924_v52 }
  0xd4   : > { %1602 = vmatprep.mubr.f32.mxu0 %v6926_v53 }
  0xd7   : > { %1603 = vmatmul.mubr.f32.gmra.mrb[40].mxu0 %v6930_v55 }
  0xd8   : > { %1607 = vmatprep.mubr.f32.mxu0 %v6932_v57 }
  0xdb   : > { %1608 = vmatmul.mubr.f32.gmra.mrb[42].mxu0 %v6936_v58 }
  0xdc   : > { %1612 = vmatprep.mubr.f32.mxu0 %v6938_v60 }
  0xdf   : > { %1613 = vmatmul.mubr.f32.gmra.mrb[44].mxu0 %v6942_v62 }
  0xe0   : > { %1617 = vmatprep.mubr.f32.mxu0 %v6944_v63  ;;  %v7007_v63 = vld [vmem:[#allocation2 + $0x1a] sm:$0xff] }
  0xe3   : > { %1618 = vmatmul.mubr.f32.gmra.mrb[46].mxu0 %v6948_v3 }
  0xe4   : > { %1622 = vmatprep.mubr.f32.mxu0 %v6950_v5  ;;  %v1363_v5 = vld [vmem:[#allocation6 + $0x228] sm:$0xff] }
  0xe7   : > { %1623 = vmatmul.mubr.f32.gmra.mrb[48].mxu0 %v6954_v6 }
  0xe8   : > { %1627 = vmatprep.mubr.f32.mxu0 %v6956_v8  ;;  %v8181_v8 = vmov 0.0|0.0  }
  0xeb   : > { %1628 = vmatmul.mubr.f32.gmra.mrb[50].mxu0 %v6960_v10 }
  0xec   : > { %1632 = vmatprep.mubr.f32.mxu0 %v6962_v11 }
  0xef   : > { %1633 = vmatmul.mubr.f32.gmra.mrb[52].mxu0 %v6966_v13 }
  0xf0   : > { %1637 = vmatprep.mubr.f32.mxu0 %v6968_v15  ;;  %v558_v15 = vld [vmem:[#allocation2 + $0xa] sm:$0xff] }
  0xf3   : > { %1638 = vmatmul.mubr.f32.gmra.mrb[54].mxu0 %v6972_v16 }
  0xf4   : > { %1642 = vmatprep.mubr.f32.mxu0 %v6974_v18  ;;  %v1360_v18 = vld [vmem:[#allocation6 + $0x210] sm:$0xff] }
  0xf7   : > { %1643 = vmatmul.mubr.f32.gmra.mrb[56].mxu0 %v6978_v20 }
  0xf8   : > { %1647 = vmatprep.mubr.f32.mxu0 %v6980_v21  ;;  %v5615_v21 = vpack.c.bf16 %v1359_v0, %v1358_v23  ;;  %v1364_v0 = vld [vmem:[#allocation6 + $0x230] sm:$0xff]  ;;  %v1365_v23 = vld [vmem:[#allocation6 + $0x238] sm:$0xff] }
  0xfb   : > { %1648 = vmatmul.mubr.f32.gmra.mrb[58].mxu0 %v6986_v25 }
  0xfc   : > { %1652 = vmatprep.mubr.f32.mxu0 %v6988_v27  ;;  %v1361_v27 = vld [vmem:[#allocation6 + $0x218] sm:$0xff] }
  0xfd   : > { %v5618_v11 = vpack.c.bf16 %v1361_v27, %v1360_v18  ;;  %v5624_v18 = vpack.c.bf16 %v1365_v23, %v1364_v0  ;;  %v1372_v0 = vld [vmem:[#allocation6 + $0x270] sm:$0xff] }
  0xfe   : > { %v7030_v23 = vld [vmem:[#allocation2 + $0x52] sm:$0xff] }
  0xff   : > { %1653 = vmatmul.mubr.f32.gmra.mrb[60].mxu0 %v6994_v33 }
 0x100   : > { %1657 = vmatprep.mubr.f32.mxu0 %v6996_v1  ;;  %v1362_v1 = vld [vmem:[#allocation6 + $0x220] sm:$0xff] }
 0x103   : > { %1658 = vmatmul.mubr.f32.gmra.mrb[62].mxu0 %v7000_v37 }
 0x104   : > { %1727 = vmatprep.mubr.f32.mxu0 %v6804_v29  ;;  %v5621_v29 = vpack.c.bf16 %v1363_v5, %v1362_v1  ;;  %v1370_v1 = vld [vmem:[#allocation6 + $0x260] sm:$0xff] }
 0x107   : > { %1728 = vmatmul.mubr.f32.vlgmr.msra.gmra.mrb[0].mxu0 %v557_v30  ;;  %v1371_v30 = vld [vmem:[#allocation6 + $0x268] sm:$0xff] }
 0x108   : > { %5616 = vmatpush1.bf16.msra.mxu0 %v5615_v21  ;;  %1732 = vmatprep.mubr.f32.mxu0 %v6811_v34  ;;  %v7012_v34 = vld [vmem:[#allocation2 + $0x22] sm:$0xff]  ;;  %v1369_v21 = vld [vmem:[#allocation6 + $0x258] sm:$0xff] }
 0x109   : > { %5617 = vmatprep.subr.bf16.mxu0 %v8181_v8 }
 0x10b   : > { %1733 = vmatmul.mubr.f32.gmra.mrb[2].mxu0 %v558_v15  ;;  %v1366_v15 = vld [vmem:[#allocation6 + $0x240] sm:$0xff] }
 0x10c   : > { %1737 = vmatprep.mubr.f32.mxu0 %v6818_v38  ;;  %5619 = vmatpush1.bf16.msra.mxu0 %v5618_v11  ;;  %v1367_v38 = vld [vmem:[#allocation6 + $0x248] sm:$0xff]  ;;  %v1368_v11 = vld [vmem:[#allocation6 + $0x250] sm:$0xff] }
 0x10d   : > { %5620 = vmatprep.subr.bf16.mxu0 %v8181_v8  ;;  %v5627_v5 = vpack.c.bf16 %v1367_v38, %v1366_v15  ;;  %v5630_v27 = vpack.c.bf16 %v1369_v21, %v1368_v11  ;;  %v1374_v15 = vld [vmem:[#allocation6 + $0x280] sm:$0xff]  ;;  %v1376_v11 = vld [vmem:[#allocation6 + $0x290] sm:$0xff] }
 0x10e   : > { %v7035_v38 = vld [vmem:[#allocation2 + $0x62] sm:$0xff]  ;;  %v7040_v21 = vld [vmem:[#allocation2 + $0x6a] sm:$0xff] }
 0x10f   : > { %1738 = vmatmul.mubr.f32.gmra.mrb[4].mxu0 %v7007_v63 }
 0x110   : > { %1742 = vmatprep.mubr.f32.mxu0 %v6828_v44  ;;  %5622 = vmatpush1.bf16.msra.mxu0 %v5621_v29  ;;  %v7020_v44 = vld [vmem:[#allocation2 + $0x3a] sm:$0xff]  ;;  %v5633_v29 = vpack.c.bf16 %v1371_v30, %v1370_v1 }
 0x111   : > { %5623 = vmatprep.subr.bf16.mxu0 %v8181_v8  ;;  %v1378_v1 = vld [vmem:[#allocation6 + $0x2a0] sm:$0xff] }
 0x112   : > { %v7045_v30 = vld [vmem:[#allocation2 + $0x7a] sm:$0xff] }
 0x113   : > { %1743 = vmatmul.mubr.f32.gmra.mrb[6].mxu0 %v7012_v34 }
 0x114   : > { %1747 = vmatprep.mubr.f32.mxu0 %v6835_v49  ;;  %5625 = vmatpush1.bf16.msra.mxu0 %v5624_v18  ;;  %v7025_v49 = vld [vmem:[#allocation2 + $0x4a] sm:$0xff] }
 0x115   : > { %5626 = vmatprep.subr.bf16.mxu0 %v8181_v8 }
 0x117   : > { %1748 = vmatmul.mubr.f32.gmra.mrb[8].mxu0 %v6820_v40 }
 0x118   : > { %1752 = vmatprep.mubr.f32.mxu0 %v6842_v54  ;;  %5628 = vmatpush1.bf16.msra.mxu0 %v5627_v5  ;;  %v1373_v54 = vld [vmem:[#allocation6 + $0x278] sm:$0xff] }
 0x119   : > { %5629 = vmatprep.subr.bf16.mxu0 %v8181_v8  ;;  %v5636_v18 = vpack.c.bf16 %v1373_v54, %v1372_v0  ;;  %v1380_v0 = vld [vmem:[#allocation6 + $0x2b0] sm:$0xff]  ;;  %v7050_v54 = vld [vmem:[#allocation2 + $0x82] sm:$0xff] }
 0x11b   : > { %1753 = vmatmul.mubr.f32.gmra.mrb[10].mxu0 %v7020_v44 }
 0x11c   : > { %1757 = vmatprep.mubr.f32.mxu0 %v6849_v59  ;;  %5631 = vmatpush1.bf16.msra.mxu0 %v5630_v27  ;;  %v1375_v59 = vld [vmem:[#allocation6 + $0x288] sm:$0xff] }
 0x11d   : > { %5632 = vmatprep.subr.bf16.mxu0 %v8181_v8  ;;  %v5639_v5 = vpack.c.bf16 %v1375_v59, %v1374_v15  ;;  %v1382_v15 = vld [vmem:[#allocation6 + $0x2c0] sm:$0xff]  ;;  %v7055_v59 = vld [vmem:[#allocation2 + $0x92] sm:$0xff] }
 0x11f   : > { %1758 = vmatmul.mubr.f32.gmra.mrb[12].mxu0 %v7025_v49 }
 0x120   : > { %1762 = vmatprep.mubr.f32.mxu0 %v6856_v2  ;;  %5634 = vmatpush1.bf16.msra.mxu0 %v5633_v29  ;;  %v1377_v2 = vld [vmem:[#allocation6 + $0x298] sm:$0xff] }
 0x121   : > { %5635 = vmatprep.subr.bf16.mxu0 %v8181_v8  ;;  %v5642_v27 = vpack.c.bf16 %v1377_v2, %v1376_v11  ;;  %v1384_v11 = vld [vmem:[#allocation6 + $0x2d0] sm:$0xff]  ;;  %v7060_v2 = vld [vmem:[#allocation2 + $0x9a] sm:$0xff] }
 0x123   : > { %1763 = vmatmul.mubr.f32.gmra.mrb[14].mxu0 %v7030_v23 }
 0x124   : > { %1767 = vmatprep.mubr.f32.mxu0 %v6863_v7  ;;  %5637 = vmatpush1.bf16.msra.mxu0 %v5636_v18  ;;  %v1379_v7 = vld [vmem:[#allocation6 + $0x2a8] sm:$0xff] }
 0x125   : > { %5638 = vmatprep.subr.bf16.mxu0 %v8181_v8  ;;  %v5645_v29 = vpack.c.bf16 %v1379_v7, %v1378_v1  ;;  %v1386_v1 = vld [vmem:[#allocation6 + $0x2e0] sm:$0xff]  ;;  %v7065_v7 = vld [vmem:[#allocation2 + $0xaa] sm:$0xff] }
 0x127   : > { %1768 = vmatmul.mubr.f32.gmra.mrb[16].mxu0 %v7035_v38 }
 0x128   : > { %1772 = vmatprep.mubr.f32.mxu0 %v6870_v12  ;;  %5640 = vmatpush1.bf16.msra.mxu0 %v5639_v5  ;;  %v1381_v12 = vld [vmem:[#allocation6 + $0x2b8] sm:$0xff] }
 0x129   : > { %5641 = vmatprep.subr.bf16.mxu0 %v8181_v8  ;;  %v5648_v18 = vpack.c.bf16 %v1381_v12, %v1380_v0  ;;  %v1388_v0 = vld [vmem:[#allocation6 + $0x2f0] sm:$0xff] }
 0x12a   : > { %v7070_v12 = vld [vmem:[#allocation2 + $0xb2] sm:$0xff] }
 0x12b   : > { %1773 = vmatmul.mubr.f32.gmra.mrb[18].mxu0 %v7040_v21 }
 0x12c   : > { %1777 = vmatprep.mubr.f32.mxu0 %v6877_v17  ;;  %5643 = vmatpush1.bf16.msra.mxu0 %v5642_v27  ;;  %v1383_v17 = vld [vmem:[#allocation6 + $0x2c8] sm:$0xff] }
 0x12d   : > { %5644 = vmatprep.subr.bf16.mxu0 %v8181_v8  ;;  %v5651_v5 = vpack.c.bf16 %v1383_v17, %v1382_v15  ;;  %v7084_v15 = vld [vmem:[#allocation2 + $0xda] sm:$0xff]  ;;  %v7092_v17 = vld [vmem:[#allocation2 + $0xf2] sm:$0xff] }
 0x12f   : > { %1778 = vmatmul.mubr.f32.gmra.mrb[20].mxu0 %v7045_v30 }
 0x130   : > { %1782 = vmatprep.mubr.f32.mxu0 %v6884_v22  ;;  %5646 = vmatpush1.bf16.msra.mxu0 %v5645_v29  ;;  %v1385_v22 = vld [vmem:[#allocation6 + $0x2d8] sm:$0xff] }
 0x131   : > { %5647 = vmatprep.subr.bf16.mxu0 %v8181_v8  ;;  %v5654_v27 = vpack.c.bf16 %v1385_v22, %v1384_v11  ;;  %v1425_v22 = vld [vmem:[#allocation6 + $0x418] sm:$0xff] }
 0x133   : > { %1783 = vmatmul.mubr.f32.gmra.mrb[22].mxu0 %v7050_v54 }
 0x134   : > { %1787 = vmatprep.mubr.f32.mxu0 %v6891_v28  ;;  %5649 = vmatpush1.bf16.msra.mxu0 %v5648_v18  ;;  %v1387_v28 = vld [vmem:[#allocation6 + $0x2e8] sm:$0xff] }
 0x135   : > { %5650 = vmatprep.subr.bf16.mxu0 %v8181_v8  ;;  %v5657_v29 = vpack.c.bf16 %v1387_v28, %v1386_v1  ;;  %v1426_v1 = vld [vmem:[#allocation6 + $0x420] sm:$0xff]  ;;  %v1427_v28 = vld [vmem:[#allocation6 + $0x428] sm:$0xff] }
 0x137   : > { %1788 = vmatmul.mubr.f32.gmra.mrb[24].mxu0 %v7055_v59 }
 0x138   : > { %1792 = vmatprep.mubr.f32.mxu0 %v6898_v36  ;;  %5652 = vmatpush1.bf16.msra.mxu0 %v5651_v5  ;;  %v1389_v36 = vld [vmem:[#allocation6 + $0x2f8] sm:$0xff]  ;;  %v1423_v5 = vld [vmem:[#allocation6 + $0x408] sm:$0xff] }
 0x139   : > { %5653 = vmatprep.subr.bf16.mxu0 %v8181_v8  ;;  %v5660_v18 = vpack.c.bf16 %v1389_v36, %v1388_v0  ;;  %v1428_v0 = vld [vmem:[#allocation6 + $0x430] sm:$0xff]  ;;  %v1429_v36 = vld [vmem:[#allocation6 + $0x438] sm:$0xff] }
 0x13b   : > { %1793 = vmatmul.mubr.f32.gmra.mrb[26].mxu0 %v7060_v2 }
 0x13c   : > { %1797 = vmatprep.mubr.f32.mxu0 %v6905_v42  ;;  %5655 = vmatpush1.bf16.msra.mxu0 %v5654_v27  ;;  %v7075_v42 = vld [vmem:[#allocation2 + $0xc2] sm:$0xff] }
 0x13d   : > { %5656 = vmatprep.subr.bf16.mxu0 %v8181_v8 }
 0x13f   : > { %1798 = vmatmul.mubr.f32.gmra.mrb[28].mxu0 %v7065_v7 }
 0x140   : > { %1802 = vmatprep.mubr.f32.mxu0 %v6912_v45  ;;  %5658 = vmatpush1.bf16.msra.mxu0 %v5657_v29  ;;  %v7080_v45 = vld [vmem:[#allocation2 + $0xca] sm:$0xff]  ;;  %v7116_v29 = vld [vmem:[#allocation2 + $0x13a] sm:$0xff] }
 0x141   : > { %5659 = vmatprep.subr.bf16.mxu0 %v8181_v8 }
 0x143   : > { %1803 = vmatmul.mubr.f32.gmra.mrb[30].mxu0 %v7070_v12 }
 0x144   : > { %1807 = vmatprep.mubr.f32.mxu0 %v6918_v48  ;;  %5661 = vmatpush1.bf16.msra.mxu0 %v5660_v18  ;;  %v7088_v48 = vld [vmem:[#allocation2 + $0xe2] sm:$0xff] }
 0x145   : > { %5662 = vmatprep.subr.bf16.mxu0 %v8181_v8  ;;  %v7120_v18 = vld [vmem:[#allocation2 + $0x142] sm:$0xff] }
 0x147   : > { %1808 = vmatmul.mubr.f32.gmra.mrb[32].mxu0 %v7075_v42 }
 0x148   : > { %1812 = vmatprep.mubr.f32.mxu0 %v6924_v52  ;;  %v7096_v52 = vld [vmem:[#allocation2 + $0xfa] sm:$0xff] }
 0x14b   : > { %1813 = vmatmul.mubr.f32.gmra.mrb[34].mxu0 %v7080_v45 }
 0x14c   : > { %1817 = vmatprep.mubr.f32.mxu0 %v6930_v55  ;;  %v7100_v55 = vld [vmem:[#allocation2 + $0x10a] sm:$0xff] }
 0x14f   : > { %1818 = vmatmul.mubr.f32.gmra.mrb[36].mxu0 %v7084_v15 }
 0x150   : > { %1822 = vmatprep.mubr.f32.mxu0 %v6936_v58  ;;  %v7104_v58 = vld [vmem:[#allocation2 + $0x112] sm:$0xff] }
 0x153   : > { %1823 = vmatmul.mubr.f32.gmra.mrb[38].mxu0 %v7088_v48 }
 0x154   : > { %1827 = vmatprep.mubr.f32.mxu0 %v6942_v62  ;;  %v1422_v62 = vld [vmem:[#allocation6 + $0x400] sm:$0xff] }
 0x155   : > { %v5710_v11 = vpack.c.bf16 %v1423_v5, %v1422_v62  ;;  %v1430_v62 = vld [vmem:[#allocation6 + $0x440] sm:$0xff]  ;;  %v1431_v5 = vld [vmem:[#allocation6 + $0x448] sm:$0xff] }
 0x157   : > { %1828 = vmatmul.mubr.f32.gmra.mrb[40].mxu0 %v7092_v17  ;;  %5711 = vmatprep.subr.bf16.mxu1 %v5710_v11 }
 0x158   : > { %1832 = vmatprep.mubr.f32.mxu0 %v6948_v3  ;;  %v7108_v3 = vld [vmem:[#allocation2 + $0x122] sm:$0xff]  ;;  %5713 = vmatpush3.bf16.msra.mxu1 %v5710_v11  ;;  %v7124_v11 = vld [vmem:[#allocation2 + $0x152] sm:$0xff] }
 0x15b   : > { %1833 = vmatmul.mubr.f32.gmra.mrb[42].mxu0 %v7096_v52 }
 0x15c   : > { %1837 = vmatprep.mubr.f32.mxu0 %v6954_v6  ;;  %v1424_v6 = vld [vmem:[#allocation6 + $0x410] sm:$0xff] }
 0x15d   : > { %v5714_v27 = vpack.c.bf16 %v1425_v22, %v1424_v6  ;;  %v1432_v6 = vld [vmem:[#allocation6 + $0x450] sm:$0xff]  ;;  %v1433_v22 = vld [vmem:[#allocation6 + $0x458] sm:$0xff] }
 0x15f   : > { %1838 = vmatmul.mubr.f32.gmra.mrb[44].mxu0 %v7100_v55  ;;  %5715 = vmatprep.subr.bf16.mxu1 %v5714_v27 }
 0x160   : > { %1842 = vmatprep.mubr.f32.mxu0 %v6960_v10  ;;  %v7112_v10 = vld [vmem:[#allocation2 + $0x12a] sm:$0xff]  ;;  %5717 = vmatpush3.bf16.msra.mxu1 %v5714_v27  ;;  %v7128_v27 = vld [vmem:[#allocation2 + $0x15a] sm:$0xff] }
 0x163   : > { %1843 = vmatmul.mubr.f32.gmra.mrb[46].mxu0 %v7104_v58 }
 0x164   : > { %1847 = vmatprep.mubr.f32.mxu0 %v6966_v13  ;;  %v5718_v13 = vpack.c.bf16 %v1427_v28, %v1426_v1  ;;  %v7130_v1 = vld [vmem:[#allocation2 + $0x180] sm:$0xff] }
 0x165   : > { %v1434_v28 = vld [vmem:[#allocation6 + $0x460] sm:$0xff] }
 0x166   : > { %5719 = vmatprep.subr.bf16.mxu1 %v5718_v13 }
 0x167   : > { %1848 = vmatmul.mubr.f32.gmra.mrb[48].mxu0 %v7108_v3  ;;  %5721 = vmatpush3.bf16.msra.mxu1 %v5718_v13  ;;  %v1435_v13 = vld [vmem:[#allocation6 + $0x468] sm:$0xff] }
 0x168   : > { %1852 = vmatprep.mubr.f32.mxu0 %v6972_v16  ;;  %v5722_v16 = vpack.c.bf16 %v1429_v36, %v1428_v0  ;;  %v7134_v0 = vld [vmem:[#allocation2 + $0x16a] sm:$0xff] }
 0x169   : > { %v7136_v36 = vld [vmem:[#allocation2 + $0x188] sm:$0xff] }
 0x16a   : > { %5723 = vmatprep.subr.bf16.mxu1 %v5722_v16 }
 0x16b   : > { %1853 = vmatmul.mubr.f32.gmra.mrb[50].mxu0 %v7112_v10  ;;  %5725 = vmatpush3.bf16.msra.mxu1 %v5722_v16  ;;  %v1437_v16 = vld [vmem:[#allocation6 + $0x478] sm:$0xff] }
 0x16c   : > { %1857 = vmatprep.mubr.f32.mxu0 %v6978_v20  ;;  %v5726_v20 = vpack.c.bf16 %v1431_v5, %v1430_v62  ;;  %v7140_v5 = vld [vmem:[#allocation2 + $0x172] sm:$0xff] }
 0x16e   : > { %5727 = vmatprep.subr.bf16.mxu1 %v5726_v20 }
 0x16f   : > { %1858 = vmatmul.mubr.f32.gmra.mrb[52].mxu0 %v7116_v29  ;;  %5729 = vmatpush3.bf16.msra.mxu1 %v5726_v20  ;;  %v1390_v20 = vld [vmem:[#allocation6 + $0x300] sm:$0xff] }
 0x170   : > { %1862 = vmatprep.mubr.f32.mxu0 %v6986_v25  ;;  %v5730_v25 = vpack.c.bf16 %v1433_v22, %v1432_v6  ;;  %v1391_v6 = vld [vmem:[#allocation6 + $0x308] sm:$0xff] }
 0x171   : > { %v5663_v22 = vpack.c.bf16 %v1391_v6, %v1390_v20 }
 0x172   : > { %5731 = vmatprep.subr.bf16.mxu1 %v5730_v25 }
 0x173   : > { %1863 = vmatmul.mubr.f32.gmra.mrb[54].mxu0 %v7120_v18  ;;  %5733 = vmatpush3.bf16.msra.mxu1 %v5730_v25  ;;  %v1392_v25 = vld [vmem:[#allocation6 + $0x310] sm:$0xff] }
 0x174   : > { %1867 = vmatprep.mubr.f32.mxu0 %v6994_v33  ;;  %v5734_v33 = vpack.c.bf16 %v1435_v13, %v1434_v28  ;;  %v1393_v28 = vld [vmem:[#allocation6 + $0x318] sm:$0xff] }
 0x175   : > { %v5666_v13 = vpack.c.bf16 %v1393_v28, %v1392_v25 }
 0x176   : > { %5735 = vmatprep.subr.bf16.mxu1 %v5734_v33 }
 0x177   : > { %1868 = vmatmul.mubr.f32.gmra.mrb[56].mxu0 %v7124_v11  ;;  %5737 = vmatpush3.bf16.msra.mxu1 %v5734_v33  ;;  %v1394_v33 = vld [vmem:[#allocation6 + $0x320] sm:$0xff] }
 0x178   : > { %1872 = vmatprep.mubr.f32.mxu0 %v7000_v37  ;;  %v1436_v37 = vld [vmem:[#allocation6 + $0x470] sm:$0xff] }
 0x179   : > { %v5738_v62 = vpack.c.bf16 %v1437_v16, %v1436_v37  ;;  %v1395_v37 = vld [vmem:[#allocation6 + $0x328] sm:$0xff]  ;;  %v1397_v16 = vld [vmem:[#allocation6 + $0x338] sm:$0xff] }
 0x17b   : > { %1873 = vmatmul.mubr.f32.gmra.mrb[58].mxu0 %v7128_v27  ;;  %5739 = vmatprep.subr.bf16.mxu1 %v5738_v62 }
 0x17c   : > { %1877 = vmatprep.mubr.f32.mxu0 %v7130_v1  ;;  %5741 = vmatpush3.bf16.msra.mxu1 %v5738_v62 }
 0x17d   : > { %5742 = vmatprep.subr.bf16.mxu1 %v8181_v8 }
 0x17f   : > { %1878 = vmatmul.mubr.f32.gmra.mrb[60].mxu0 %v7134_v0  ;;  %5391 = vmatmul.mubr.f32.vlgmr.msra.gmra.mrb[0].mxu1 %v7020_v44 }
 0x180   : > { %1882 = vmatprep.mubr.f32.mxu0 %v7136_v36  ;;  %5393 = vmatprep.mubr.f32.mxu1 %v7025_v49 }
 0x183   : > { %1883 = vmatmul.mubr.f32.gmra.mrb[62].mxu0 %v7140_v5  ;;  %5394 = vmatmul.mubr.f32.gmra.mrb[2].mxu1 %v7030_v23 }
 0x184   : > { %1952 = vmatprep.mubr.f32.mxu0 %v7007_v63  ;;  %5396 = vmatprep.mubr.f32.mxu1 %v7035_v38  ;;  %v5669_v63 = vpack.c.bf16 %v1395_v37, %v1394_v33 }
 0x187   : > { %1953 = vmatmul.mubr.f32.vlgmr.msra.gmra.mrb[0].mxu0 %v6799_v26  ;;  %v1396_v26 = vld [vmem:[#allocation6 + $0x330] sm:$0xff]  ;;  %5397 = vmatmul.mubr.f32.gmra.mrb[4].mxu1 %v7040_v21 }
 0x188   : > { %5664 = vmatpush1.bf16.msra.mxu0 %v5663_v22  ;;  %1957 = vmatprep.mubr.f32.mxu0 %v7012_v34  ;;  %v5672_v34 = vpack.c.bf16 %v1397_v16, %v1396_v26  ;;  %v779_v26 = vld [vmem:[#allocation2 + $0x182] sm:$0xff] }
 0x189   : > { %5665 = vmatprep.subr.bf16.mxu0 %v8181_v8  ;;  %5399 = vmatprep.mubr.f32.mxu1 %v7045_v30 }
 0x18b   : > { %1958 = vmatmul.mubr.f32.gmra.mrb[2].mxu0 %v6806_v31  ;;  %v1398_v31 = vld [vmem:[#allocation6 + $0x340] sm:$0xff]  ;;  %5400 = vmatmul.mubr.f32.gmra.mrb[6].mxu1 %v7050_v54 }
 0x18c   : > { %1962 = vmatprep.mubr.f32.mxu0 %v6820_v40  ;;  %5667 = vmatpush1.bf16.msra.mxu0 %v5666_v13  ;;  %v1399_v40 = vld [vmem:[#allocation6 + $0x348] sm:$0xff] }
 0x18d   : > { %5668 = vmatprep.subr.bf16.mxu0 %v8181_v8  ;;  %5402 = vmatprep.mubr.f32.mxu1 %v7055_v59  ;;  %v5675_v62 = vpack.c.bf16 %v1399_v40, %v1398_v31  ;;  %v815_v40 = vld [vmem:[#allocation2 + $0x38] sm:$0xff] }
 0x18f   : > { %1963 = vmatmul.mubr.f32.gmra.mrb[4].mxu0 %v6813_v35  ;;  %v1400_v35 = vld [vmem:[#allocation6 + $0x350] sm:$0xff]  ;;  %5403 = vmatmul.mubr.f32.gmra.mrb[8].mxu1 %v7060_v2 }
 0x190   : > { %1967 = vmatprep.mubr.f32.mxu0 %v7020_v44  ;;  %5670 = vmatpush1.bf16.msra.mxu0 %v5669_v63  ;;  %v1401_v44 = vld [vmem:[#allocation6 + $0x358] sm:$0xff] }
 0x191   : > { %5671 = vmatprep.subr.bf16.mxu0 %v8181_v8  ;;  %5405 = vmatprep.mubr.f32.mxu1 %v7065_v7  ;;  %v5678_v20 = vpack.c.bf16 %v1401_v44, %v1400_v35  ;;  %v3695_v44 = vld [vmem:[#allocation8 + $0x30] sm:$0xff] }
 0x193   : > { %1968 = vmatmul.mubr.f32.gmra.mrb[6].mxu0 %v6822_v41  ;;  %v1402_v41 = vld [vmem:[#allocation6 + $0x360] sm:$0xff]  ;;  %5406 = vmatmul.mubr.f32.gmra.mrb[10].mxu1 %v7070_v12 }
 0x194   : > { %1972 = vmatprep.mubr.f32.mxu0 %v7025_v49  ;;  %5673 = vmatpush1.bf16.msra.mxu0 %v5672_v34  ;;  %v1403_v49 = vld [vmem:[#allocation6 + $0x368] sm:$0xff] }
 0x195   : > { %5674 = vmatprep.subr.bf16.mxu0 %v8181_v8  ;;  %5408 = vmatprep.mubr.f32.mxu1 %v7075_v42  ;;  %v5681_v6 = vpack.c.bf16 %v1403_v49, %v1402_v41  ;;  %v780_v34 = vld [vmem:[#allocation2 + $0x18a] sm:$0xff]  ;;  %v3817_v41 = vld [vmem:[#allocation8 + $0x400] sm:$0xff] }
 0x196   : > { %v816_v49 = vld [vmem:[#allocation2 + $0x48] sm:$0xff] }
 0x197   : > { %1973 = vmatmul.mubr.f32.gmra.mrb[8].mxu0 %v6830_v46  ;;  %v1404_v46 = vld [vmem:[#allocation6 + $0x370] sm:$0xff]  ;;  %5409 = vmatmul.mubr.f32.gmra.mrb[12].mxu1 %v7080_v45 }
 0x198   : > { %1977 = vmatprep.mubr.f32.mxu0 %v7030_v23  ;;  %5676 = vmatpush1.bf16.msra.mxu0 %v5675_v62  ;;  %v1405_v23 = vld [vmem:[#allocation6 + $0x378] sm:$0xff]  ;;  %v880_v62 = vld [vmem:[#allocation2 + $0x49] sm:$0xff] }
 0x199   : > { %5677 = vmatprep.subr.bf16.mxu0 %v8181_v8  ;;  %5411 = vmatprep.mubr.f32.mxu1 %v7084_v15  ;;  %v5684_v22 = vpack.c.bf16 %v1405_v23, %v1404_v46  ;;  %v881_v46 = vld [vmem:[#allocation2 + $0x51] sm:$0xff] }
 0x19b   : > { %1978 = vmatmul.mubr.f32.gmra.mrb[10].mxu0 %v6837_v51  ;;  %v1406_v51 = vld [vmem:[#allocation6 + $0x380] sm:$0xff]  ;;  %5412 = vmatmul.mubr.f32.gmra.mrb[14].mxu1 %v7088_v48 }
 0x19c   : > { %1982 = vmatprep.mubr.f32.mxu0 %v7035_v38  ;;  %5679 = vmatpush1.bf16.msra.mxu0 %v5678_v20  ;;  %v1407_v38 = vld [vmem:[#allocation6 + $0x388] sm:$0xff]  ;;  %v3696_v20 = vld [vmem:[#allocation8 + $0x38] sm:$0xff] }
 0x19d   : > { %5680 = vmatprep.subr.bf16.mxu0 %v8181_v8  ;;  %5414 = vmatprep.mubr.f32.mxu1 %v7092_v17  ;;  %v5687_v25 = vpack.c.bf16 %v1407_v38, %v1406_v51  ;;  %v3697_v51 = vld [vmem:[#allocation8 + $0x40] sm:$0xff]  ;;  %v3698_v38 = vld [vmem:[#allocation8 + $0x48] sm:$0xff] }
 0x19f   : > { %1983 = vmatmul.mubr.f32.gmra.mrb[12].mxu0 %v6844_v56  ;;  %v1408_v56 = vld [vmem:[#allocation6 + $0x390] sm:$0xff]  ;;  %5415 = vmatmul.mubr.f32.gmra.mrb[16].mxu1 %v7096_v52 }
 0x1a0   : > { %1987 = vmatprep.mubr.f32.mxu0 %v7040_v21  ;;  %5682 = vmatpush1.bf16.msra.mxu0 %v5681_v6  ;;  %v1409_v21 = vld [vmem:[#allocation6 + $0x398] sm:$0xff]  ;;  %v3818_v6 = vld [vmem:[#allocation8 + $0x408] sm:$0xff] }
 0x1a1   : > { %5683 = vmatprep.subr.bf16.mxu0 %v8181_v8  ;;  %5417 = vmatprep.mubr.f32.mxu1 %v7100_v55  ;;  %v5690_v28 = vpack.c.bf16 %v1409_v21, %v1408_v56  ;;  %v7254_v23 = vpack.c.bf16 %v3818_v6, %v3817_v41  ;;  %v882_v56 = vld [vmem:[#allocation2 + $0x61] sm:$0xff]  ;;  %v5755_v21 = vpack.c.bf16 %v3698_v38, %v3697_v51  ;;  %v830_v41 = vld [vmem:[#allocation2 + $0xf0] sm:$0xff]  ;;  %v831_v6 = vld [vmem:[#allocation2 + $0xf8] sm:$0xff] }
 0x1a2   : > { %v897_v51 = vld [vmem:[#allocation2 + $0x111] sm:$0xff] }
 0x1a3   : > { %1988 = vmatmul.mubr.f32.gmra.mrb[14].mxu0 %v6851_v61  ;;  %v1410_v61 = vld [vmem:[#allocation6 + $0x3a0] sm:$0xff]  ;;  %5418 = vmatmul.mubr.f32.gmra.mrb[18].mxu1 %v7104_v58  ;;  %v833_v38 = vld [vmem:[#allocation2 + $0x110] sm:$0xff] }
 0x1a4   : > { %1992 = vmatprep.mubr.f32.mxu0 %v7045_v30  ;;  %5685 = vmatpush1.bf16.msra.mxu0 %v5684_v22  ;;  %v1411_v30 = vld [vmem:[#allocation6 + $0x3a8] sm:$0xff]  ;;  %v5752_v22 = vpack.c.bf16 %v3696_v20, %v3695_v44  ;;  %v829_v44 = vld [vmem:[#allocation2 + $0xe0] sm:$0xff]  ;;  %v894_v20 = vld [vmem:[#allocation2 + $0xf1] sm:$0xff] }
 0x1a5   : > { %5686 = vmatprep.subr.bf16.mxu0 %v8181_v8  ;;  %5420 = vmatprep.mubr.f32.mxu1 %v7108_v3  ;;  %v5693_v13 = vpack.c.bf16 %v1411_v30, %v1410_v61  ;;  %v3700_v61 = vld [vmem:[#allocation8 + $0x58] sm:$0xff]  ;;  %v818_v30 = vld [vmem:[#allocation2 + $0x60] sm:$0xff] }
 0x1a7   : > { %1993 = vmatmul.mubr.f32.gmra.mrb[16].mxu0 %v6858_v4  ;;  %v1412_v4 = vld [vmem:[#allocation6 + $0x3b0] sm:$0xff]  ;;  %5421 = vmatmul.mubr.f32.gmra.mrb[20].mxu1 %v7112_v10 }
 0x1a8   : > { %1997 = vmatprep.mubr.f32.mxu0 %v7050_v54  ;;  %5688 = vmatpush1.bf16.msra.mxu0 %v5687_v25  ;;  %v1413_v54 = vld [vmem:[#allocation6 + $0x3b8] sm:$0xff]  ;;  %v817_v25 = vld [vmem:[#allocation2 + $0x50] sm:$0xff] }
 0x1a9   : > { %5689 = vmatprep.subr.bf16.mxu0 %v8181_v8  ;;  %5423 = vmatprep.mubr.f32.mxu1 %v7116_v29  ;;  %v5696_v33 = vpack.c.bf16 %v1413_v54, %v1412_v4  ;;  %v3701_v54 = vld [vmem:[#allocation8 + $0x60] sm:$0xff] }
 0x1ab   : > { %1998 = vmatmul.mubr.f32.gmra.mrb[18].mxu0 %v6865_v9  ;;  %v1414_v9 = vld [vmem:[#allocation6 + $0x3c0] sm:$0xff]  ;;  %5424 = vmatmul.mubr.f32.gmra.mrb[22].mxu1 %v7120_v18 }
 0x1ac   : > { %2002 = vmatprep.mubr.f32.mxu0 %v7055_v59  ;;  %5691 = vmatpush1.bf16.msra.mxu0 %v5690_v28  ;;  %v1415_v59 = vld [vmem:[#allocation6 + $0x3c8] sm:$0xff]  ;;  %v3699_v28 = vld [vmem:[#allocation8 + $0x50] sm:$0xff] }
 0x1ad   : > { %5692 = vmatprep.subr.bf16.mxu0 %v8181_v8  ;;  %5426 = vmatprep.mubr.f32.mxu1 %v7124_v11  ;;  %v5699_v37 = vpack.c.bf16 %v1415_v59, %v1414_v9  ;;  %v5758_v4 = vpack.c.bf16 %v3700_v61, %v3699_v28  ;;  %v819_v9 = vld [vmem:[#allocation2 + $0x68] sm:$0xff]  ;;  %v884_v59 = vld [vmem:[#allocation2 + $0x79] sm:$0xff] }
 0x1ae   : > { %v834_v61 = vld [vmem:[#allocation2 + $0x120] sm:$0xff] }
 0x1af   : > { %2003 = vmatmul.mubr.f32.gmra.mrb[20].mxu0 %v6872_v14  ;;  %v1416_v14 = vld [vmem:[#allocation6 + $0x3d0] sm:$0xff]  ;;  %5427 = vmatmul.mubr.f32.gmra.mrb[24].mxu1 %v7128_v27 }
 0x1b0   : > { %2007 = vmatprep.mubr.f32.mxu0 %v7060_v2  ;;  %5694 = vmatpush1.bf16.msra.mxu0 %v5693_v13  ;;  %v1417_v2 = vld [vmem:[#allocation6 + $0x3d8] sm:$0xff]  ;;  %v883_v13 = vld [vmem:[#allocation2 + $0x69] sm:$0xff] }
 0x1b1   : > { %5695 = vmatprep.subr.bf16.mxu0 %v8181_v8  ;;  %5429 = vmatprep.mubr.f32.mxu1 %v7134_v0  ;;  %v5702_v63 = vpack.c.bf16 %v1417_v2, %v1416_v14  ;;  %v3703_v14 = vld [vmem:[#allocation8 + $0x70] sm:$0xff]  ;;  %v3704_v2 = vld [vmem:[#allocation8 + $0x78] sm:$0xff] }
 0x1b3   : > { %2008 = vmatmul.mubr.f32.gmra.mrb[22].mxu0 %v6879_v19  ;;  %v1418_v19 = vld [vmem:[#allocation6 + $0x3e0] sm:$0xff]  ;;  %5430 = vmatmul.mubr.f32.gmra.mrb[26].mxu1 %v7140_v5 }
 0x1b4   : > { %2012 = vmatprep.mubr.f32.mxu0 %v7065_v7  ;;  %5697 = vmatpush1.bf16.msra.mxu0 %v5696_v33  ;;  %v1419_v7 = vld [vmem:[#allocation6 + $0x3e8] sm:$0xff] }
 0x1b5   : > { %5698 = vmatprep.subr.bf16.mxu0 %v8181_v8  ;;  %5432 = vmatprep.mubr.f32.mxu1 %v779_v26  ;;  %v5705_v16 = vpack.c.bf16 %v1419_v7, %v1418_v19  ;;  %v3702_v33 = vld [vmem:[#allocation8 + $0x68] sm:$0xff]  ;;  %v5764_v7 = vpack.c.bf16 %v3704_v2, %v3703_v14  ;;  %v3719_v14 = vld [vmem:[#allocation8 + $0xf0] sm:$0xff]  ;;  %v3720_v2 = vld [vmem:[#allocation8 + $0xf8] sm:$0xff] }
 0x1b6   : > { %v885_v19 = vld [vmem:[#allocation2 + $0x81] sm:$0xff] }
 0x1b7   : > { %2013 = vmatmul.mubr.f32.gmra.mrb[24].mxu0 %v6886_v24  ;;  %v1420_v24 = vld [vmem:[#allocation6 + $0x3f0] sm:$0xff]  ;;  %5433 = vmatmul.mubr.f32.gmra.mrb[28].mxu1 %v780_v34 }
 0x1b8   : > { %2017 = vmatprep.mubr.f32.mxu0 %v7070_v12  ;;  %5700 = vmatpush1.bf16.msra.mxu0 %v5699_v37  ;;  %v1421_v12 = vld [vmem:[#allocation6 + $0x3f8] sm:$0xff]  ;;  %v5761_v37 = vpack.c.bf16 %v3702_v33, %v3701_v54  ;;  %v835_v33 = vld [vmem:[#allocation2 + $0x128] sm:$0xff] }
 0x1b9   : > { %5701 = vmatprep.subr.bf16.mxu0 %v8181_v8  ;;  %v5708_v31 = vpack.c.bf16 %v1421_v12, %v1420_v24  ;;  %v886_v24 = vld [vmem:[#allocation2 + $0x91] sm:$0xff] }
 0x1bb   : > { %2018 = vmatmul.mubr.f32.gmra.mrb[26].mxu0 %v6893_v32  ;;  %v8182_v32 = vld [vmem:[#allocation12_spill] sm:$0xff] }
 0x1bc   : > { %2022 = vmatprep.mubr.f32.mxu0 %v7075_v42  ;;  %5703 = vmatpush1.bf16.msra.mxu0 %v5702_v63  ;;  %v8190_v42 = vld [vmem:[#allocation20_spill] sm:$0xff]  ;;  %8191 = vst [vmem:[#allocation12_spill] sm:$0xff] %v7254_v23  ;;  %v820_v63 = vld [vmem:[#allocation2 + $0x78] sm:$0xff] }
 0x1bd   : > { %5704 = vmatprep.subr.bf16.mxu0 %v8181_v8 }
 0x1bf   : > { %2023 = vmatmul.mubr.f32.gmra.mrb[28].mxu0 %v6900_v39  ;;  %v8183_v39 = vld [vmem:[#allocation13_spill] sm:$0xff] }
 0x1c0   : > { %2027 = vmatprep.mubr.f32.mxu0 %v7080_v45  ;;  %5706 = vmatpush1.bf16.msra.mxu0 %v5705_v16  ;;  %v972_v45 = vld [vmem:[#allocation2 + $0x19a] sm:$0xff]  ;;  %v3706_v16 = vld [vmem:[#allocation8 + $0x88] sm:$0xff] }
 0x1c1   : > { %5707 = vmatprep.subr.bf16.mxu0 %v8181_v8  ;;  %5435 = vmatprep.mubr.f32.mxu1 %v972_v45  ;;  %v3711_v45 = vld [vmem:[#allocation8 + $0xb0] sm:$0xff] }
 0x1c3   : > { %2028 = vmatmul.mubr.f32.gmra.mrb[30].mxu0 %v6907_v43  ;;  %v8184_v43 = vld [vmem:[#allocation14_spill] sm:$0xff] }
 0x1c4   : > { %2032 = vmatprep.mubr.f32.mxu0 %v7084_v15  ;;  %5709 = vmatpush1.bf16.msra.mxu0 %v5708_v31  ;;  %v7246_v15 = vld [vmem:[#allocation2 + $0x181] sm:$0xff]  ;;  %v3707_v31 = vld [vmem:[#allocation8 + $0x90] sm:$0xff] }
 0x1c5   : > { %5935 = vmatprep.subr.bf16.mxu0 %v7254_v23 }
 0x1c7   : > { %2033 = vmatmul.mubr.f32.gmra.mrb[32].mxu0 %v6914_v47  ;;  %v8185_v47 = vld [vmem:[#allocation15_spill] sm:$0xff] }
 0x1c8   : > { %2037 = vmatprep.mubr.f32.mxu0 %v7088_v48  ;;  %v973_v48 = vld [vmem:[#allocation2 + $0x1a2] sm:$0xff] }
 0x1c9   : > { %5436 = vmatmul.mubr.f32.gmra.mrb[30].mxu1 %v973_v48  ;;  %v3712_v48 = vld [vmem:[#allocation8 + $0xb8] sm:$0xff] }
 0x1cb   : > { %2038 = vmatmul.mubr.f32.gmra.mrb[34].mxu0 %v6920_v50  ;;  %v8186_v50 = vld [vmem:[#allocation16_spill] sm:$0xff] }
 0x1cc   : > { %2042 = vmatprep.mubr.f32.mxu0 %v7092_v17  ;;  %v7249_v17 = vld [vmem:[#allocation2 + $0x189] sm:$0xff] }
 0x1cf   : > { %2043 = vmatmul.mubr.f32.gmra.mrb[36].mxu0 %v6926_v53  ;;  %v8187_v53 = vld [vmem:[#allocation17_spill] sm:$0xff] }
 0x1d0   : > { %2047 = vmatprep.mubr.f32.mxu0 %v7096_v52  ;;  %v878_v52 = vld [vmem:[#allocation2 + $0x31] sm:$0xff] }
 0x1d3   : > { %2048 = vmatmul.mubr.f32.gmra.mrb[38].mxu0 %v6932_v57  ;;  %v8188_v57 = vld [vmem:[#allocation18_spill] sm:$0xff] }
 0x1d4   : > { %2052 = vmatprep.mubr.f32.mxu0 %v7100_v55  ;;  %v3689_v55 = vld [vmem:[#allocation8] sm:$0xff] }
 0x1d7   : > { %2053 = vmatmul.mubr.f32.gmra.mrb[40].mxu0 %v6938_v60  ;;  %v8189_v60 = vld [vmem:[#allocation19_spill] sm:$0xff] }
 0x1d8   : > { %2057 = vmatprep.mubr.f32.mxu0 %v7104_v58  ;;  %v3690_v58 = vld [vmem:[#allocation8 + $0x8] sm:$0xff] }
 0x1db   : > { %2058 = vmatmul.mubr.f32.gmra.mrb[42].mxu0 %v8182_v32  ;;  %v3708_v32 = vld [vmem:[#allocation8 + $0x98] sm:$0xff] }
 0x1dc   : > { %2062 = vmatprep.mubr.f32.mxu0 %v7108_v3  ;;  %v3691_v3 = vld [vmem:[#allocation8 + $0x10] sm:$0xff] }
 0x1df   : > { %2063 = vmatmul.mubr.f32.gmra.mrb[44].mxu0 %v8183_v39  ;;  %v822_v39 = vld [vmem:[#allocation2 + $0x90] sm:$0xff] }
 0x1e0   : > { %2067 = vmatprep.mubr.f32.mxu0 %v7112_v10  ;;  %v814_v10 = vld [vmem:[#allocation2 + $0x30] sm:$0xff] }
 0x1e3   : > { %2068 = vmatmul.mubr.f32.gmra.mrb[46].mxu0 %v8184_v43  ;;  %v887_v43 = vld [vmem:[#allocation2 + $0x99] sm:$0xff] }
 0x1e4   : > { %2072 = vmatprep.mubr.f32.mxu0 %v7116_v29  ;;  %v5743_v29 = vpack.c.bf16 %v3690_v58, %v3689_v55  ;;  %v889_v55 = vld [vmem:[#allocation2 + $0xb1] sm:$0xff]  ;;  %v5776_v58 = vpack.c.bf16 %v3712_v48, %v3711_v45 }
 0x1e5   : > { %v838_v48 = vld [vmem:[#allocation2 + $0x150] sm:$0xff] }
 0x1e6   : > { %5744 = vmatpush1.bf16.msra.mxu1 %v5743_v29  ;;  %v825_v29 = vld [vmem:[#allocation2 + $0xb0] sm:$0xff] }
 0x1e7   : > { %2073 = vmatmul.mubr.f32.gmra.mrb[48].mxu0 %v8185_v47  ;;  %5745 = vmatprep.subr.bf16.mxu1 %v8181_v8  ;;  %v5770_v47 = vpack.c.bf16 %v3708_v32, %v3707_v31  ;;  %v3822_v31 = vld [vmem:[#allocation8 + $0x428] sm:$0xff] }
 0x1e8   : > { %2077 = vmatprep.mubr.f32.mxu0 %v7120_v18  ;;  %v3692_v18 = vld [vmem:[#allocation8 + $0x18] sm:$0xff] }
 0x1eb   : > { %2078 = vmatmul.mubr.f32.gmra.mrb[50].mxu0 %v8186_v50  ;;  %v3709_v50 = vld [vmem:[#allocation8 + $0xa0] sm:$0xff] }
 0x1ec   : > { %2082 = vmatprep.mubr.f32.mxu0 %v7124_v11  ;;  %v879_v11 = vld [vmem:[#allocation2 + $0x39] sm:$0xff] }
 0x1ef   : > { %2083 = vmatmul.mubr.f32.gmra.mrb[52].mxu0 %v8187_v53  ;;  %v3710_v53 = vld [vmem:[#allocation8 + $0xa8] sm:$0xff] }
 0x1f0   : > { %2087 = vmatprep.mubr.f32.mxu0 %v7128_v27  ;;  %v5746_v27 = vpack.c.bf16 %v3692_v18, %v3691_v3  ;;  %v3713_v3 = vld [vmem:[#allocation8 + $0xc0] sm:$0xff] }
 0x1f1   : > { %v890_v18 = vld [vmem:[#allocation2 + $0xc1] sm:$0xff] }
 0x1f2   : > { %5747 = vmatpush1.bf16.msra.mxu1 %v5746_v27  ;;  %v826_v27 = vld [vmem:[#allocation2 + $0xc0] sm:$0xff] }
 0x1f3   : > { %2088 = vmatmul.mubr.f32.gmra.mrb[54].mxu0 %v8188_v57  ;;  %5748 = vmatprep.subr.bf16.mxu1 %v8181_v8  ;;  %v823_v57 = vld [vmem:[#allocation2 + $0x98] sm:$0xff] }
 0x1f4   : > { %2092 = vmatprep.mubr.f32.mxu0 %v7134_v0  ;;  %v3693_v0 = vld [vmem:[#allocation8 + $0x20] sm:$0xff] }
 0x1f7   : > { %2093 = vmatmul.mubr.f32.gmra.mrb[56].mxu0 %v8189_v60  ;;  %v888_v60 = vld [vmem:[#allocation2 + $0xa9] sm:$0xff] }
 0x1f8   : > { %2097 = vmatprep.mubr.f32.mxu0 %v7140_v5  ;;  %v3694_v5 = vld [vmem:[#allocation8 + $0x28] sm:$0xff] }
 0x1f9   : > { %v5749_v35 = vpack.c.bf16 %v3694_v5, %v3693_v0  ;;  %v891_v0 = vld [vmem:[#allocation2 + $0xc9] sm:$0xff] }
 0x1fa   : > { %v827_v5 = vld [vmem:[#allocation2 + $0xc8] sm:$0xff] }
 0x1fb   : > { %2098 = vmatmul.mubr.f32.gmra.mrb[58].mxu0 %v8190_v42  ;;  %5750 = vmatpush1.bf16.msra.mxu1 %v5749_v35  ;;  %v5773_v42 = vpack.c.bf16 %v3710_v53, %v3709_v50  ;;  %v893_v35 = vld [vmem:[#allocation2 + $0xe1] sm:$0xff]  ;;  %v902_v50 = vld [vmem:[#allocation2 + $0x151] sm:$0xff] }
 0x1fc   : > { %2102 = vmatprep.mubr.f32.mxu0 %v779_v26  ;;  %5751 = vmatprep.subr.bf16.mxu1 %v8181_v8  ;;  %v3705_v26 = vld [vmem:[#allocation8 + $0x80] sm:$0xff] }
 0x1fd   : > { %v5767_v12 = vpack.c.bf16 %v3706_v16, %v3705_v26  ;;  %v836_v16 = vld [vmem:[#allocation2 + $0x138] sm:$0xff] }
 0x1ff   : > { %2103 = vmatmul.mubr.f32.gmra.mrb[60].mxu0 %v7246_v15  ;;  %5753 = vmatpush1.bf16.msra.mxu1 %v5752_v22  ;;  %v832_v22 = vld [vmem:[#allocation2 + $0x108] sm:$0xff] }
 0x200   : > { %2107 = vmatprep.mubr.f32.mxu0 %v780_v34  ;;  %5754 = vmatprep.subr.bf16.mxu1 %v8181_v8  ;;  %v821_v34 = vld [vmem:[#allocation2 + $0x80] sm:$0xff] }
 0x203   : > { %2108 = vmatmul.mubr.f32.gmra.mrb[62].mxu0 %v7249_v17  ;;  %5756 = vmatpush1.bf16.msra.mxu1 %v5755_v21  ;;  %v3716_v21 = vld [vmem:[#allocation8 + $0xd8] sm:$0xff] }
 0x204   : > { %2177 = vmatprep.mubr.f32.mxu0 %v878_v52  ;;  %5757 = vmatprep.subr.bf16.mxu1 %v8181_v8  ;;  %v824_v52 = vld [vmem:[#allocation2 + $0xa8] sm:$0xff] }
 0x207   : > { %2178 = vmatmul.mubr.f32.vlgmr.msra.gmra.mrb[0].mxu0 %v814_v10  ;;  %5759 = vmatpush1.bf16.msra.mxu1 %v5758_v4  ;;  %v3714_v10 = vld [vmem:[#allocation8 + $0xc8] sm:$0xff] }
 0x208   : > { %2182 = vmatprep.mubr.f32.mxu0 %v879_v11  ;;  %5937 = vmatpush3.bf16.msra.mxu0 %v7254_v23  ;;  %v5779_v11 = vpack.c.bf16 %v3714_v10, %v3713_v3  ;;  %v3718_v4 = vld [vmem:[#allocation8 + $0xe8] sm:$0xff]  ;;  %v839_v10 = vld [vmem:[#allocation2 + $0x158] sm:$0xff] }
 0x209   : > { %5760 = vmatprep.subr.bf16.mxu1 %v8181_v8 }
 0x20b   : > { %2183 = vmatmul.mubr.f32.gmra.mrb[2].mxu0 %v815_v40  ;;  %5762 = vmatpush1.bf16.msra.mxu1 %v5761_v37  ;;  %v892_v40 = vld [vmem:[#allocation2 + $0xd9] sm:$0xff] }
 0x20c   : > { %2187 = vmatprep.mubr.f32.mxu0 %v880_v62  ;;  %5763 = vmatprep.subr.bf16.mxu1 %v8181_v8  ;;  %v828_v62 = vld [vmem:[#allocation2 + $0xd8] sm:$0xff] }
 0x20f   : > { %2188 = vmatmul.mubr.f32.gmra.mrb[4].mxu0 %v816_v49  ;;  %5765 = vmatpush1.bf16.msra.mxu1 %v5764_v7  ;;  %v895_v49 = vld [vmem:[#allocation2 + $0xf9] sm:$0xff]  ;;  %v5788_v7 = vpack.c.bf16 %v3720_v2, %v3719_v14 }
 0x210   : > { %2192 = vmatprep.mubr.f32.mxu0 %v881_v46  ;;  %5766 = vmatprep.subr.bf16.mxu1 %v8181_v8  ;;  %v896_v46 = vld [vmem:[#allocation2 + $0x109] sm:$0xff]  ;;  %v3728_v14 = vld [vmem:[#allocation8 + $0x138] sm:$0xff] }
 0x213   : > { %2193 = vmatmul.mubr.f32.gmra.mrb[6].mxu0 %v817_v25  ;;  %5768 = vmatpush1.bf16.msra.mxu1 %v5767_v12  ;;  %v898_v25 = vld [vmem:[#allocation2 + $0x121] sm:$0xff] }
 0x214   : > { %2197 = vmatprep.mubr.f32.mxu0 %v882_v56  ;;  %5769 = vmatprep.subr.bf16.mxu1 %v8181_v8  ;;  %v3715_v56 = vld [vmem:[#allocation8 + $0xd0] sm:$0xff]  ;;  %v3821_v12 = vld [vmem:[#allocation8 + $0x420] sm:$0xff] }
 0x215   : > { %v5782_v28 = vpack.c.bf16 %v3716_v21, %v3715_v56  ;;  %v7280_v32 = vpack.c.bf16 %v3822_v31, %v3821_v12  ;;  %v3723_v21 = vld [vmem:[#allocation8 + $0x110] sm:$0xff] }
 0x216   : > { %v3731_v31 = vld [vmem:[#allocation8 + $0x150] sm:$0xff] }
 0x217   : > { %2198 = vmatmul.mubr.f32.gmra.mrb[8].mxu0 %v818_v30  ;;  %5771 = vmatpush1.bf16.msra.mxu1 %v5770_v47  ;;  %v899_v30 = vld [vmem:[#allocation2 + $0x129] sm:$0xff]  ;;  %8193 = vst [vmem:[#allocation14_spill] sm:$0xff] %v7280_v32 }
 0x218   : > { %2202 = vmatprep.mubr.f32.mxu0 %v883_v13  ;;  %5772 = vmatprep.subr.bf16.mxu1 %v8181_v8  ;;  %v3717_v13 = vld [vmem:[#allocation8 + $0xe0] sm:$0xff] }
 0x219   : > { %v5785_v54 = vpack.c.bf16 %v3718_v4, %v3717_v13 }
 0x21b   : > { %2203 = vmatmul.mubr.f32.gmra.mrb[10].mxu0 %v819_v9  ;;  %5774 = vmatpush1.bf16.msra.mxu1 %v5773_v42  ;;  %v3824_v42 = vld [vmem:[#allocation8 + $0x438] sm:$0xff] }
 0x21c   : > { %2207 = vmatprep.mubr.f32.mxu0 %v884_v59  ;;  %5775 = vmatprep.subr.bf16.mxu1 %v8181_v8  ;;  %v900_v59 = vld [vmem:[#allocation2 + $0x139] sm:$0xff] }
 0x21f   : > { %2208 = vmatmul.mubr.f32.gmra.mrb[12].mxu0 %v820_v63  ;;  %5777 = vmatpush1.bf16.msra.mxu1 %v5776_v58  ;;  %v3819_v63 = vld [vmem:[#allocation8 + $0x410] sm:$0xff]  ;;  %v3826_v58 = vld [vmem:[#allocation8 + $0x448] sm:$0xff] }
 0x220   : > { %2212 = vmatprep.mubr.f32.mxu0 %v885_v19  ;;  %5778 = vmatprep.subr.bf16.mxu1 %v8181_v8  ;;  %v3820_v19 = vld [vmem:[#allocation8 + $0x418] sm:$0xff] }
 0x221   : > { %v7275_v26 = vpack.c.bf16 %v3820_v19, %v3819_v63 }
 0x223   : > { %2213 = vmatmul.mubr.f32.gmra.mrb[14].mxu0 %v821_v34  ;;  %5780 = vmatpush1.bf16.msra.mxu1 %v5779_v11  ;;  %8192 = vst [vmem:[#allocation13_spill] sm:$0xff] %v7275_v26  ;;  %v901_v34 = vld [vmem:[#allocation2 + $0x141] sm:$0xff] }
 0x224   : > { %2217 = vmatprep.mubr.f32.mxu0 %v886_v24  ;;  %5781 = vmatprep.subr.bf16.mxu1 %v8181_v8  ;;  %v2888_v24 = vld [vmem:[#allocation3 + $0x1] sm:$0xff] }
 0x225   : > { %5939 = vmatprep.subr.bf16.mxu0 %v7275_v26  ;;  %3897 = vmatprep.mubr.f32.mxu1 %v2888_v24 }
 0x226   : > { %5941 = vmatpush3.bf16.msra.mxu0 %v7275_v26 }
 0x227   : > { %2218 = vmatmul.mubr.f32.gmra.mrb[16].mxu0 %v822_v39  ;;  %5783 = vmatpush1.bf16.msra.mxu1 %v5782_v28  ;;  %v7282_v39 = vld [vmem:[#allocation2] sm:$0xff]  ;;  %v3724_v28 = vld [vmem:[#allocation8 + $0x118] sm:$0xff] }
 0x228   : > { %2222 = vmatprep.mubr.f32.mxu0 %v887_v43  ;;  %5784 = vmatprep.subr.bf16.mxu1 %v8181_v8  ;;  %v837_v43 = vld [vmem:[#allocation2 + $0x140] sm:$0xff]  ;;  %v5794_v13 = vpack.c.bf16 %v3724_v28, %v3723_v21  ;;  %v3742_v28 = vld [vmem:[#allocation8 + $0x1a8] sm:$0xff] }
 0x229   : > { %5943 = vmatprep.subr.bf16.mxu0 %v7280_v32  ;;  %v3741_v21 = vld [vmem:[#allocation8 + $0x1a0] sm:$0xff] }
 0x22a   : > { %5945 = vmatpush3.bf16.msra.mxu0 %v7280_v32 }
 0x22b   : > { %2223 = vmatmul.mubr.f32.gmra.mrb[18].mxu0 %v823_v57  ;;  %5786 = vmatpush1.bf16.msra.mxu1 %v5785_v54  ;;  %v2889_v57 = vld [vmem:[#allocation3 + $0x9] sm:$0xff] }
 0x22c   : > { %2227 = vmatprep.mubr.f32.mxu0 %v888_v60  ;;  %5787 = vmatprep.subr.bf16.mxu1 %v8181_v8  ;;  %v3823_v60 = vld [vmem:[#allocation8 + $0x430] sm:$0xff] }
 0x22d   : > { %v7291_v45 = vpack.c.bf16 %v3824_v42, %v3823_v60  ;;  %v3733_v60 = vld [vmem:[#allocation8 + $0x160] sm:$0xff]  ;;  %v3734_v42 = vld [vmem:[#allocation8 + $0x168] sm:$0xff] }
 0x22f   : > { %2228 = vmatmul.mubr.f32.gmra.mrb[20].mxu0 %v824_v52  ;;  %5789 = vmatpush1.bf16.msra.mxu1 %v5788_v7  ;;  %8194 = vst [vmem:[#allocation15_spill] sm:$0xff] %v7291_v45  ;;  %v903_v52 = vld [vmem:[#allocation2 + $0x159] sm:$0xff] }
 0x230   : > { %2232 = vmatprep.mubr.f32.mxu0 %v889_v55  ;;  %5790 = vmatprep.subr.bf16.mxu1 %v8181_v8  ;;  %v3825_v55 = vld [vmem:[#allocation8 + $0x440] sm:$0xff] }
 0x231   : > { %5947 = vmatprep.subr.bf16.mxu0 %v7291_v45  ;;  %v7296_v3 = vpack.c.bf16 %v3826_v58, %v3825_v55  ;;  %v3729_v7 = vld [vmem:[#allocation8 + $0x140] sm:$0xff]  ;;  %v3735_v58 = vld [vmem:[#allocation8 + $0x170] sm:$0xff] }
 0x232   : > { %3898 = vmatmul.mubr.f32.vlgmr.msra.gmra.mrb[32].mxu1 %v7282_v39  ;;  %5949 = vmatpush3.bf16.msra.mxu0 %v7291_v45 }
 0x233   : > { %2233 = vmatmul.mubr.f32.gmra.mrb[22].mxu0 %v825_v29  ;;  %3902 = vmatprep.mubr.f32.mxu1 %v2889_v57  ;;  %8195 = vst [vmem:[#allocation16_spill] sm:$0xff] %v7296_v3 }
 0x234   : > { %2237 = vmatprep.mubr.f32.mxu0 %v890_v18  ;;  %v904_v18 = vld [vmem:[#allocation2 + $0x169] sm:$0xff]  ;;  %5951 = vmatprep.subr.bf16.mxu0 %v7296_v3 }
 0x236   : > { %3903 = vmatmul.mubr.f32.gmra.mrb[34].mxu1 %v7282_v39  ;;  %5953 = vmatpush3.bf16.msra.mxu0 %v7296_v3 }
 0x237   : > { %2238 = vmatmul.mubr.f32.gmra.mrb[24].mxu0 %v826_v27  ;;  %v3827_v27 = vld [vmem:[#allocation8 + $0x450] sm:$0xff] }
 0x238   : > { %2242 = vmatprep.mubr.f32.mxu0 %v891_v0  ;;  %v3828_v0 = vld [vmem:[#allocation8 + $0x458] sm:$0xff] }
 0x23b   : > { %2243 = vmatmul.mubr.f32.gmra.mrb[26].mxu0 %v827_v5  ;;  %v7304_v5 = vpack.c.bf16 %v3828_v0, %v3827_v27 }
 0x23c   : > { %2247 = vmatprep.mubr.f32.mxu0 %v892_v40  ;;  %v840_v40 = vld [vmem:[#allocation2 + $0x168] sm:$0xff] }
 0x23d   : > { %8196 = vst [vmem:[#allocation17_spill] sm:$0xff] %v7304_v5  ;;  %5955 = vmatprep.subr.bf16.mxu0 %v7304_v5 }
 0x23e   : > { %5957 = vmatpush3.bf16.msra.mxu0 %v7304_v5 }
 0x23f   : > { %2248 = vmatmul.mubr.f32.gmra.mrb[28].mxu0 %v828_v62  ;;  %v905_v62 = vld [vmem:[#allocation2 + $0x171] sm:$0xff] }
 0x240   : > { %2252 = vmatprep.mubr.f32.mxu0 %v893_v35  ;;  %v3829_v35 = vld [vmem:[#allocation8 + $0x460] sm:$0xff] }
 0x243   : > { %2253 = vmatmul.mubr.f32.gmra.mrb[30].mxu0 %v829_v44  ;;  %v3830_v44 = vld [vmem:[#allocation8 + $0x468] sm:$0xff] }
 0x244   : > { %2257 = vmatprep.mubr.f32.mxu0 %v894_v20  ;;  %v7308_v20 = vpack.c.bf16 %v3830_v44, %v3829_v35 }
 0x246   : > { %8197 = vst [vmem:[#allocation18_spill] sm:$0xff] %v7308_v20  ;;  %5959 = vmatprep.subr.bf16.mxu0 %v7308_v20 }
 0x247   : > { %2258 = vmatmul.mubr.f32.gmra.mrb[32].mxu0 %v830_v41  ;;  %v841_v41 = vld [vmem:[#allocation2 + $0x170] sm:$0xff] }
 0x248   : > { %2262 = vmatprep.mubr.f32.mxu0 %v895_v49  ;;  %v3721_v49 = vld [vmem:[#allocation8 + $0x100] sm:$0xff]  ;;  %5961 = vmatpush3.bf16.msra.mxu0 %v7308_v20 }
 0x24b   : > { %2263 = vmatmul.mubr.f32.gmra.mrb[34].mxu0 %v831_v6  ;;  %v3722_v6 = vld [vmem:[#allocation8 + $0x108] sm:$0xff] }
 0x24c   : > { %2267 = vmatprep.mubr.f32.mxu0 %v896_v46 }
 0x24f   : > { %2268 = vmatmul.mubr.f32.gmra.mrb[36].mxu0 %v832_v22  ;;  %v5791_v22 = vpack.c.bf16 %v3722_v6, %v3721_v49  ;;  %v3739_v49 = vld [vmem:[#allocation8 + $0x190] sm:$0xff]  ;;  %v3740_v6 = vld [vmem:[#allocation8 + $0x198] sm:$0xff] }
 0x250   : > { %2272 = vmatprep.mubr.f32.mxu0 %v897_v51 }
 0x251   : > { %5792 = vmatpush1.bf16.msra.mxu1 %v5791_v22 }
 0x252   : > { %v7270_v9 = vpop.f32.mrb[0].mxu1  ;;  %5793 = vmatprep.subr.bf16.mxu1 %v8181_v8 }
 0x253   : > { %2273 = vmatmul.mubr.f32.gmra.mrb[38].mxu0 %v833_v38  ;;  %v7272_v37 = vpop.f32.mrb[1].mxu1  ;;  %v3831_v38 = vld [vmem:[#allocation8 + $0x470] sm:$0xff] }
 0x254   : > { %2277 = vmatprep.mubr.f32.mxu0 %v898_v25  ;;  %v3832_v25 = vld [vmem:[#allocation8 + $0x478] sm:$0xff] }
 0x255   : > { %v7316_v56 = vpack.c.bf16 %v3832_v25, %v3831_v38  ;;  %5795 = vmatpush1.bf16.msra.mxu1 %v5794_v13  ;;  %v5818_v38 = vpack.c.bf16 %v3740_v6, %v3739_v49  ;;  %v5821_v13 = vpack.c.bf16 %v3742_v28, %v3741_v21  ;;  %v3752_v21 = vld [vmem:[#allocation8 + $0x1f8] sm:$0xff] }
 0x256   : > { %v7285_v47 = vpop.f32.mrb[2].mxu1  ;;  %5796 = vmatprep.subr.bf16.mxu1 %v8181_v8 }
 0x257   : > { %2278 = vmatmul.mubr.f32.gmra.mrb[40].mxu0 %v834_v61  ;;  %v7288_v53 = vpop.f32.mrb[3].mxu1  ;;  %8198 = vst [vmem:[#allocation19_spill] sm:$0xff] %v7316_v56  ;;  %5963 = vmatprep.subr.bf16.mxu0 %v7316_v56 }
 0x258   : > { %2282 = vmatprep.mubr.f32.mxu0 %v899_v30  ;;  %5965 = vmatpush3.bf16.msra.mxu0 %v7316_v56  ;;  %v908_v30 = vld [vmem:[#allocation2 + $0x199] sm:$0xff] }
 0x25a   : > { %v7298_v29 = vpop.f32.mrb[4].mxu1 }
 0x25b   : > { %2283 = vmatmul.mubr.f32.gmra.mrb[42].mxu0 %v835_v33  ;;  %v7301_v11 = vpop.f32.mrb[5].mxu1 }
 0x25c   : > { %2287 = vmatprep.mubr.f32.mxu0 %v900_v59 }
 0x25e   : > { %v7310_v46 = vpop.f32.mrb[6].mxu1 }
 0x25f   : > { %2288 = vmatmul.mubr.f32.gmra.mrb[44].mxu0 %v836_v16  ;;  %v7313_v51 = vpop.f32.mrb[7].mxu1  ;;  %v3730_v16 = vld [vmem:[#allocation8 + $0x148] sm:$0xff] }
 0x260   : > { %2292 = vmatprep.mubr.f32.mxu0 %v901_v34  ;;  %v5803_v24 = vpack.c.bf16 %v3730_v16, %v3729_v7  ;;  %v3746_v7 = vld [vmem:[#allocation8 + $0x1c8] sm:$0xff] }
 0x262   : > { %v7324_v61 = vpop.f32.mrb[8].mxu1 }
 0x263   : > { %2293 = vmatmul.mubr.f32.gmra.mrb[46].mxu0 %v837_v43  ;;  %v7326_v4 = vpop.f32.mrb[9].mxu1 }
 0x264   : > { %2297 = vmatprep.mubr.f32.mxu0 %v902_v50 }
 0x266   : > { %v7331_v54 = vpop.f32.mrb[10].mxu1 }
 0x267   : > { %2298 = vmatmul.mubr.f32.gmra.mrb[48].mxu0 %v838_v48  ;;  %v7333_v59 = vpop.f32.mrb[11].mxu1 }
 0x268   : > { %2302 = vmatprep.mubr.f32.mxu0 %v903_v52  ;;  %v5809_v52 = vpack.c.bf16 %v3734_v42, %v3733_v60 }
 0x26a   : > { %v7337_v2 = vpop.f32.mrb[12].mxu1 }
 0x26b   : > { %2303 = vmatmul.mubr.f32.gmra.mrb[50].mxu0 %v839_v10  ;;  %v7339_v19 = vpop.f32.mrb[13].mxu1  ;;  %v3736_v10 = vld [vmem:[#allocation8 + $0x178] sm:$0xff] }
 0x26c   : > { %2307 = vmatprep.mubr.f32.mxu0 %v904_v18  ;;  %v5812_v27 = vpack.c.bf16 %v3736_v10, %v3735_v58  ;;  %v3749_v58 = vld [vmem:[#allocation8 + $0x1e0] sm:$0xff]  ;;  %v3750_v10 = vld [vmem:[#allocation8 + $0x1e8] sm:$0xff] }
 0x26e   : > { %v7342_v34 = vpop.f32.mrb[14].mxu1 }
 0x26f   : > { %2308 = vmatmul.mubr.f32.gmra.mrb[52].mxu0 %v840_v40  ;;  %v7344_v12 = vpop.f32.mrb[15].mxu1  ;;  %v3737_v40 = vld [vmem:[#allocation8 + $0x180] sm:$0xff] }
 0x270   : > { %2312 = vmatprep.mubr.f32.mxu0 %v905_v62  ;;  %v3738_v62 = vld [vmem:[#allocation8 + $0x188] sm:$0xff] }
 0x271   : > { %v5815_v44 = vpack.c.bf16 %v3738_v62, %v3737_v40  ;;  %v5833_v62 = vpack.c.bf16 %v3750_v10, %v3749_v58 }
 0x272   : > { %v7347_v43 = vpop.f32.mrb[16].mxu1 }
 0x273   : > { %2313 = vmatmul.mubr.f32.gmra.mrb[54].mxu0 %v841_v41  ;;  %v7349_v57 = vpop.f32.mrb[17].mxu1 }
 0x274   : > { %2317 = vmatprep.mubr.f32.mxu0 %v7246_v15  ;;  %v909_v15 = vld [vmem:[#allocation2 + $0x1a1] sm:$0xff] }
 0x276   : > { %v7352_v48 = vpop.f32.mrb[18].mxu1 }
 0x277   : > { %2318 = vmatmul.mubr.f32.gmra.mrb[56].mxu0 %v7130_v1  ;;  %v3725_v1 = vld [vmem:[#allocation8 + $0x120] sm:$0xff]  ;;  %v7354_v55 = vpop.f32.mrb[19].mxu1 }
 0x278   : > { %2322 = vmatprep.mubr.f32.mxu0 %v7249_v17  ;;  %v3726_v17 = vld [vmem:[#allocation8 + $0x128] sm:$0xff] }
 0x279   : > { %v5797_v33 = vpack.c.bf16 %v3726_v17, %v3725_v1  ;;  %v3743_v1 = vld [vmem:[#allocation8 + $0x1b0] sm:$0xff]  ;;  %v3744_v17 = vld [vmem:[#allocation8 + $0x1b8] sm:$0xff] }
 0x27a   : > { %v7357_v18 = vpop.f32.mrb[20].mxu1 }
 0x27b   : > { %2323 = vmatmul.mubr.f32.gmra.mrb[58].mxu0 %v7136_v36  ;;  %5798 = vmatpush1.bf16.msra.mxu1 %v5797_v33  ;;  %v3727_v36 = vld [vmem:[#allocation8 + $0x130] sm:$0xff]  ;;  %v7359_v0 = vpop.f32.mrb[21].mxu1 }
 0x27c   : > { %2327 = vmatprep.mubr.f32.mxu0 %v908_v30  ;;  %5799 = vmatprep.subr.bf16.mxu1 %v8181_v8  ;;  %v5800_v63 = vpack.c.bf16 %v3728_v14, %v3727_v36  ;;  %v5824_v36 = vpack.c.bf16 %v3744_v17, %v3743_v1 }
 0x27e   : > { %v7362_v35 = vpop.f32.mrb[22].mxu1 }
 0x27f   : > { %2328 = vmatmul.mubr.f32.gmra.mrb[60].mxu0 %v7282_v39  ;;  %5801 = vmatpush1.bf16.msra.mxu1 %v5800_v63  ;;  %v7364_v41 = vpop.f32.mrb[23].mxu1  ;;  %v3745_v63 = vld [vmem:[#allocation8 + $0x1c0] sm:$0xff] }
 0x280   : > { %2332 = vmatprep.mubr.f32.mxu0 %v909_v15  ;;  %5802 = vmatprep.subr.bf16.mxu1 %v8181_v8  ;;  %v5827_v16 = vpack.c.bf16 %v3746_v7, %v3745_v63 }
 0x282   : > { %v7367_v22 = vpop.f32.mrb[24].mxu1 }
 0x283   : > { %2333 = vmatmul.mubr.f32.gmra.mrb[62].mxu0 %v7282_v39  ;;  %5804 = vmatpush1.bf16.msra.mxu1 %v5803_v24  ;;  %v3732_v39 = vld [vmem:[#allocation8 + $0x158] sm:$0xff]  ;;  %v7369_v25 = vpop.f32.mrb[25].mxu1 }
 0x284   : > { %5805 = vmatprep.subr.bf16.mxu1 %v8181_v8  ;;  %v5806_v50 = vpack.c.bf16 %v3732_v39, %v3731_v31  ;;  %v3747_v39 = vld [vmem:[#allocation8 + $0x1d0] sm:$0xff] }
 0x286   : > { %v7372_v30 = vpop.f32.mrb[26].mxu1 }
 0x287   : > { %5807 = vmatpush1.bf16.msra.mxu1 %v5806_v50  ;;  %v7374_v15 = vpop.f32.mrb[27].mxu1  ;;  %v3748_v50 = vld [vmem:[#allocation8 + $0x1d8] sm:$0xff] }
 0x288   : > { %5808 = vmatprep.subr.bf16.mxu1 %v8181_v8  ;;  %v5830_v60 = vpack.c.bf16 %v3748_v50, %v3747_v39 }
 0x28a   : > { %v7377_v33 = vpop.f32.mrb[28].mxu1 }
 0x28b   : > { %5810 = vmatpush1.bf16.msra.mxu1 %v5809_v52  ;;  %v7379_v14 = vpop.f32.mrb[29].mxu1  ;;  %v7390_v52 = vld [vmem:[%s8120_s2] ss:$0 sm:$0xff] }
 0x28c   : > { %5811 = vmatprep.subr.bf16.mxu1 %v8181_v8 }
 0x28f   : > { %5813 = vmatpush1.bf16.msra.mxu1 %v5812_v27 }
 0x290   : > { %5814 = vmatprep.subr.bf16.mxu1 %v8181_v8 }
 0x293   : > { %5816 = vmatpush1.bf16.msra.mxu1 %v5815_v44  ;;  %v7397_v44 = vld [vmem:[%s8121_s3] ss:$0 sm:$0xff] }
 0x294   : > { %5817 = vmatprep.subr.bf16.mxu1 %v8181_v8 }
 0x297   : > { %5819 = vmatpush1.bf16.msra.mxu1 %v5818_v38  ;;  %v3751_v38 = vld [vmem:[#allocation8 + $0x1f0] sm:$0xff] }
 0x298   : > { %5820 = vmatprep.subr.bf16.mxu1 %v8181_v8  ;;  %v5836_v1 = vpack.c.bf16 %v3752_v21, %v3751_v38 }
 0x29b   : > { %5822 = vmatpush1.bf16.msra.mxu1 %v5821_v13 }
 0x29c   : > { %5823 = vmatprep.subr.bf16.mxu1 %v8181_v8  ;;  %v7382_v24 = vpop.f32.mrb[30].mxu1 }
 0x29d   : > { %v7384_v31 = vpop.f32.mrb[31].mxu1 }
 0x29f   : > { %5825 = vmatpush1.bf16.msra.mxu1 %v5824_v36 }
 0x2a0   : > { %5826 = vmatprep.subr.bf16.mxu1 %v8181_v8 }
 0x2a3   : > { %5828 = vmatpush1.bf16.msra.mxu1 %v5827_v16 }
 0x2a4   : > { %5829 = vmatprep.subr.bf16.mxu1 %v8181_v8 }
 0x2a7   : > { %5831 = vmatpush1.bf16.msra.mxu1 %v5830_v60 }
 0x2a8   : > { %5832 = vmatprep.subr.bf16.mxu1 %v8181_v8 }
 0x2ab   : > { %5834 = vmatpush1.bf16.msra.mxu1 %v5833_v62 }
 0x2ac   : > { %5835 = vmatprep.subr.bf16.mxu1 %v8181_v8 }
 0x2af   : > { %5837 = vmatpush1.bf16.msra.mxu1 %v5836_v1 }
 0x2b0   : > { %5838 = vmatprep.subr.bf16.mxu1 %v8181_v8 }
 0x2da   : > { %v2179_v42 = vpop.f32.mrb[0].mxu0 }
 0x2db   : > { %v2405_v27 = vadd.f32 %v7272_v37, %v2179_v42  ;;  %v2181_v40 = vpop.f32.mrb[1].mxu0 }
 0x2dd   : > { %v2570_v49 = vmul.f32 %v7390_v52, %v2405_v27 }
 0x2de   : > { %v2184_v6 = vpop.f32.mrb[2].mxu0 }
 0x2df   : > { %v2609_v28 = vadd.f32 %v7397_v44, %v2570_v49  ;;  %v2410_v13 = vadd.f32 %v7270_v9, %v2184_v6  ;;  %v2186_v37 = vpop.f32.mrb[3].mxu0 }
 0x2e1   : > { %vm2641_vm1 = vcmp.ge.f32.partialorder %v2609_v28, 0.0  ;;  %v2673_v17 = vmul.f32 0.01, %v2609_v28  ;;  %v2571_v36 = vmul.f32 %v7390_v52, %v2410_v13 }
 0x2e2   : > { %v2189_v63 = vpop.f32.mrb[4].mxu0 }
 0x2e3   : > { %v2705_v7 = vsel %vm2641_vm1, %v2609_v28, %v2673_v17  ;;  %v2610_v16 = vadd.f32 %v7397_v44, %v2571_v36  ;;  %v2415_v39 = vadd.f32 %v7288_v53, %v2189_v63  ;;  %v2191_v50 = vpop.f32.mrb[5].mxu0 }
 0x2e4   : > { %2792 = vst [vmem:[#allocation3 + $0x19] sm:$0xff] %v2705_v7  ;;  %3907 = vmatprep.mubr.f32.mxu1 %v2705_v7 }
 0x2e5   : > { %vm2642_vm2 = vcmp.ge.f32.partialorder %v2610_v16, 0.0  ;;  %v2674_v9 = vmul.f32 0.01, %v2610_v16  ;;  %v2572_v60 = vmul.f32 %v7390_v52, %v2415_v39 }
 0x2e6   : > { %v2194_v42 = vpop.f32.mrb[6].mxu0 }
 0x2e7   : > { %v2706_v58 = vsel %vm2642_vm2, %v2610_v16, %v2674_v9  ;;  %v2611_v10 = vadd.f32 %v7397_v44, %v2572_v60  ;;  %v2420_v27 = vadd.f32 %v7285_v47, %v2194_v42  ;;  %v2196_v40 = vpop.f32.mrb[7].mxu0 }
 0x2e8   : > { %2793 = vst [vmem:[#allocation3 + $0x21] sm:$0xff] %v2706_v58 }
 0x2e9   : > { %vm2643_vm3 = vcmp.ge.f32.partialorder %v2611_v10, 0.0  ;;  %v2675_v62 = vmul.f32 0.01, %v2611_v10  ;;  %v2573_v49 = vmul.f32 %v7390_v52, %v2420_v27 }
 0x2ea   : > { %v2199_v53 = vpop.f32.mrb[8].mxu0 }
 0x2eb   : > { %v2707_v6 = vsel %vm2643_vm3, %v2611_v10, %v2675_v62  ;;  %v2612_v38 = vadd.f32 %v7397_v44, %v2573_v49  ;;  %v2425_v21 = vadd.f32 %v7301_v11, %v2199_v53  ;;  %v2201_v28 = vpop.f32.mrb[9].mxu0  ;;  %v2826_v13 = vld [vmem:[#allocation3 + $0x18] sm:$0xff] }
 0x2ec   : > { %2794 = vst [vmem:[#allocation3 + $0x31] sm:$0xff] %v2707_v6  ;;  %3908 = vmatmul.mubr.f32.gmra.mrb[36].mxu1 %v2826_v13 }
 0x2ed   : > { %vm2644_vm4 = vcmp.ge.f32.partialorder %v2612_v38, 0.0  ;;  %v2676_v37 = vmul.f32 0.01, %v2612_v38  ;;  %v2574_v47 = vmul.f32 %v7390_v52, %v2425_v21  ;;  %3912 = vmatprep.mubr.f32.mxu1 %v2706_v58 }
 0x2ee   : > { %v2204_v1 = vpop.f32.mrb[10].mxu0 }
 0x2ef   : > { %v2708_v17 = vsel %vm2644_vm4, %v2612_v38, %v2676_v37  ;;  %v2613_v36 = vadd.f32 %v7397_v44, %v2574_v47  ;;  %v2430_v63 = vadd.f32 %v7298_v29, %v2204_v1  ;;  %v2206_v7 = vpop.f32.mrb[11].mxu0  ;;  %v7416_v16 = vld [vmem:[#allocation3 + $0x20] sm:$0xff] }
 0x2f0   : > { %2795 = vst [vmem:[#allocation3 + $0x39] sm:$0xff] %v2708_v17  ;;  %3913 = vmatmul.mubr.f32.gmra.mrb[38].mxu1 %v7416_v16 }
 0x2f1   : > { %vm2645_vm5 = vcmp.ge.f32.partialorder %v2613_v36, 0.0  ;;  %v2677_v11 = vmul.f32 0.01, %v2613_v36  ;;  %v2575_v39 = vmul.f32 %v7390_v52, %v2430_v63  ;;  %3917 = vmatprep.mubr.f32.mxu1 %v2707_v6 }
 0x2f2   : > { %v2209_v50 = vpop.f32.mrb[12].mxu0 }
 0x2f3   : > { %v2709_v9 = vsel %vm2645_vm5, %v2613_v36, %v2677_v11  ;;  %v2614_v60 = vadd.f32 %v7397_v44, %v2575_v39  ;;  %v2435_v42 = vadd.f32 %v7313_v51, %v2209_v50  ;;  %v2211_v58 = vpop.f32.mrb[13].mxu0  ;;  %v7422_v10 = vld [vmem:[#allocation3 + $0x30] sm:$0xff] }
 0x2f4   : > { %2796 = vst [vmem:[#allocation3 + $0x49] sm:$0xff] %v2709_v9  ;;  %3918 = vmatmul.mubr.f32.gmra.mrb[40].mxu1 %v7422_v10 }
 0x2f5   : > { %vm2646_vm6 = vcmp.ge.f32.partialorder %v2614_v60, 0.0  ;;  %v2678_v29 = vmul.f32 0.01, %v2614_v60  ;;  %v2576_v27 = vmul.f32 %v7390_v52, %v2435_v42  ;;  %3922 = vmatprep.mubr.f32.mxu1 %v2708_v17 }
 0x2f6   : > { %v2214_v40 = vpop.f32.mrb[14].mxu0 }
 0x2f7   : > { %v2710_v62 = vsel %vm2646_vm6, %v2614_v60, %v2678_v29  ;;  %v2615_v49 = vadd.f32 %v7397_v44, %v2576_v27  ;;  %v2440_v53 = vadd.f32 %v7310_v46, %v2214_v40  ;;  %v2216_v6 = vpop.f32.mrb[15].mxu0  ;;  %v7428_v38 = vld [vmem:[#allocation3 + $0x32] sm:$0xff]  ;;  %v7432_v21 = vld [vmem:[#allocation3 + $0x3a] sm:$0xff] }
 0x2f8   : > { %v7430_v51 = vld [vmem:[#allocation3 + $0x38] sm:$0xff]  ;;  %2797 = vst [vmem:[#allocation3 + $0x51] sm:$0xff] %v2710_v62  ;;  %5470 = vmatprep.mubr.f32.mxu0 %v7428_v38 }
 0x2f9   : > { %3923 = vmatmul.mubr.f32.gmra.mrb[42].mxu1 %v7430_v51  ;;  %vm2647_vm7 = vcmp.ge.f32.partialorder %v2615_v49, 0.0  ;;  %v2679_v28 = vmul.f32 0.01, %v2615_v49  ;;  %v2577_v13 = vmul.f32 %v7390_v52, %v2440_v53  ;;  %5471 = vmatmul.mubr.f32.vlgmr.msra.gmra.mrb[64].mxu0 %v7432_v21 }
 0x2fa   : > { %3927 = vmatprep.mubr.f32.mxu1 %v2709_v9  ;;  %v2219_v46 = vpop.f32.mrb[16].mxu0 }
 0x2fb   : > { %v2711_v37 = vsel %vm2647_vm7, %v2615_v49, %v2679_v28  ;;  %v2616_v47 = vadd.f32 %v7397_v44, %v2577_v13  ;;  %v2445_v1 = vadd.f32 %v7326_v4, %v2219_v46  ;;  %v2221_v17 = vpop.f32.mrb[17].mxu0  ;;  %v7440_v36 = vld [vmem:[#allocation3 + $0x48] sm:$0xff] }
 0x2fc   : > { %2798 = vst [vmem:[#allocation3 + $0x61] sm:$0xff] %v2711_v37 }
 0x2fd   : > { %3928 = vmatmul.mubr.f32.gmra.mrb[44].mxu1 %v7440_v36  ;;  %vm2648_vm8 = vcmp.ge.f32.partialorder %v2616_v47, 0.0  ;;  %v2680_v63 = vmul.f32 0.01, %v2616_v47  ;;  %v2578_v7 = vmul.f32 %v7390_v52, %v2445_v1 }
 0x2fe   : > { %3932 = vmatprep.mubr.f32.mxu1 %v2710_v62  ;;  %v2224_v11 = vpop.f32.mrb[18].mxu0 }
 0x2ff   : > { %v2712_v39 = vsel %vm2648_vm8, %v2616_v47, %v2680_v63  ;;  %v2617_v50 = vadd.f32 %v7397_v44, %v2578_v7  ;;  %v2450_v9 = vadd.f32 %v7324_v61, %v2224_v11  ;;  %v2226_v60 = vpop.f32.mrb[19].mxu0  ;;  %v7446_v42 = vld [vmem:[#allocation3 + $0x4a] sm:$0xff]  ;;  %v7450_v58 = vld [vmem:[#allocation3 + $0x52] sm:$0xff] }
 0x300   : > { %v7448_v4 = vld [vmem:[#allocation3 + $0x50] sm:$0xff]  ;;  %2799 = vst [vmem:[#allocation3 + $0x69] sm:$0xff] %v2712_v39  ;;  %5473 = vmatprep.mubr.f32.mxu0 %v7446_v42 }
 0x301   : > { %3933 = vmatmul.mubr.f32.gmra.mrb[46].mxu1 %v7448_v4  ;;  %vm2649_vm9 = vcmp.ge.f32.partialorder %v2617_v50, 0.0  ;;  %v2681_v29 = vmul.f32 0.01, %v2617_v50  ;;  %v2579_v27 = vmul.f32 %v7390_v52, %v2450_v9  ;;  %5474 = vmatmul.mubr.f32.gmra.mrb[66].mxu0 %v7450_v58 }
 0x302   : > { %3937 = vmatprep.mubr.f32.mxu1 %v2711_v37  ;;  %v2229_v61 = vpop.f32.mrb[20].mxu0 }
 0x303   : > { %v2713_v40 = vsel %vm2649_vm9, %v2617_v50, %v2681_v29  ;;  %v2618_v62 = vadd.f32 %v7397_v44, %v2579_v27  ;;  %v2455_v49 = vadd.f32 %v7333_v59, %v2229_v61  ;;  %v2231_v53 = vpop.f32.mrb[21].mxu0  ;;  %v7458_v6 = vld [vmem:[#allocation3 + $0x60] sm:$0xff] }
 0x304   : > { %2800 = vst [vmem:[#allocation3 + $0x79] sm:$0xff] %v2713_v40 }
 0x305   : > { %3938 = vmatmul.mubr.f32.gmra.mrb[48].mxu1 %v7458_v6  ;;  %vm2650_vm10 = vcmp.ge.f32.partialorder %v2618_v62, 0.0  ;;  %v2682_v28 = vmul.f32 0.01, %v2618_v62  ;;  %v2580_v13 = vmul.f32 %v7390_v52, %v2455_v49 }
 0x306   : > { %3942 = vmatprep.mubr.f32.mxu1 %v2712_v39  ;;  %v2234_v46 = vpop.f32.mrb[22].mxu0 }
 0x307   : > { %v2714_v47 = vsel %vm2650_vm10, %v2618_v62, %v2682_v28  ;;  %v2619_v37 = vadd.f32 %v7397_v44, %v2580_v13  ;;  %v2460_v1 = vadd.f32 %v7331_v54, %v2234_v46  ;;  %v2236_v17 = vpop.f32.mrb[23].mxu0  ;;  %v7464_v63 = vld [vmem:[#allocation3 + $0x62] sm:$0xff]  ;;  %v7468_v7 = vld [vmem:[#allocation3 + $0x6a] sm:$0xff] }
 0x308   : > { %v7466_v59 = vld [vmem:[#allocation3 + $0x68] sm:$0xff]  ;;  %2801 = vst [vmem:[#allocation3 + $0x81] sm:$0xff] %v2714_v47  ;;  %5476 = vmatprep.mubr.f32.mxu0 %v7464_v63 }
 0x309   : > { %3943 = vmatmul.mubr.f32.gmra.mrb[50].mxu1 %v7466_v59  ;;  %vm2651_vm11 = vcmp.ge.f32.partialorder %v2619_v37, 0.0  ;;  %v2683_v11 = vmul.f32 0.01, %v2619_v37  ;;  %v2581_v39 = vmul.f32 %v7390_v52, %v2460_v1  ;;  %5477 = vmatmul.mubr.f32.gmra.mrb[68].mxu0 %v7468_v7 }
 0x30a   : > { %3947 = vmatprep.mubr.f32.mxu1 %v2713_v40  ;;  %v2239_v54 = vpop.f32.mrb[24].mxu0 }
 0x30b   : > { %v2715_v50 = vsel %vm2651_vm11, %v2619_v37, %v2683_v11  ;;  %v2620_v9 = vadd.f32 %v7397_v44, %v2581_v39  ;;  %v2465_v60 = vadd.f32 %v7339_v19, %v2239_v54  ;;  %v2241_v29 = vpop.f32.mrb[25].mxu0  ;;  %v7476_v27 = vld [vmem:[#allocation3 + $0x78] sm:$0xff] }
 0x30c   : > { %2802 = vst [vmem:[#allocation3 + $0x91] sm:$0xff] %v2715_v50 }
 0x30d   : > { %3948 = vmatmul.mubr.f32.gmra.mrb[52].mxu1 %v7476_v27  ;;  %vm2652_vm12 = vcmp.ge.f32.partialorder %v2620_v9, 0.0  ;;  %v2684_v61 = vmul.f32 0.01, %v2620_v9  ;;  %v2582_v62 = vmul.f32 %v7390_v52, %v2465_v60 }
 0x30e   : > { %3952 = vmatprep.mubr.f32.mxu1 %v2714_v47  ;;  %v2244_v49 = vpop.f32.mrb[26].mxu0 }
 0x30f   : > { %v2716_v53 = vsel %vm2652_vm12, %v2620_v9, %v2684_v61  ;;  %v2621_v40 = vadd.f32 %v7397_v44, %v2582_v62  ;;  %v2470_v28 = vadd.f32 %v7337_v2, %v2244_v49  ;;  %v2246_v13 = vpop.f32.mrb[27].mxu0  ;;  %v7482_v46 = vld [vmem:[#allocation3 + $0x7a] sm:$0xff]  ;;  %v7486_v37 = vld [vmem:[#allocation3 + $0x82] sm:$0xff] }
 0x310   : > { %v7484_v19 = vld [vmem:[#allocation3 + $0x80] sm:$0xff]  ;;  %2803 = vst [vmem:[#allocation3 + $0x99] sm:$0xff] %v2716_v53  ;;  %5479 = vmatprep.mubr.f32.mxu0 %v7482_v46 }
 0x311   : > { %3953 = vmatmul.mubr.f32.gmra.mrb[54].mxu1 %v7484_v19  ;;  %vm2653_vm13 = vcmp.ge.f32.partialorder %v2621_v40, 0.0  ;;  %v2685_v47 = vmul.f32 0.01, %v2621_v40  ;;  %v2583_v1 = vmul.f32 %v7390_v52, %v2470_v28  ;;  %5480 = vmatmul.mubr.f32.gmra.mrb[70].mxu0 %v7486_v37 }
 0x312   : > { %3957 = vmatprep.mubr.f32.mxu1 %v2715_v50  ;;  %v2249_v2 = vpop.f32.mrb[28].mxu0 }
 0x313   : > { %v2717_v17 = vsel %vm2653_vm13, %v2621_v40, %v2685_v47  ;;  %v2622_v11 = vadd.f32 %v7397_v44, %v2583_v1  ;;  %v2475_v39 = vadd.f32 %v7344_v12, %v2249_v2  ;;  %v2251_v54 = vpop.f32.mrb[29].mxu0  ;;  %v7494_v9 = vld [vmem:[#allocation3 + $0x90] sm:$0xff] }
 0x314   : > { %2804 = vst [vmem:[#allocation3 + $0xa9] sm:$0xff] %v2717_v17 }
 0x315   : > { %3958 = vmatmul.mubr.f32.gmra.mrb[56].mxu1 %v7494_v9  ;;  %vm2654_vm14 = vcmp.ge.f32.partialorder %v2622_v11, 0.0  ;;  %v2686_v60 = vmul.f32 0.01, %v2622_v11  ;;  %v2584_v29 = vmul.f32 %v7390_v52, %v2475_v39 }
 0x316   : > { %3962 = vmatprep.mubr.f32.mxu1 %v2716_v53  ;;  %v2254_v61 = vpop.f32.mrb[30].mxu0 }
 0x317   : > { %v2718_v62 = vsel %vm2654_vm14, %v2622_v11, %v2686_v60  ;;  %v2623_v50 = vadd.f32 %v7397_v44, %v2584_v29  ;;  %v2480_v49 = vadd.f32 %v7342_v34, %v2254_v61  ;;  %v2256_v40 = vpop.f32.mrb[31].mxu0  ;;  %v7500_v28 = vld [vmem:[#allocation3 + $0x92] sm:$0xff]  ;;  %v7504_v13 = vld [vmem:[#allocation3 + $0x9a] sm:$0xff] }
 0x318   : > { %v7502_v12 = vld [vmem:[#allocation3 + $0x98] sm:$0xff]  ;;  %2805 = vst [vmem:[#allocation3 + $0xb1] sm:$0xff] %v2718_v62  ;;  %5482 = vmatprep.mubr.f32.mxu0 %v7500_v28 }
 0x319   : > { %3963 = vmatmul.mubr.f32.gmra.mrb[58].mxu1 %v7502_v12  ;;  %vm2655_vm15 = vcmp.ge.f32.partialorder %v2623_v50, 0.0  ;;  %v2687_v53 = vmul.f32 0.01, %v2623_v50  ;;  %v2585_v47 = vmul.f32 %v7390_v52, %v2480_v49  ;;  %5483 = vmatmul.mubr.f32.gmra.mrb[72].mxu0 %v7504_v13 }
 0x31a   : > { %3967 = vmatprep.mubr.f32.mxu1 %v2717_v17  ;;  %v2259_v34 = vpop.f32.mrb[32].mxu0 }
 0x31b   : > { %v2719_v1 = vsel %vm2655_vm15, %v2623_v50, %v2687_v53  ;;  %v2624_v2 = vadd.f32 %v7397_v44, %v2585_v47  ;;  %v2485_v11 = vadd.f32 %v7349_v57, %v2259_v34  ;;  %v2261_v39 = vpop.f32.mrb[33].mxu0  ;;  %v7512_v54 = vld [vmem:[#allocation3 + $0xa8] sm:$0xff] }
 0x31c   : > { %2806 = vst [vmem:[#allocation3 + $0xc1] sm:$0xff] %v2719_v1 }
 0x31d   : > { %3968 = vmatmul.mubr.f32.gmra.mrb[60].mxu1 %v7512_v54  ;;  %vm2656_vm0 = vcmp.ge.f32.partialorder %v2624_v2, 0.0  ;;  %v2688_v60 = vmul.f32 0.01, %v2624_v2  ;;  %v2586_v29 = vmul.f32 %v7390_v52, %v2485_v11 }
 0x31e   : > { %3972 = vmatprep.mubr.f32.mxu1 %v2718_v62  ;;  %v2264_v61 = vpop.f32.mrb[34].mxu0 }
 0x31f   : > { %v2720_v49 = vsel %vm2656_vm0, %v2624_v2, %v2688_v60  ;;  %v2625_v17 = vadd.f32 %v7397_v44, %v2586_v29  ;;  %v2490_v50 = vadd.f32 %v7347_v43, %v2264_v61  ;;  %v2266_v40 = vpop.f32.mrb[35].mxu0  ;;  %v7518_v53 = vld [vmem:[#allocation3 + $0xaa] sm:$0xff]  ;;  %v7522_v47 = vld [vmem:[#allocation3 + $0xb2] sm:$0xff] }
 0x320   : > { %v7520_v57 = vld [vmem:[#allocation3 + $0xb0] sm:$0xff]  ;;  %2807 = vst [vmem:[#allocation3 + $0xc9] sm:$0xff] %v2720_v49  ;;  %5485 = vmatprep.mubr.f32.mxu0 %v7518_v53 }
 0x321   : > { %3973 = vmatmul.mubr.f32.gmra.mrb[62].mxu1 %v7520_v57  ;;  %vm2657_vm1 = vcmp.ge.f32.partialorder %v2625_v17, 0.0  ;;  %v2689_v62 = vmul.f32 0.01, %v2625_v17  ;;  %v2587_v34 = vmul.f32 %v7390_v52, %v2490_v50  ;;  %5486 = vmatmul.mubr.f32.gmra.mrb[74].mxu0 %v7522_v47 }
 0x322   : > { %3977 = vmatprep.mubr.f32.mxu1 %v2719_v1  ;;  %v2269_v43 = vpop.f32.mrb[36].mxu0 }
 0x323   : > { %v2721_v2 = vsel %vm2657_vm1, %v2625_v17, %v2689_v62  ;;  %v2626_v11 = vadd.f32 %v7397_v44, %v2587_v34  ;;  %v2495_v39 = vadd.f32 %v7354_v55, %v2269_v43  ;;  %v2271_v60 = vpop.f32.mrb[37].mxu0  ;;  %v7530_v29 = vld [vmem:[#allocation3 + $0xc0] sm:$0xff] }
 0x324   : > { %2808 = vst [vmem:[#allocation3 + $0xd9] sm:$0xff] %v2721_v2 }
 0x325   : > { %3978 = vmatmul.mubr.f32.gmra.mrb[64].mxu1 %v7530_v29  ;;  %vm2658_vm2 = vcmp.ge.f32.partialorder %v2626_v11, 0.0  ;;  %v2690_v61 = vmul.f32 0.01, %v2626_v11  ;;  %v2588_v40 = vmul.f32 %v7390_v52, %v2495_v39 }
 0x326   : > { %3982 = vmatprep.mubr.f32.mxu1 %v2720_v49  ;;  %v2274_v50 = vpop.f32.mrb[38].mxu0 }
 0x327   : > { %v2722_v56 = vsel %vm2658_vm2, %v2626_v11, %v2690_v61  ;;  %v2627_v1 = vadd.f32 %v7397_v44, %v2588_v40  ;;  %v2500_v17 = vadd.f32 %v7352_v48, %v2274_v50  ;;  %v2276_v62 = vpop.f32.mrb[39].mxu0  ;;  %v7536_v34 = vld [vmem:[#allocation3 + $0xc2] sm:$0xff]  ;;  %v7540_v43 = vld [vmem:[#allocation3 + $0xca] sm:$0xff] }
 0x328   : > { %v7538_v55 = vld [vmem:[#allocation3 + $0xc8] sm:$0xff]  ;;  %2809 = vst [vmem:[#allocation3 + $0xe1] sm:$0xff] %v2722_v56  ;;  %5488 = vmatprep.mubr.f32.mxu0 %v7536_v34 }
 0x329   : > { %3983 = vmatmul.mubr.f32.gmra.mrb[66].mxu1 %v7538_v55  ;;  %vm2659_vm3 = vcmp.ge.f32.partialorder %v2627_v1, 0.0  ;;  %v2691_v49 = vmul.f32 0.01, %v2627_v1  ;;  %v2589_v11 = vmul.f32 %v7390_v52, %v2500_v17  ;;  %5489 = vmatmul.mubr.f32.gmra.mrb[76].mxu0 %v7540_v43 }
 0x32a   : > { %3987 = vmatprep.mubr.f32.mxu1 %v2721_v2  ;;  %v2279_v48 = vpop.f32.mrb[40].mxu0 }
 0x32b   : > { %v2723_v39 = vsel %vm2659_vm3, %v2627_v1, %v2691_v49  ;;  %v2628_v60 = vadd.f32 %v7397_v44, %v2589_v11  ;;  %v2505_v61 = vadd.f32 %v7359_v0, %v2279_v48  ;;  %v2281_v40 = vpop.f32.mrb[41].mxu0  ;;  %v7548_v50 = vld [vmem:[#allocation3 + $0xd8] sm:$0xff] }
 0x32c   : > { %2810 = vst [vmem:[#allocation3 + $0xf1] sm:$0xff] %v2723_v39 }
 0x32d   : > { %3988 = vmatmul.mubr.f32.gmra.mrb[68].mxu1 %v7548_v50  ;;  %vm2660_vm4 = vcmp.ge.f32.partialorder %v2628_v60, 0.0  ;;  %v2692_v62 = vmul.f32 0.01, %v2628_v60  ;;  %v2590_v20 = vmul.f32 %v7390_v52, %v2505_v61 }
 0x32e   : > { %3992 = vmatprep.mubr.f32.mxu1 %v2722_v56  ;;  %v2284_v17 = vpop.f32.mrb[42].mxu0 }
 0x32f   : > { %v2724_v5 = vsel %vm2660_vm4, %v2628_v60, %v2692_v62  ;;  %v2629_v2 = vadd.f32 %v7397_v44, %v2590_v20  ;;  %v2510_v1 = vadd.f32 %v7357_v18, %v2284_v17  ;;  %v2286_v49 = vpop.f32.mrb[43].mxu0  ;;  %v7554_v11 = vld [vmem:[#allocation3 + $0xda] sm:$0xff]  ;;  %v7558_v48 = vld [vmem:[#allocation3 + $0xe2] sm:$0xff] }
 0x330   : > { %v7556_v0 = vld [vmem:[#allocation3 + $0xe0] sm:$0xff]  ;;  %2811 = vst [vmem:[#allocation3 + $0xf9] sm:$0xff] %v2724_v5  ;;  %5491 = vmatprep.mubr.f32.mxu0 %v7554_v11 }
 0x331   : > { %3993 = vmatmul.mubr.f32.gmra.mrb[70].mxu1 %v7556_v0  ;;  %vm2661_vm5 = vcmp.ge.f32.partialorder %v2629_v2, 0.0  ;;  %v2693_v56 = vmul.f32 0.01, %v2629_v2  ;;  %v2591_v60 = vmul.f32 %v7390_v52, %v2510_v1  ;;  %5492 = vmatmul.mubr.f32.gmra.mrb[78].mxu0 %v7558_v48 }
 0x332   : > { %3997 = vmatprep.mubr.f32.mxu1 %v2723_v39  ;;  %v2289_v20 = vpop.f32.mrb[44].mxu0 }
 0x333   : > { %v2725_v18 = vsel %vm2661_vm5, %v2629_v2, %v2693_v56  ;;  %v2630_v61 = vadd.f32 %v7397_v44, %v2591_v60  ;;  %v2515_v40 = vadd.f32 %v7364_v41, %v2289_v20  ;;  %v2291_v62 = vpop.f32.mrb[45].mxu0  ;;  %v7566_v17 = vld [vmem:[#allocation3 + $0xf0] sm:$0xff] }
 0x334   : > { %2812 = vst [vmem:[#allocation3 + $0x109] sm:$0xff] %v2725_v18 }
 0x335   : > { %3998 = vmatmul.mubr.f32.gmra.mrb[72].mxu1 %v7566_v17  ;;  %vm2662_vm6 = vcmp.ge.f32.partialorder %v2630_v61, 0.0  ;;  %v2694_v49 = vmul.f32 0.01, %v2630_v61  ;;  %v2592_v3 = vmul.f32 %v7390_v52, %v2515_v40 }
 0x336   : > { %4002 = vmatprep.mubr.f32.mxu1 %v2724_v5  ;;  %v2294_v1 = vpop.f32.mrb[46].mxu0 }
 0x337   : > { %v2726_v45 = vsel %vm2662_vm6, %v2630_v61, %v2694_v49  ;;  %v2631_v39 = vadd.f32 %v7397_v44, %v2592_v3  ;;  %v2520_v2 = vadd.f32 %v7362_v35, %v2294_v1  ;;  %v2296_v56 = vpop.f32.mrb[47].mxu0  ;;  %v7572_v60 = vld [vmem:[#allocation3 + $0xf2] sm:$0xff]  ;;  %v7576_v20 = vld [vmem:[#allocation3 + $0xfa] sm:$0xff] }
 0x338   : > { %v7574_v41 = vld [vmem:[#allocation3 + $0xf8] sm:$0xff]  ;;  %2813 = vst [vmem:[#allocation3 + $0x111] sm:$0xff] %v2726_v45  ;;  %5494 = vmatprep.mubr.f32.mxu0 %v7572_v60 }
 0x339   : > { %4003 = vmatmul.mubr.f32.gmra.mrb[74].mxu1 %v7574_v41  ;;  %vm2663_vm7 = vcmp.ge.f32.partialorder %v2631_v39, 0.0  ;;  %v2695_v5 = vmul.f32 0.01, %v2631_v39  ;;  %v2593_v61 = vmul.f32 %v7390_v52, %v2520_v2  ;;  %5495 = vmatmul.mubr.f32.gmra.mrb[80].mxu0 %v7576_v20 }
 0x33a   : > { %4007 = vmatprep.mubr.f32.mxu1 %v2725_v18  ;;  %v2299_v3 = vpop.f32.mrb[48].mxu0 }
 0x33b   : > { %v2727_v35 = vsel %vm2663_vm7, %v2631_v39, %v2695_v5  ;;  %v2632_v40 = vadd.f32 %v7397_v44, %v2593_v61  ;;  %v2525_v62 = vadd.f32 %v7369_v25, %v2299_v3  ;;  %v2301_v49 = vpop.f32.mrb[49].mxu0  ;;  %v7584_v1 = vld [vmem:[#allocation3 + $0x108] sm:$0xff] }
 0x33c   : > { %2814 = vst [vmem:[#allocation3 + $0x121] sm:$0xff] %v2727_v35 }
 0x33d   : > { %4008 = vmatmul.mubr.f32.gmra.mrb[76].mxu1 %v7584_v1  ;;  %vm2664_vm8 = vcmp.ge.f32.partialorder %v2632_v40, 0.0  ;;  %v2696_v56 = vmul.f32 0.01, %v2632_v40  ;;  %v2594_v32 = vmul.f32 %v7390_v52, %v2525_v62 }
 0x33e   : > { %4012 = vmatprep.mubr.f32.mxu1 %v2726_v45  ;;  %v2304_v2 = vpop.f32.mrb[50].mxu0 }
 0x33f   : > { %v2728_v26 = vsel %vm2664_vm8, %v2632_v40, %v2696_v56  ;;  %v2633_v18 = vadd.f32 %v7397_v44, %v2594_v32  ;;  %v2530_v39 = vadd.f32 %v7367_v22, %v2304_v2  ;;  %v2306_v5 = vpop.f32.mrb[51].mxu0  ;;  %v7590_v61 = vld [vmem:[#allocation3 + $0x10a] sm:$0xff]  ;;  %v7594_v3 = vld [vmem:[#allocation3 + $0x112] sm:$0xff] }
 0x340   : > { %v7592_v25 = vld [vmem:[#allocation3 + $0x110] sm:$0xff]  ;;  %8199 = vst [vmem:[#allocation20_spill] sm:$0xff] %v7594_v3  ;;  %2815 = vst [vmem:[#allocation3 + $0x129] sm:$0xff] %v2728_v26  ;;  %5497 = vmatprep.mubr.f32.mxu0 %v7590_v61 }
 0x341   : > { %4013 = vmatmul.mubr.f32.gmra.mrb[78].mxu1 %v7592_v25  ;;  %vm2665_vm9 = vcmp.ge.f32.partialorder %v2633_v18, 0.0  ;;  %v2697_v45 = vmul.f32 0.01, %v2633_v18  ;;  %v2595_v40 = vmul.f32 %v7390_v52, %v2530_v39  ;;  %5498 = vmatmul.mubr.f32.gmra.mrb[82].mxu0 %v7594_v3 }
 0x342   : > { %4017 = vmatprep.mubr.f32.mxu1 %v2727_v35  ;;  %v2309_v32 = vpop.f32.mrb[52].mxu0 }
 0x343   : > { %v2729_v22 = vsel %vm2665_vm9, %v2633_v18, %v2697_v45  ;;  %v2634_v62 = vadd.f32 %v7397_v44, %v2595_v40  ;;  %v2535_v49 = vadd.f32 %v7374_v15, %v2309_v32  ;;  %v2311_v56 = vpop.f32.mrb[53].mxu0  ;;  %v7602_v2 = vld [vmem:[#allocation3 + $0x120] sm:$0xff] }
 0x344   : > { %2816 = vst [vmem:[#allocation3 + $0x139] sm:$0xff] %v2729_v22 }
 0x345   : > { %4018 = vmatmul.mubr.f32.gmra.mrb[80].mxu1 %v7602_v2  ;;  %vm2666_vm10 = vcmp.ge.f32.partialorder %v2634_v62, 0.0  ;;  %v2698_v5 = vmul.f32 0.01, %v2634_v62  ;;  %v2596_v23 = vmul.f32 %v7390_v52, %v2535_v49 }
 0x346   : > { %4022 = vmatprep.mubr.f32.mxu1 %v2728_v26  ;;  %v2314_v39 = vpop.f32.mrb[54].mxu0 }
 0x347   : > { %v2730_v3 = vsel %vm2666_vm10, %v2634_v62, %v2698_v5  ;;  %v2635_v35 = vadd.f32 %v7397_v44, %v2596_v23  ;;  %v2540_v18 = vadd.f32 %v7372_v30, %v2314_v39  ;;  %v2316_v45 = vpop.f32.mrb[55].mxu0  ;;  %v7608_v40 = vld [vmem:[#allocation3 + $0x122] sm:$0xff]  ;;  %v7612_v32 = vld [vmem:[#allocation3 + $0x12a] sm:$0xff] }
 0x348   : > { %8200 = vst [vmem:[#allocation21_spill] sm:$0xff] %v7608_v40  ;;  %v7610_v15 = vld [vmem:[#allocation3 + $0x128] sm:$0xff]  ;;  %8201 = vst [vmem:[#allocation22_spill] sm:$0xff] %v7612_v32  ;;  %5500 = vmatprep.mubr.f32.mxu0 %v7608_v40 }
 0x349   : > { %2817 = vst [vmem:[#allocation3 + $0x141] sm:$0xff] %v2730_v3  ;;  %4023 = vmatmul.mubr.f32.gmra.mrb[82].mxu1 %v7610_v15  ;;  %vm2667_vm11 = vcmp.ge.f32.partialorder %v2635_v35, 0.0  ;;  %v2699_v26 = vmul.f32 0.01, %v2635_v35  ;;  %v2597_v62 = vmul.f32 %v7390_v52, %v2540_v18  ;;  %5501 = vmatmul.mubr.f32.gmra.mrb[84].mxu0 %v7612_v32 }
 0x34a   : > { %4027 = vmatprep.mubr.f32.mxu1 %v2729_v22  ;;  %v2319_v23 = vpop.f32.mrb[56].mxu0 }
 0x34b   : > { %v2731_v30 = vsel %vm2667_vm11, %v2635_v35, %v2699_v26  ;;  %v2636_v49 = vadd.f32 %v7397_v44, %v2597_v62  ;;  %v2545_v56 = vadd.f32 %v7379_v14, %v2319_v23  ;;  %v2321_v5 = vpop.f32.mrb[57].mxu0  ;;  %v7620_v39 = vld [vmem:[#allocation3 + $0x138] sm:$0xff] }
 0x34c   : > { %2818 = vst [vmem:[#allocation3 + $0x151] sm:$0xff] %v2731_v30 }
 0x34d   : > { %4028 = vmatmul.mubr.f32.gmra.mrb[84].mxu1 %v7620_v39  ;;  %vm2668_vm12 = vcmp.ge.f32.partialorder %v2636_v49, 0.0  ;;  %v2700_v45 = vmul.f32 0.01, %v2636_v49  ;;  %v2598_v40 = vmul.f32 %v7390_v52, %v2545_v56 }
 0x34e   : > { %4032 = vmatprep.mubr.f32.mxu1 %v2730_v3  ;;  %v2324_v18 = vpop.f32.mrb[58].mxu0 }
 0x34f   : > { %v7624_v32 = vsel %vm2668_vm12, %v2636_v49, %v2700_v45  ;;  %v2637_v22 = vadd.f32 %v7397_v44, %v2598_v40  ;;  %v2550_v35 = vadd.f32 %v7377_v33, %v2324_v18  ;;  %v2326_v26 = vpop.f32.mrb[59].mxu0 }
 0x350   : > { %8202 = vst [vmem:[#allocation23_spill] sm:$0xff] %v7624_v32  ;;  %v7628_v14 = vld [vmem:[#allocation3 + $0x13a] sm:$0xff]  ;;  %v7632_v23 = vld [vmem:[#allocation3 + $0x142] sm:$0xff]  ;;  %2819 = vst [vmem:[#allocation3 + $0x159] sm:$0xff] %v7624_v32 }
 0x351   : > { %v7630_v62 = vld [vmem:[#allocation3 + $0x140] sm:$0xff]  ;;  %5503 = vmatprep.mubr.f32.mxu0 %v7628_v14  ;;  %vm2669_vm13 = vcmp.ge.f32.partialorder %v2637_v22, 0.0  ;;  %v2701_v3 = vmul.f32 0.01, %v2637_v22  ;;  %v2599_v49 = vmul.f32 %v7390_v52, %v2550_v35 }
 0x352   : > { %4033 = vmatmul.mubr.f32.gmra.mrb[86].mxu1 %v7630_v62  ;;  %5504 = vmatmul.mubr.f32.gmra.mrb[86].mxu0 %v7632_v23  ;;  %v2329_v33 = vpop.f32.mrb[60].mxu0 }
 0x353   : > { %4037 = vmatprep.mubr.f32.mxu1 %v2731_v30  ;;  %v7639_v40 = vsel %vm2669_vm13, %v2637_v22, %v2701_v3  ;;  %v2638_v56 = vadd.f32 %v7397_v44, %v2599_v49  ;;  %v2555_v5 = vadd.f32 %v7384_v31, %v2329_v33  ;;  %v2331_v45 = vpop.f32.mrb[61].mxu0  ;;  %v7643_v18 = vld [vmem:[#allocation3 + $0x150] sm:$0xff] }
 0x354   : > { %2820 = vst [vmem:[#allocation3 + $0x169] sm:$0xff] %v7639_v40 }
 0x355   : > { %vm2670_vm14 = vcmp.ge.f32.partialorder %v2638_v56, 0.0  ;;  %v2702_v26 = vmul.f32 0.01, %v2638_v56  ;;  %v2600_v35 = vmul.f32 %v7390_v52, %v2555_v5 }
 0x356   : > { %4038 = vmatmul.mubr.f32.gmra.mrb[88].mxu1 %v7643_v18  ;;  %v2334_v30 = vpop.f32.mrb[62].mxu0 }
 0x357   : > { %4042 = vmatprep.mubr.f32.mxu1 %v7624_v32  ;;  %v7649_v22 = vsel %vm2670_vm14, %v2638_v56, %v2702_v26  ;;  %v2639_v3 = vadd.f32 %v7397_v44, %v2600_v35  ;;  %v2560_v31 = vadd.f32 %v7382_v24, %v2334_v30  ;;  %v2336_v49 = vpop.f32.mrb[63].mxu0  ;;  %v7653_v33 = vld [vmem:[#allocation3 + $0x158] sm:$0xff]  ;;  %v3753_v35 = vld [vmem:[#allocation8 + $0x200] sm:$0xff] }
 0x358   : > { %8203 = vst [vmem:[#allocation24_spill] sm:$0xff] %v7649_v22  ;;  %2821 = vst [vmem:[#allocation3 + $0x171] sm:$0xff] %v7649_v22  ;;  %v3754_v30 = vld [vmem:[#allocation8 + $0x208] sm:$0xff] }
 0x359   : > { %vm2671_vm15 = vcmp.ge.f32.partialorder %v2639_v3, 0.0  ;;  %v2703_v45 = vmul.f32 0.01, %v2639_v3  ;;  %v2601_v5 = vmul.f32 %v7390_v52, %v2560_v31  ;;  %v5839_v31 = vpack.c.bf16 %v3754_v30, %v3753_v35  ;;  %v3759_v35 = vld [vmem:[#allocation8 + $0x230] sm:$0xff]  ;;  %v3760_v30 = vld [vmem:[#allocation8 + $0x238] sm:$0xff] }
 0x35a   : > { %4043 = vmatmul.mubr.f32.gmra.mrb[90].mxu1 %v7653_v33 }
 0x35b   : > { %4047 = vmatprep.mubr.f32.mxu1 %v7639_v40  ;;  %v7659_v32 = vsel %vm2671_vm15, %v2639_v3, %v2703_v45  ;;  %v2640_v56 = vadd.f32 %v7397_v44, %v2601_v5  ;;  %v7662_v26 = vld [vmem:[#allocation3 + $0x168] sm:$0xff]  ;;  %v3016_v44 = vld [vmem:[#allocation3 + $0x18] sm:$0xff]  ;;  %v3755_v45 = vld [vmem:[#allocation8 + $0x210] sm:$0xff] }
 0x35c   : > { %8204 = vst [vmem:[#allocation25_spill] sm:$0xff] %v7659_v32  ;;  %2822 = vst [vmem:[#allocation3 + $0x181] sm:$0xff] %v7659_v32  ;;  %v2952_v3 = vld [vmem:[#allocation3 + $0x2] sm:$0xff]  ;;  %v2953_v32 = vld [vmem:[#allocation3 + $0xa] sm:$0xff] }
 0x35d   : > { %vm2672_vm0 = vcmp.ge.f32.partialorder %v2640_v56, 0.0  ;;  %v2704_v24 = vmul.f32 0.01, %v2640_v56  ;;  %v3756_v5 = vld [vmem:[#allocation8 + $0x218] sm:$0xff] }
 0x35e   : > { %4048 = vmatmul.mubr.f32.gmra.mrb[92].mxu1 %v7662_v26 }
 0x35f   : > { %4052 = vmatprep.mubr.f32.mxu1 %v7649_v22  ;;  %v7667_v49 = vsel %vm2672_vm0, %v2640_v56, %v2704_v24  ;;  %v7669_v52 = vld [vmem:[#allocation3 + $0x170] sm:$0xff]  ;;  %v5842_v22 = vpack.c.bf16 %v3756_v5, %v3755_v45  ;;  %v3758_v24 = vld [vmem:[#allocation8 + $0x228] sm:$0xff]  ;;  %v3764_v45 = vld [vmem:[#allocation8 + $0x258] sm:$0xff] }
 0x360   : > { %8205 = vst [vmem:[#allocation26_spill] sm:$0xff] %v7667_v49  ;;  %2823 = vst [vmem:[#allocation3 + $0x189] sm:$0xff] %v7667_v49  ;;  %v3757_v56 = vld [vmem:[#allocation8 + $0x220] sm:$0xff]  ;;  %v3766_v5 = vld [vmem:[#allocation8 + $0x268] sm:$0xff] }
 0x361   : > { %v5845_v49 = vpack.c.bf16 %v3758_v24, %v3757_v56  ;;  %v3767_v56 = vld [vmem:[#allocation8 + $0x270] sm:$0xff]  ;;  %v3768_v24 = vld [vmem:[#allocation8 + $0x278] sm:$0xff] }
 0x362   : > { %4053 = vmatmul.mubr.f32.gmra.mrb[94].mxu1 %v7669_v52 }
 0x363   : > { %4122 = vmatprep.mubr.f32.mxu1 %v3016_v44  ;;  %v7677_v44 = vld [vmem:[#allocation3 + $0x1a] sm:$0xff] }
 0x366   : > { %4123 = vmatmul.mubr.f32.vlgmr.msra.gmra.mrb[32].mxu1 %v2952_v3  ;;  %v3761_v3 = vld [vmem:[#allocation8 + $0x240] sm:$0xff] }
 0x367   : > { %4127 = vmatprep.mubr.f32.mxu1 %v7416_v16  ;;  %5840 = vmatpush1.bf16.msra.mxu1 %v5839_v31  ;;  %v5848_v16 = vpack.c.bf16 %v3760_v30, %v3759_v35  ;;  %v7682_v31 = vld [vmem:[#allocation3 + $0x22] sm:$0xff]  ;;  %v3770_v35 = vld [vmem:[#allocation8 + $0x288] sm:$0xff] }
 0x368   : > { %5841 = vmatprep.subr.bf16.mxu1 %v8181_v8  ;;  %v3772_v30 = vld [vmem:[#allocation8 + $0x298] sm:$0xff] }
 0x36a   : > { %4128 = vmatmul.mubr.f32.gmra.mrb[34].mxu1 %v2953_v32  ;;  %v3762_v32 = vld [vmem:[#allocation8 + $0x248] sm:$0xff] }
 0x36b   : > { %4132 = vmatprep.mubr.f32.mxu1 %v7422_v10  ;;  %5843 = vmatpush1.bf16.msra.mxu1 %v5842_v22  ;;  %v5851_v10 = vpack.c.bf16 %v3762_v32, %v3761_v3  ;;  %v3763_v22 = vld [vmem:[#allocation8 + $0x250] sm:$0xff]  ;;  %v3776_v3 = vld [vmem:[#allocation8 + $0x2b8] sm:$0xff]  ;;  %v3778_v32 = vld [vmem:[#allocation8 + $0x2c8] sm:$0xff] }
 0x36c   : > { %5844 = vmatprep.subr.bf16.mxu1 %v8181_v8 }
 0x36e   : > { %4133 = vmatmul.mubr.f32.gmra.mrb[36].mxu1 %v7677_v44 }
 0x36f   : > { %4137 = vmatprep.mubr.f32.mxu1 %v7430_v51  ;;  %5846 = vmatpush1.bf16.msra.mxu1 %v5845_v49  ;;  %v5854_v51 = vpack.c.bf16 %v3764_v45, %v3763_v22  ;;  %v3765_v49 = vld [vmem:[#allocation8 + $0x260] sm:$0xff]  ;;  %v3782_v22 = vld [vmem:[#allocation8 + $0x2e8] sm:$0xff]  ;;  %v3784_v45 = vld [vmem:[#allocation8 + $0x2f8] sm:$0xff] }
 0x370   : > { %5847 = vmatprep.subr.bf16.mxu1 %v8181_v8 }
 0x372   : > { %4138 = vmatmul.mubr.f32.gmra.mrb[38].mxu1 %v7682_v31 }
 0x373   : > { %4142 = vmatprep.mubr.f32.mxu1 %v7440_v36  ;;  %5849 = vmatpush1.bf16.msra.mxu1 %v5848_v16  ;;  %v5857_v36 = vpack.c.bf16 %v3766_v5, %v3765_v49  ;;  %v3774_v16 = vld [vmem:[#allocation8 + $0x2a8] sm:$0xff]  ;;  %v3081_v5 = vld [vmem:[#allocation3 + $0x21] sm:$0xff] }
 0x374   : > { %5850 = vmatprep.subr.bf16.mxu1 %v8181_v8  ;;  %v3790_v49 = vld [vmem:[#allocation8 + $0x328] sm:$0xff] }
 0x376   : > { %4143 = vmatmul.mubr.f32.gmra.mrb[40].mxu1 %v7428_v38  ;;  %v5860_v38 = vpack.c.bf16 %v3768_v24, %v3767_v56  ;;  %v3791_v56 = vld [vmem:[#allocation8 + $0x330] sm:$0xff]  ;;  %v3792_v24 = vld [vmem:[#allocation8 + $0x338] sm:$0xff] }
 0x377   : > { %4147 = vmatprep.mubr.f32.mxu1 %v7448_v4  ;;  %5852 = vmatpush1.bf16.msra.mxu1 %v5851_v10  ;;  %v3769_v4 = vld [vmem:[#allocation8 + $0x280] sm:$0xff]  ;;  %v3780_v10 = vld [vmem:[#allocation8 + $0x2d8] sm:$0xff] }
 0x378   : > { %5853 = vmatprep.subr.bf16.mxu1 %v8181_v8 }
 0x37a   : > { %4148 = vmatmul.mubr.f32.gmra.mrb[42].mxu1 %v7432_v21  ;;  %v5863_v21 = vpack.c.bf16 %v3770_v35, %v3769_v4 }
 0x37b   : > { %4152 = vmatprep.mubr.f32.mxu1 %v7458_v6  ;;  %5855 = vmatpush1.bf16.msra.mxu1 %v5854_v51  ;;  %v3771_v6 = vld [vmem:[#allocation8 + $0x290] sm:$0xff]  ;;  %v3789_v51 = vld [vmem:[#allocation8 + $0x320] sm:$0xff] }
 0x37c   : > { %5856 = vmatprep.subr.bf16.mxu1 %v8181_v8 }
 0x37e   : > { %4153 = vmatmul.mubr.f32.gmra.mrb[44].mxu1 %v7446_v42  ;;  %v5866_v42 = vpack.c.bf16 %v3772_v30, %v3771_v6  ;;  %v3793_v6 = vld [vmem:[#allocation8 + $0x340] sm:$0xff]  ;;  %v3794_v30 = vld [vmem:[#allocation8 + $0x348] sm:$0xff] }
 0x37f   : > { %4157 = vmatprep.mubr.f32.mxu1 %v7466_v59  ;;  %5858 = vmatpush1.bf16.msra.mxu1 %v5857_v36  ;;  %v3773_v59 = vld [vmem:[#allocation8 + $0x2a0] sm:$0xff]  ;;  %v5893_v36 = vpack.c.bf16 %v3790_v49, %v3789_v51  ;;  %v3803_v49 = vld [vmem:[#allocation8 + $0x390] sm:$0xff] }
 0x380   : > { %5859 = vmatprep.subr.bf16.mxu1 %v8181_v8 }
 0x382   : > { %4158 = vmatmul.mubr.f32.gmra.mrb[46].mxu1 %v7450_v58  ;;  %v5869_v58 = vpack.c.bf16 %v3774_v16, %v3773_v59  ;;  %v3148_v59 = vld [vmem:[#allocation3 + $0x4a] sm:$0xff]  ;;  %v5899_v16 = vpack.c.bf16 %v3794_v30, %v3793_v6  ;;  %v3806_v6 = vld [vmem:[#allocation8 + $0x3a8] sm:$0xff]  ;;  %v7830_v30 = vld [vmem:[#allocation3 + $0x81] sm:$0xff] }
 0x383   : > { %4162 = vmatprep.mubr.f32.mxu1 %v7476_v27  ;;  %5861 = vmatpush1.bf16.msra.mxu1 %v5860_v38  ;;  %v3775_v27 = vld [vmem:[#allocation8 + $0x2b0] sm:$0xff]  ;;  %v7786_v38 = vld [vmem:[#allocation3 + $0x31] sm:$0xff] }
 0x384   : > { %5862 = vmatprep.subr.bf16.mxu1 %v8181_v8 }
 0x386   : > { %4163 = vmatmul.mubr.f32.gmra.mrb[48].mxu1 %v7464_v63  ;;  %v5872_v63 = vpack.c.bf16 %v3776_v3, %v3775_v27  ;;  %v3796_v27 = vld [vmem:[#allocation8 + $0x358] sm:$0xff] }
 0x387   : > { %4167 = vmatprep.mubr.f32.mxu1 %v7484_v19  ;;  %5864 = vmatpush1.bf16.msra.mxu1 %v5863_v21  ;;  %v3777_v19 = vld [vmem:[#allocation8 + $0x2c0] sm:$0xff]  ;;  %v5896_v21 = vpack.c.bf16 %v3792_v24, %v3791_v56  ;;  %v3153_v56 = vld [vmem:[#allocation3 + $0x82] sm:$0xff] }
 0x388   : > { %5865 = vmatprep.subr.bf16.mxu1 %v8181_v8  ;;  %v7798_v3 = vld [vmem:[#allocation3 + $0x49] sm:$0xff] }
 0x38a   : > { %4168 = vmatmul.mubr.f32.gmra.mrb[50].mxu1 %v7468_v7  ;;  %v5875_v7 = vpack.c.bf16 %v3778_v32, %v3777_v19  ;;  %v3149_v19 = vld [vmem:[#allocation3 + $0x52] sm:$0xff] }
 0x38b   : > { %4172 = vmatprep.mubr.f32.mxu1 %v7494_v9  ;;  %5867 = vmatpush1.bf16.msra.mxu1 %v5866_v42  ;;  %v3779_v9 = vld [vmem:[#allocation8 + $0x2d0] sm:$0xff] }
 0x38c   : > { %5868 = vmatprep.subr.bf16.mxu1 %v8181_v8  ;;  %v7794_v42 = vld [vmem:[#allocation3 + $0x39] sm:$0xff] }
 0x38e   : > { %4173 = vmatmul.mubr.f32.gmra.mrb[52].mxu1 %v7482_v46  ;;  %v5878_v46 = vpack.c.bf16 %v3780_v10, %v3779_v9  ;;  %v3797_v9 = vld [vmem:[#allocation8 + $0x360] sm:$0xff]  ;;  %v3798_v10 = vld [vmem:[#allocation8 + $0x368] sm:$0xff] }
 0x38f   : > { %4177 = vmatprep.mubr.f32.mxu1 %v7502_v12  ;;  %5870 = vmatpush1.bf16.msra.mxu1 %v5869_v58  ;;  %v3781_v12 = vld [vmem:[#allocation8 + $0x2e0] sm:$0xff]  ;;  %v3795_v58 = vld [vmem:[#allocation8 + $0x350] sm:$0xff] }
 0x390   : > { %5871 = vmatprep.subr.bf16.mxu1 %v8181_v8 }
 0x392   : > { %4178 = vmatmul.mubr.f32.gmra.mrb[54].mxu1 %v7486_v37  ;;  %v5881_v37 = vpack.c.bf16 %v3782_v22, %v3781_v12  ;;  %v3150_v12 = vld [vmem:[#allocation3 + $0x62] sm:$0xff]  ;;  %v5905_v22 = vpack.c.bf16 %v3798_v10, %v3797_v9  ;;  %v3155_v9 = vld [vmem:[#allocation3 + $0x9a] sm:$0xff] }
 0x393   : > { %4182 = vmatprep.mubr.f32.mxu1 %v7512_v54  ;;  %5873 = vmatpush1.bf16.msra.mxu1 %v5872_v63  ;;  %v3783_v54 = vld [vmem:[#allocation8 + $0x2f0] sm:$0xff] }
 0x394   : > { %5874 = vmatprep.subr.bf16.mxu1 %v8181_v8 }
 0x396   : > { %4183 = vmatmul.mubr.f32.gmra.mrb[56].mxu1 %v7500_v28  ;;  %v5884_v28 = vpack.c.bf16 %v3784_v45, %v3783_v54  ;;  %v3800_v54 = vld [vmem:[#allocation8 + $0x378] sm:$0xff] }
 0x397   : > { %4187 = vmatprep.mubr.f32.mxu1 %v7520_v57  ;;  %5876 = vmatpush1.bf16.msra.mxu1 %v5875_v7  ;;  %v8208_v57 = vld [vmem:[#allocation22_spill] sm:$0xff]  ;;  %v5902_v7 = vpack.c.bf16 %v3796_v27, %v3795_v58  ;;  %v3808_v27 = vld [vmem:[#allocation8 + $0x3b8] sm:$0xff] }
 0x398   : > { %5877 = vmatprep.subr.bf16.mxu1 %v8181_v8  ;;  %v7810_v45 = vld [vmem:[#allocation3 + $0x61] sm:$0xff] }
 0x399   : > { %v3807_v58 = vld [vmem:[#allocation8 + $0x3b0] sm:$0xff] }
 0x39a   : > { %4188 = vmatmul.mubr.f32.gmra.mrb[58].mxu1 %v7504_v13  ;;  %v8206_v13 = vld [vmem:[#allocation20_spill] sm:$0xff] }
 0x39b   : > { %4192 = vmatprep.mubr.f32.mxu1 %v7530_v29  ;;  %5879 = vmatpush1.bf16.msra.mxu1 %v5878_v46  ;;  %v7806_v46 = vld [vmem:[#allocation3 + $0x51] sm:$0xff] }
 0x39c   : > { %5880 = vmatprep.subr.bf16.mxu1 %v8181_v8 }
 0x39e   : > { %4193 = vmatmul.mubr.f32.gmra.mrb[60].mxu1 %v7518_v53  ;;  %v8207_v53 = vld [vmem:[#allocation21_spill] sm:$0xff] }
 0x39f   : > { %4197 = vmatprep.mubr.f32.mxu1 %v7538_v55  ;;  %5882 = vmatpush1.bf16.msra.mxu1 %v5881_v37  ;;  %v3799_v37 = vld [vmem:[#allocation8 + $0x370] sm:$0xff] }
 0x3a0   : > { %5883 = vmatprep.subr.bf16.mxu1 %v8181_v8 }
 0x3a2   : > { %4198 = vmatmul.mubr.f32.gmra.mrb[62].mxu1 %v7522_v47 }
 0x3a3   : > { %4202 = vmatprep.mubr.f32.mxu1 %v7548_v50  ;;  %5885 = vmatpush1.bf16.msra.mxu1 %v5884_v28  ;;  %v7759_v50 = vld [vmem:[#allocation3 + $0x15a] sm:$0xff] }
 0x3a4   : > { %5886 = vmatprep.subr.bf16.mxu1 %v8181_v8 }
 0x3a6   : > { %4203 = vmatmul.mubr.f32.gmra.mrb[64].mxu1 %v7536_v34  ;;  %v7751_v34 = vld [vmem:[#allocation3 + $0x152] sm:$0xff] }
 0x3a7   : > { %4207 = vmatprep.mubr.f32.mxu1 %v7556_v0  ;;  %v7765_v0 = vld [vmem:[#allocation3 + $0x16a] sm:$0xff] }
 0x3aa   : > { %4208 = vmatmul.mubr.f32.gmra.mrb[66].mxu1 %v7540_v43 }
 0x3ab   : > { %4212 = vmatprep.mubr.f32.mxu1 %v7566_v17  ;;  %v7770_v17 = vld [vmem:[#allocation3 + $0x188] sm:$0xff] }
 0x3ae   : > { %4213 = vmatmul.mubr.f32.gmra.mrb[68].mxu1 %v7554_v11  ;;  %v7762_v11 = vld [vmem:[#allocation3 + $0x180] sm:$0xff] }
 0x3af   : > { %4217 = vmatprep.mubr.f32.mxu1 %v7574_v41 }
 0x3b2   : > { %4218 = vmatmul.mubr.f32.gmra.mrb[70].mxu1 %v7558_v48 }
 0x3b3   : > { %4222 = vmatprep.mubr.f32.mxu1 %v7584_v1  ;;  %v3785_v1 = vld [vmem:[#allocation8 + $0x300] sm:$0xff] }
 0x3b6   : > { %4223 = vmatmul.mubr.f32.gmra.mrb[72].mxu1 %v7572_v60 }
 0x3b7   : > { %4227 = vmatprep.mubr.f32.mxu1 %v7592_v25  ;;  %v3786_v25 = vld [vmem:[#allocation8 + $0x308] sm:$0xff] }
 0x3ba   : > { %4228 = vmatmul.mubr.f32.gmra.mrb[74].mxu1 %v7576_v20 }
 0x3bb   : > { %4232 = vmatprep.mubr.f32.mxu1 %v7602_v2  ;;  %v7775_v2 = vld [vmem:[#allocation3 + $0x172] sm:$0xff] }
 0x3be   : > { %4233 = vmatmul.mubr.f32.gmra.mrb[76].mxu1 %v7590_v61 }
 0x3bf   : > { %4237 = vmatprep.mubr.f32.mxu1 %v7610_v15  ;;  %v5887_v15 = vpack.c.bf16 %v3786_v25, %v3785_v1  ;;  %v3151_v1 = vld [vmem:[#allocation3 + $0x6a] sm:$0xff] }
 0x3c2   : > { %4238 = vmatmul.mubr.f32.gmra.mrb[78].mxu1 %v8206_v13 }
 0x3c3   : > { %4242 = vmatprep.mubr.f32.mxu1 %v7620_v39  ;;  %v3787_v39 = vld [vmem:[#allocation8 + $0x310] sm:$0xff] }
 0x3c6   : > { %4243 = vmatmul.mubr.f32.gmra.mrb[80].mxu1 %v8207_v53 }
 0x3c7   : > { %4247 = vmatprep.mubr.f32.mxu1 %v7630_v62  ;;  %v3788_v62 = vld [vmem:[#allocation8 + $0x318] sm:$0xff] }
 0x3ca   : > { %4248 = vmatmul.mubr.f32.gmra.mrb[82].mxu1 %v8208_v57 }
 0x3cb   : > { %4252 = vmatprep.mubr.f32.mxu1 %v7643_v18  ;;  %v3080_v18 = vld [vmem:[#allocation3 + $0x19] sm:$0xff] }
 0x3cc   : > { %v7743_v47 = vpop.f32.mrb[64].mxu0 }
 0x3cd   : > { %v7746_v29 = vpop.f32.mrb[65].mxu0 }
 0x3ce   : > { %4253 = vmatmul.mubr.f32.gmra.mrb[84].mxu1 %v7628_v14 }
 0x3cf   : > { %4257 = vmatprep.mubr.f32.mxu1 %v7653_v33 }
 0x3d2   : > { %4258 = vmatmul.mubr.f32.gmra.mrb[86].mxu1 %v7632_v23 }
 0x3d3   : > { %4262 = vmatprep.mubr.f32.mxu1 %v7662_v26 }
 0x3d4   : > { %v7753_v55 = vpop.f32.mrb[66].mxu0 }
 0x3d5   : > { %v7756_v43 = vpop.f32.mrb[67].mxu0 }
 0x3d6   : > { %4263 = vmatmul.mubr.f32.gmra.mrb[88].mxu1 %v7751_v34 }
 0x3d7   : > { %4267 = vmatprep.mubr.f32.mxu1 %v7669_v52  ;;  %v5890_v52 = vpack.c.bf16 %v3788_v62, %v3787_v39  ;;  %v3801_v39 = vld [vmem:[#allocation8 + $0x380] sm:$0xff]  ;;  %v3802_v62 = vld [vmem:[#allocation8 + $0x388] sm:$0xff] }
 0x3d8   : > { %v5911_v51 = vpack.c.bf16 %v3802_v62, %v3801_v39  ;;  %v3811_v39 = vld [vmem:[#allocation8 + $0x3d0] sm:$0xff]  ;;  %v3812_v62 = vld [vmem:[#allocation8 + $0x3d8] sm:$0xff] }
 0x3da   : > { %4268 = vmatmul.mubr.f32.gmra.mrb[90].mxu1 %v7759_v50 }
 0x3db   : > { %4272 = vmatprep.mubr.f32.mxu1 %v7762_v11 }
 0x3dc   : > { %v7767_v48 = vpop.f32.mrb[68].mxu0 }
 0x3dd   : > { %v7772_v41 = vpop.f32.mrb[69].mxu0 }
 0x3de   : > { %4273 = vmatmul.mubr.f32.gmra.mrb[92].mxu1 %v7765_v0 }
 0x3df   : > { %4277 = vmatprep.mubr.f32.mxu1 %v7770_v17 }
 0x3e2   : > { %4278 = vmatmul.mubr.f32.gmra.mrb[94].mxu1 %v7775_v2 }
 0x3e3   : > { %4347 = vmatprep.mubr.f32.mxu1 %v7677_v44  ;;  %v3146_v44 = vld [vmem:[#allocation3 + $0x32] sm:$0xff] }
 0x3e4   : > { %v7779_v33 = vpop.f32.mrb[70].mxu0 }
 0x3e5   : > { %v7781_v26 = vpop.f32.mrb[71].mxu0 }
 0x3e6   : > { %4348 = vmatmul.mubr.f32.vlgmr.msra.gmra.mrb[32].mxu1 %v3080_v18  ;;  %v7818_v18 = vld [vmem:[#allocation3 + $0x69] sm:$0xff] }
 0x3e7   : > { %4352 = vmatprep.mubr.f32.mxu1 %v7682_v31  ;;  %5888 = vmatpush1.bf16.msra.mxu1 %v5887_v15  ;;  %v3147_v31 = vld [vmem:[#allocation3 + $0x3a] sm:$0xff]  ;;  %v5908_v15 = vpack.c.bf16 %v3800_v54, %v3799_v37 }
 0x3e8   : > { %5889 = vmatprep.subr.bf16.mxu1 %v8181_v8  ;;  %v3810_v37 = vld [vmem:[#allocation8 + $0x3c8] sm:$0xff] }
 0x3e9   : > { %v7842_v54 = vld [vmem:[#allocation3 + $0x99] sm:$0xff] }
 0x3ea   : > { %4353 = vmatmul.mubr.f32.gmra.mrb[34].mxu1 %v3081_v5  ;;  %v3804_v5 = vld [vmem:[#allocation8 + $0x398] sm:$0xff] }
 0x3eb   : > { %4357 = vmatprep.mubr.f32.mxu1 %v3146_v44  ;;  %5891 = vmatpush1.bf16.msra.mxu1 %v5890_v52  ;;  %v3152_v52 = vld [vmem:[#allocation3 + $0x7a] sm:$0xff] }
 0x3ec   : > { %5892 = vmatprep.subr.bf16.mxu1 %v8181_v8  ;;  %v7788_v4 = vpop.f32.mrb[72].mxu0  ;;  %v7822_v44 = vld [vmem:[#allocation3 + $0x79] sm:$0xff] }
 0x3ed   : > { %v7791_v35 = vpop.f32.mrb[73].mxu0 }
 0x3ee   : > { %4358 = vmatmul.mubr.f32.gmra.mrb[36].mxu1 %v7786_v38 }
 0x3ef   : > { %4362 = vmatprep.mubr.f32.mxu1 %v3147_v31  ;;  %5894 = vmatpush1.bf16.msra.mxu1 %v5893_v36  ;;  %v5914_v31 = vpack.c.bf16 %v3804_v5, %v3803_v49  ;;  %v3157_v49 = vld [vmem:[#allocation3 + $0xb2] sm:$0xff] }
 0x3f0   : > { %5895 = vmatprep.subr.bf16.mxu1 %v8181_v8 }
 0x3f2   : > { %4363 = vmatmul.mubr.f32.gmra.mrb[38].mxu1 %v7794_v42 }
 0x3f3   : > { %4367 = vmatprep.mubr.f32.mxu1 %v3148_v59  ;;  %5897 = vmatpush1.bf16.msra.mxu1 %v5896_v21  ;;  %v3805_v21 = vld [vmem:[#allocation8 + $0x3a0] sm:$0xff] }
 0x3f4   : > { %5898 = vmatprep.subr.bf16.mxu1 %v8181_v8  ;;  %v7800_v63 = vpop.f32.mrb[74].mxu0  ;;  %v3154_v59 = vld [vmem:[#allocation3 + $0x92] sm:$0xff] }
 0x3f5   : > { %v7803_v32 = vpop.f32.mrb[75].mxu0 }
 0x3f6   : > { %4368 = vmatmul.mubr.f32.gmra.mrb[40].mxu1 %v7798_v3 }
 0x3f7   : > { %4372 = vmatprep.mubr.f32.mxu1 %v3149_v19  ;;  %5900 = vmatpush1.bf16.msra.mxu1 %v5899_v16  ;;  %v5917_v16 = vpack.c.bf16 %v3806_v6, %v3805_v21  ;;  %v7834_v19 = vld [vmem:[#allocation3 + $0x91] sm:$0xff] }
 0x3f8   : > { %5901 = vmatprep.subr.bf16.mxu1 %v8181_v8  ;;  %v3814_v21 = vld [vmem:[#allocation8 + $0x3e8] sm:$0xff] }
 0x3f9   : > { %v7854_v6 = vld [vmem:[#allocation3 + $0xb1] sm:$0xff] }
 0x3fa   : > { %4373 = vmatmul.mubr.f32.gmra.mrb[42].mxu1 %v7806_v46 }
 0x3fb   : > { %4377 = vmatprep.mubr.f32.mxu1 %v3150_v12  ;;  %5903 = vmatpush1.bf16.msra.mxu1 %v5902_v7  ;;  %v5920_v12 = vpack.c.bf16 %v3808_v27, %v3807_v58  ;;  %v3815_v58 = vld [vmem:[#allocation8 + $0x3f0] sm:$0xff]  ;;  %v3816_v27 = vld [vmem:[#allocation8 + $0x3f8] sm:$0xff] }
 0x3fc   : > { %5904 = vmatprep.subr.bf16.mxu1 %v8181_v8  ;;  %v7812_v28 = vpop.f32.mrb[76].mxu0 }
 0x3fd   : > { %v7815_v25 = vpop.f32.mrb[77].mxu0 }
 0x3fe   : > { %4378 = vmatmul.mubr.f32.gmra.mrb[44].mxu1 %v7810_v45 }
 0x3ff   : > { %4382 = vmatprep.mubr.f32.mxu1 %v3151_v1  ;;  %5906 = vmatpush1.bf16.msra.mxu1 %v5905_v22  ;;  %v3809_v22 = vld [vmem:[#allocation8 + $0x3c0] sm:$0xff] }
 0x400   : > { %5907 = vmatprep.subr.bf16.mxu1 %v8181_v8  ;;  %v3156_v1 = vld [vmem:[#allocation3 + $0xaa] sm:$0xff] }
 0x402   : > { %4383 = vmatmul.mubr.f32.gmra.mrb[46].mxu1 %v7818_v18 }
 0x403   : > { %4387 = vmatprep.mubr.f32.mxu1 %v3152_v52  ;;  %5909 = vmatpush1.bf16.msra.mxu1 %v5908_v15  ;;  %v5923_v15 = vpack.c.bf16 %v3810_v37, %v3809_v22  ;;  %v7846_v52 = vld [vmem:[#allocation3 + $0xa9] sm:$0xff] }
 0x404   : > { %5910 = vmatprep.subr.bf16.mxu1 %v8181_v8  ;;  %v7824_v36 = vpop.f32.mrb[78].mxu0  ;;  %v3159_v22 = vld [vmem:[#allocation3 + $0xca] sm:$0xff] }
 0x405   : > { %v7827_v24 = vpop.f32.mrb[79].mxu0 }
 0x406   : > { %4388 = vmatmul.mubr.f32.gmra.mrb[48].mxu1 %v7822_v44 }
 0x407   : > { %4392 = vmatprep.mubr.f32.mxu1 %v3153_v56  ;;  %5912 = vmatpush1.bf16.msra.mxu1 %v5911_v51  ;;  %v5926_v56 = vpack.c.bf16 %v3812_v62, %v3811_v39  ;;  %v3160_v39 = vld [vmem:[#allocation3 + $0xda] sm:$0xff]  ;;  %v8209_v62 = vld [vmem:[#allocation12_spill] sm:$0xff] }
 0x408   : > { %5913 = vmatprep.subr.bf16.mxu1 %v8181_v8 }
 0x40a   : > { %4393 = vmatmul.mubr.f32.gmra.mrb[50].mxu1 %v7830_v30 }
 0x40b   : > { %4397 = vmatprep.mubr.f32.mxu1 %v3154_v59  ;;  %5915 = vmatpush1.bf16.msra.mxu1 %v5914_v31  ;;  %v3813_v31 = vld [vmem:[#allocation8 + $0x3e0] sm:$0xff]  ;;  %v3158_v59 = vld [vmem:[#allocation3 + $0xc2] sm:$0xff] }
 0x40c   : > { %5916 = vmatprep.subr.bf16.mxu1 %v8181_v8  ;;  %v7836_v7 = vpop.f32.mrb[80].mxu0 }
 0x40d   : > { %v7839_v10 = vpop.f32.mrb[81].mxu0 }
 0x40e   : > { %4398 = vmatmul.mubr.f32.gmra.mrb[52].mxu1 %v7834_v19 }
 0x40f   : > { %4402 = vmatprep.mubr.f32.mxu1 %v3155_v9  ;;  %5918 = vmatpush1.bf16.msra.mxu1 %v5917_v16  ;;  %v5929_v16 = vpack.c.bf16 %v3814_v21, %v3813_v31  ;;  %v7858_v9 = vld [vmem:[#allocation3 + $0xc1] sm:$0xff] }
 0x410   : > { %5919 = vmatprep.subr.bf16.mxu1 %v8181_v8  ;;  %v3161_v31 = vld [vmem:[#allocation3 + $0xe2] sm:$0xff] }
 0x412   : > { %4403 = vmatmul.mubr.f32.gmra.mrb[54].mxu1 %v7842_v54 }
 0x413   : > { %4407 = vmatprep.mubr.f32.mxu1 %v3156_v1  ;;  %5921 = vmatpush1.bf16.msra.mxu1 %v5920_v12  ;;  %v5932_v1 = vpack.c.bf16 %v3816_v27, %v3815_v58  ;;  %v7889_v58 = vld [vmem:[#allocation3 + $0x109] sm:$0xff]  ;;  %v7893_v27 = vld [vmem:[#allocation3 + $0x111] sm:$0xff] }
 0x414   : > { %5922 = vmatprep.subr.bf16.mxu1 %v8181_v8  ;;  %v7848_v51 = vpop.f32.mrb[82].mxu0 }
 0x415   : > { %v7851_v5 = vpop.f32.mrb[83].mxu0 }
 0x416   : > { %4408 = vmatmul.mubr.f32.gmra.mrb[56].mxu1 %v7846_v52 }
 0x417   : > { %4412 = vmatprep.mubr.f32.mxu1 %v3157_v49  ;;  %5924 = vmatpush1.bf16.msra.mxu1 %v5923_v15  ;;  %v7866_v15 = vld [vmem:[#allocation3 + $0xc9] sm:$0xff]  ;;  %v7870_v49 = vld [vmem:[#allocation3 + $0xd9] sm:$0xff] }
 0x418   : > { %5925 = vmatprep.subr.bf16.mxu1 %v8181_v8 }
 0x41a   : > { %4413 = vmatmul.mubr.f32.gmra.mrb[58].mxu1 %v7854_v6 }
 0x41b   : > { %4417 = vmatprep.mubr.f32.mxu1 %v3158_v59  ;;  %5927 = vmatpush1.bf16.msra.mxu1 %v5926_v56  ;;  %v7881_v59 = vld [vmem:[#allocation3 + $0xf1] sm:$0xff] }
 0x41c   : > { %5928 = vmatprep.subr.bf16.mxu1 %v8181_v8  ;;  %v7860_v12 = vpop.f32.mrb[84].mxu0 }
 0x41d   : > { %v7863_v37 = vpop.f32.mrb[85].mxu0 }
 0x41e   : > { %4418 = vmatmul.mubr.f32.gmra.mrb[60].mxu1 %v7858_v9 }
 0x41f   : > { %4422 = vmatprep.mubr.f32.mxu1 %v3159_v22  ;;  %5930 = vmatpush1.bf16.msra.mxu1 %v5929_v16  ;;  %v7885_v16 = vld [vmem:[#allocation3 + $0xf9] sm:$0xff] }
 0x420   : > { %5931 = vmatprep.subr.bf16.mxu1 %v8181_v8  ;;  %v7877_v8 = vld [vmem:[#allocation3 + $0xe1] sm:$0xff]  ;;  %v8212_v22 = vld [vmem:[#allocation25_spill] sm:$0xff] }
 0x422   : > { %4423 = vmatmul.mubr.f32.gmra.mrb[62].mxu1 %v7866_v15 }
 0x423   : > { %4427 = vmatprep.mubr.f32.mxu1 %v3160_v39  ;;  %5933 = vmatpush1.bf16.msra.mxu1 %v5932_v1  ;;  %v7926_v1 = vld [vmem:[#allocation3 + $0x18a] sm:$0xff]  ;;  %v8213_v39 = vld [vmem:[#allocation26_spill] sm:$0xff] }
 0x424   : > { %5966 = vmatprep.subr.bf16.mxu1 %v8209_v62 }
 0x425   : > { %v7872_v56 = vpop.f32.mrb[86].mxu0 }
 0x426   : > { %4428 = vmatmul.mubr.f32.gmra.mrb[64].mxu1 %v7870_v49  ;;  %v7875_v21 = vpop.f32.mrb[87].mxu0 }
 0x427   : > { %4432 = vmatprep.mubr.f32.mxu1 %v3161_v31  ;;  %v3209_v31 = vld [vmem:[#allocation3 + $0x30] sm:$0xff] }
 0x42a   : > { %4433 = vmatmul.mubr.f32.gmra.mrb[66].mxu1 %v7877_v8 }
 0x42b   : > { %4437 = vmatprep.mubr.f32.mxu1 %v7572_v60  ;;  %v7897_v60 = vld [vmem:[#allocation3 + $0x121] sm:$0xff] }
 0x42e   : > { %4438 = vmatmul.mubr.f32.gmra.mrb[68].mxu1 %v7881_v59 }
 0x42f   : > { %4442 = vmatprep.mubr.f32.mxu1 %v7576_v20  ;;  %v7901_v20 = vld [vmem:[#allocation3 + $0x129] sm:$0xff] }
 0x432   : > { %4443 = vmatmul.mubr.f32.gmra.mrb[70].mxu1 %v7885_v16 }
 0x433   : > { %4447 = vmatprep.mubr.f32.mxu1 %v7590_v61  ;;  %v7905_v61 = vld [vmem:[#allocation3 + $0x139] sm:$0xff] }
 0x436   : > { %4448 = vmatmul.mubr.f32.gmra.mrb[72].mxu1 %v7889_v58 }
 0x437   : > { %4452 = vmatprep.mubr.f32.mxu1 %v8206_v13  ;;  %v7909_v13 = vld [vmem:[#allocation3 + $0x141] sm:$0xff] }
 0x43a   : > { %4453 = vmatmul.mubr.f32.gmra.mrb[74].mxu1 %v7893_v27 }
 0x43b   : > { %4457 = vmatprep.mubr.f32.mxu1 %v8207_v53  ;;  %v7913_v53 = vld [vmem:[#allocation3 + $0x151] sm:$0xff] }
 0x43e   : > { %4458 = vmatmul.mubr.f32.gmra.mrb[76].mxu1 %v7897_v60 }
 0x43f   : > { %4462 = vmatprep.mubr.f32.mxu1 %v8208_v57  ;;  %v8210_v57 = vld [vmem:[#allocation23_spill] sm:$0xff] }
 0x442   : > { %4463 = vmatmul.mubr.f32.gmra.mrb[78].mxu1 %v7901_v20 }
 0x443   : > { %4467 = vmatprep.mubr.f32.mxu1 %v7628_v14  ;;  %v8211_v14 = vld [vmem:[#allocation24_spill] sm:$0xff] }
 0x446   : > { %4468 = vmatmul.mubr.f32.gmra.mrb[80].mxu1 %v7905_v61 }
 0x447   : > { %4472 = vmatprep.mubr.f32.mxu1 %v7632_v23  ;;  %v7922_v23 = vld [vmem:[#allocation3 + $0x182] sm:$0xff] }
 0x44a   : > { %4473 = vmatmul.mubr.f32.gmra.mrb[82].mxu1 %v7909_v13 }
 0x44b   : > { %4477 = vmatprep.mubr.f32.mxu1 %v7751_v34 }
 0x44e   : > { %4478 = vmatmul.mubr.f32.gmra.mrb[84].mxu1 %v7913_v53 }
 0x44f   : > { %4482 = vmatprep.mubr.f32.mxu1 %v7759_v50 }
 0x452   : > { %4483 = vmatmul.mubr.f32.gmra.mrb[86].mxu1 %v8210_v57  ;;  %v3210_v57 = vld [vmem:[#allocation3 + $0x38] sm:$0xff] }
 0x453   : > { %4487 = vmatprep.mubr.f32.mxu1 %v7765_v0 }
 0x456   : > { %4488 = vmatmul.mubr.f32.gmra.mrb[88].mxu1 %v7639_v40  ;;  %v8214_v40 = vld [vmem:[#allocation13_spill] sm:$0xff] }
 0x457   : > { %4492 = vmatprep.mubr.f32.mxu1 %v7775_v2 }
 0x45a   : > { %4493 = vmatmul.mubr.f32.gmra.mrb[90].mxu1 %v8211_v14  ;;  %v8215_v14 = vld [vmem:[#allocation14_spill] sm:$0xff] }
 0x45b   : > { %4497 = vmatprep.mubr.f32.mxu1 %v7922_v23 }
 0x45e   : > { %4498 = vmatmul.mubr.f32.gmra.mrb[92].mxu1 %v8212_v22  ;;  %v3211_v22 = vld [vmem:[#allocation3 + $0x48] sm:$0xff] }
 0x45f   : > { %4502 = vmatprep.mubr.f32.mxu1 %v7926_v1 }
 0x462   : > { %4503 = vmatmul.mubr.f32.gmra.mrb[94].mxu1 %v8213_v39  ;;  %v8218_v39 = vld [vmem:[#allocation17_spill] sm:$0xff] }
 0x463   : > { %4572 = vmatprep.mubr.f32.mxu1 %v7786_v38  ;;  %v8216_v38 = vld [vmem:[#allocation15_spill] sm:$0xff] }
 0x466   : > { %4573 = vmatmul.mubr.f32.vlgmr.msra.gmra.mrb[32].mxu1 %v3209_v31  ;;  %v8219_v31 = vld [vmem:[#allocation18_spill] sm:$0xff] }
 0x467   : > { %4577 = vmatprep.mubr.f32.mxu1 %v7794_v42  ;;  %5974 = vmatpush3.bf16.msra.mxu1 %v8209_v62  ;;  %v3212_v42 = vld [vmem:[#allocation3 + $0x50] sm:$0xff] }
 0x468   : > { %5967 = vmatprep.subr.bf16.mxu1 %v8214_v40  ;;  %v8217_v62 = vld [vmem:[#allocation16_spill] sm:$0xff] }
 0x46a   : > { %4578 = vmatmul.mubr.f32.gmra.mrb[34].mxu1 %v3210_v57  ;;  %v3217_v57 = vld [vmem:[#allocation3 + $0x90] sm:$0xff] }
 0x46b   : > { %4582 = vmatprep.mubr.f32.mxu1 %v7798_v3  ;;  %5975 = vmatpush3.bf16.msra.mxu1 %v8214_v40  ;;  %v3213_v3 = vld [vmem:[#allocation3 + $0x60] sm:$0xff]  ;;  %v8220_v40 = vld [vmem:[#allocation19_spill] sm:$0xff] }
 0x46c   : > { %5968 = vmatprep.subr.bf16.mxu1 %v8215_v14 }
 0x46e   : > { %4583 = vmatmul.mubr.f32.gmra.mrb[36].mxu1 %v3211_v22  ;;  %v3221_v22 = vld [vmem:[#allocation3 + $0xc0] sm:$0xff] }
 0x46f   : > { %4587 = vmatprep.mubr.f32.mxu1 %v7806_v46  ;;  %5976 = vmatpush3.bf16.msra.mxu1 %v8215_v14  ;;  %v3214_v46 = vld [vmem:[#allocation3 + $0x68] sm:$0xff] }
 0x470   : > { %5969 = vmatprep.subr.bf16.mxu1 %v8216_v38  ;;  %v3219_v14 = vld [vmem:[#allocation3 + $0xa8] sm:$0xff] }
 0x472   : > { %4588 = vmatmul.mubr.f32.gmra.mrb[38].mxu1 %v3212_v42  ;;  %v3299_v42 = vld [vmem:[#allocation3 + $0x169] sm:$0xff] }
 0x473   : > { %4592 = vmatprep.mubr.f32.mxu1 %v7810_v45  ;;  %5977 = vmatpush3.bf16.msra.mxu1 %v8216_v38  ;;  %v3215_v45 = vld [vmem:[#allocation3 + $0x78] sm:$0xff] }
 0x474   : > { %5970 = vmatprep.subr.bf16.mxu1 %v8217_v62  ;;  %v3298_v38 = vld [vmem:[#allocation3 + $0x159] sm:$0xff] }
 0x476   : > { %4593 = vmatmul.mubr.f32.gmra.mrb[40].mxu1 %v3213_v3  ;;  %v3301_v3 = vld [vmem:[#allocation3 + $0x181] sm:$0xff] }
 0x477   : > { %4597 = vmatprep.mubr.f32.mxu1 %v7818_v18  ;;  %5978 = vmatpush3.bf16.msra.mxu1 %v8217_v62  ;;  %v3216_v18 = vld [vmem:[#allocation3 + $0x80] sm:$0xff]  ;;  %v3300_v62 = vld [vmem:[#allocation3 + $0x171] sm:$0xff] }
 0x478   : > { %5971 = vmatprep.subr.bf16.mxu1 %v8218_v39 }
 0x47a   : > { %4598 = vmatmul.mubr.f32.gmra.mrb[42].mxu1 %v3214_v46  ;;  %v6400_v46 = vld [vmem:[#allocation2] sm:$0xff] }
 0x47b   : > { %4602 = vmatprep.mubr.f32.mxu1 %v7822_v44  ;;  %5979 = vmatpush3.bf16.msra.mxu1 %v8218_v39  ;;  %v3218_v44 = vld [vmem:[#allocation3 + $0x98] sm:$0xff]  ;;  %v3304_v39 = vld [vmem:[#allocation3 + $0x1a1] sm:$0xff] }
 0x47c   : > { %5972 = vmatprep.subr.bf16.mxu1 %v8219_v31 }
 0x47e   : > { %4603 = vmatmul.mubr.f32.gmra.mrb[44].mxu1 %v3215_v45 }
 0x47f   : > { %4607 = vmatprep.mubr.f32.mxu1 %v7830_v30  ;;  %5980 = vmatpush3.bf16.msra.mxu1 %v8219_v31  ;;  %v3220_v30 = vld [vmem:[#allocation3 + $0xb0] sm:$0xff] }
 0x480   : > { %5973 = vmatprep.subr.bf16.mxu1 %v8220_v40 }
 0x482   : > { %4608 = vmatmul.mubr.f32.gmra.mrb[46].mxu1 %v3216_v18 }
 0x483   : > { %4612 = vmatprep.mubr.f32.mxu1 %v7834_v19  ;;  %5981 = vmatpush3.bf16.msra.mxu1 %v8220_v40  ;;  %v3222_v19 = vld [vmem:[#allocation3 + $0xc8] sm:$0xff] }
 0x486   : > { %4613 = vmatmul.mubr.f32.gmra.mrb[48].mxu1 %v3217_v57 }
 0x487   : > { %4617 = vmatprep.mubr.f32.mxu1 %v7842_v54  ;;  %v3223_v54 = vld [vmem:[#allocation3 + $0xd8] sm:$0xff] }
 0x48a   : > { %4618 = vmatmul.mubr.f32.gmra.mrb[50].mxu1 %v3218_v44 }
 0x48b   : > { %4622 = vmatprep.mubr.f32.mxu1 %v7846_v52  ;;  %v3224_v52 = vld [vmem:[#allocation3 + $0xe0] sm:$0xff] }
 0x48e   : > { %4623 = vmatmul.mubr.f32.gmra.mrb[52].mxu1 %v3219_v14 }
 0x48f   : > { %4627 = vmatprep.mubr.f32.mxu1 %v7854_v6  ;;  %v3225_v6 = vld [vmem:[#allocation3 + $0xf0] sm:$0xff] }
 0x492   : > { %4628 = vmatmul.mubr.f32.gmra.mrb[54].mxu1 %v3220_v30 }
 0x493   : > { %4632 = vmatprep.mubr.f32.mxu1 %v7858_v9  ;;  %v3226_v9 = vld [vmem:[#allocation3 + $0xf8] sm:$0xff] }
 0x496   : > { %4633 = vmatmul.mubr.f32.gmra.mrb[56].mxu1 %v3221_v22 }
 0x497   : > { %4637 = vmatprep.mubr.f32.mxu1 %v7866_v15  ;;  %v3227_v15 = vld [vmem:[#allocation3 + $0x108] sm:$0xff] }
 0x49a   : > { %4638 = vmatmul.mubr.f32.gmra.mrb[58].mxu1 %v3222_v19 }
 0x49b   : > { %4642 = vmatprep.mubr.f32.mxu1 %v7870_v49  ;;  %v3228_v49 = vld [vmem:[#allocation3 + $0x110] sm:$0xff] }
 0x49e   : > { %4643 = vmatmul.mubr.f32.gmra.mrb[60].mxu1 %v3223_v54 }
 0x49f   : > { %4647 = vmatprep.mubr.f32.mxu1 %v7877_v8  ;;  %v3229_v8 = vld [vmem:[#allocation3 + $0x120] sm:$0xff] }
 0x4a2   : > { %4648 = vmatmul.mubr.f32.gmra.mrb[62].mxu1 %v3224_v52 }
 0x4a3   : > { %4652 = vmatprep.mubr.f32.mxu1 %v7881_v59  ;;  %v3230_v59 = vld [vmem:[#allocation3 + $0x128] sm:$0xff] }
 0x4a6   : > { %4653 = vmatmul.mubr.f32.gmra.mrb[64].mxu1 %v3225_v6 }
 0x4a7   : > { %4657 = vmatprep.mubr.f32.mxu1 %v7885_v16  ;;  %v3231_v16 = vld [vmem:[#allocation3 + $0x138] sm:$0xff] }
 0x4aa   : > { %4658 = vmatmul.mubr.f32.gmra.mrb[66].mxu1 %v3226_v9 }
 0x4ab   : > { %4662 = vmatprep.mubr.f32.mxu1 %v7889_v58  ;;  %v3232_v58 = vld [vmem:[#allocation3 + $0x140] sm:$0xff] }
 0x4ae   : > { %4663 = vmatmul.mubr.f32.gmra.mrb[68].mxu1 %v3227_v15 }
 0x4af   : > { %4667 = vmatprep.mubr.f32.mxu1 %v7893_v27  ;;  %v3233_v27 = vld [vmem:[#allocation3 + $0x150] sm:$0xff] }
 0x4b2   : > { %4668 = vmatmul.mubr.f32.gmra.mrb[70].mxu1 %v3228_v49 }
 0x4b3   : > { %4672 = vmatprep.mubr.f32.mxu1 %v7897_v60  ;;  %v3234_v60 = vld [vmem:[#allocation3 + $0x158] sm:$0xff] }
 0x4b6   : > { %4673 = vmatmul.mubr.f32.gmra.mrb[72].mxu1 %v3229_v8 }
 0x4b7   : > { %4677 = vmatprep.mubr.f32.mxu1 %v7901_v20  ;;  %v3235_v20 = vld [vmem:[#allocation3 + $0x168] sm:$0xff] }
 0x4ba   : > { %4678 = vmatmul.mubr.f32.gmra.mrb[74].mxu1 %v3230_v59 }
 0x4bb   : > { %4682 = vmatprep.mubr.f32.mxu1 %v7905_v61  ;;  %v3236_v61 = vld [vmem:[#allocation3 + $0x170] sm:$0xff] }
 0x4be   : > { %4683 = vmatmul.mubr.f32.gmra.mrb[76].mxu1 %v3231_v16 }
 0x4bf   : > { %4687 = vmatprep.mubr.f32.mxu1 %v7909_v13  ;;  %v3302_v13 = vld [vmem:[#allocation3 + $0x189] sm:$0xff] }
 0x4c2   : > { %4688 = vmatmul.mubr.f32.gmra.mrb[78].mxu1 %v3232_v58 }
 0x4c3   : > { %4692 = vmatprep.mubr.f32.mxu1 %v7913_v53  ;;  %v3303_v53 = vld [vmem:[#allocation3 + $0x199] sm:$0xff] }
 0x4c6   : > { %4693 = vmatmul.mubr.f32.gmra.mrb[80].mxu1 %v3233_v27 }
 0x4c7   : > { %4697 = vmatprep.mubr.f32.mxu1 %v3298_v38 }
 0x4ca   : > { %4698 = vmatmul.mubr.f32.gmra.mrb[82].mxu1 %v3234_v60 }
 0x4cb   : > { %4702 = vmatprep.mubr.f32.mxu1 %v3299_v42 }
 0x4ce   : > { %4703 = vmatmul.mubr.f32.gmra.mrb[84].mxu1 %v3235_v20 }
 0x4cf   : > { %4707 = vmatprep.mubr.f32.mxu1 %v3300_v62 }
 0x4d2   : > { %4708 = vmatmul.mubr.f32.gmra.mrb[86].mxu1 %v3236_v61 }
 0x4d3   : > { %4712 = vmatprep.mubr.f32.mxu1 %v3301_v3 }
 0x4d6   : > { %4713 = vmatmul.mubr.f32.gmra.mrb[88].mxu1 %v7762_v11  ;;  %v3367_v11 = vld [vmem:[#allocation3 + $0x19a] sm:$0xff] }
 0x4d7   : > { %4717 = vmatprep.mubr.f32.mxu1 %v3302_v13 }
 0x4da   : > { %4718 = vmatmul.mubr.f32.gmra.mrb[90].mxu1 %v7770_v17  ;;  %v3368_v17 = vld [vmem:[#allocation3 + $0x1a2] sm:$0xff] }
 0x4db   : > { %4722 = vmatprep.mubr.f32.mxu1 %v3303_v53 }
 0x4de   : > { %4723 = vmatmul.mubr.f32.gmra.mrb[92].mxu1 %v6400_v46 }
 0x4df   : > { %4727 = vmatprep.mubr.f32.mxu1 %v3304_v39 }
 0x4e2   : > { %4728 = vmatmul.mubr.f32.gmra.mrb[94].mxu1 %v6400_v46 }
 0x4e3   : > { %5506 = vmatprep.mubr.f32.mxu1 %v7751_v34  ;;  %v7981_v34 = vld [vmem:[%s8123_s5] ss:$0 sm:$0xff] }
 0x4e6   : > { %5507 = vmatmul.mubr.f32.vlgmr.msra.gmra.mrb[96].mxu1 %v7759_v50 }
 0x4e7   : > { %5509 = vmatprep.mubr.f32.mxu1 %v7765_v0 }
 0x4ea   : > { %5510 = vmatmul.mubr.f32.gmra.mrb[98].mxu1 %v7775_v2  ;;  %v7987_v2 = vld [vmem:[%s8124_s6] ss:$0 sm:$0xff] }
 0x4eb   : > { %5512 = vmatprep.mubr.f32.mxu1 %v7922_v23 }
 0x4ee   : > { %5513 = vmatmul.mubr.f32.gmra.mrb[100].mxu1 %v7926_v1 }
 0x4ef   : > { %5515 = vmatprep.mubr.f32.mxu1 %v3367_v11 }
 0x4f2   : > { %5516 = vmatmul.mubr.f32.gmra.mrb[102].mxu1 %v3368_v17 }
 0x539   : > { %v4574_v31 = vpop.f32.mrb[32].mxu1 }
 0x53a   : > { %v4800_v50 = vadd.f32 %v7746_v29, %v4574_v31  ;;  %v4576_v0 = vpop.f32.mrb[33].mxu1 }
 0x53c   : > { %v4965_v23 = vmul.f32 %v7981_v34, %v4800_v50 }
 0x53d   : > { %v4579_v1 = vpop.f32.mrb[34].mxu1 }
 0x53e   : > { %v5004_v45 = vadd.f32 %v7987_v2, %v4965_v23  ;;  %v4805_v40 = vadd.f32 %v7743_v47, %v4579_v1  ;;  %v4581_v18 = vpop.f32.mrb[35].mxu1 }
 0x540   : > { %vm5036_vm1 = vcmp.ge.f32.partialorder %v5004_v45, 0.0  ;;  %v5068_v29 = vmul.f32 0.01, %v5004_v45  ;;  %v4966_v57 = vmul.f32 %v7981_v34, %v4805_v40 }
 0x541   : > { %v4584_v44 = vpop.f32.mrb[36].mxu1 }
 0x542   : > { %v5100_v14 = vsel %vm5036_vm1, %v5004_v45, %v5068_v29  ;;  %v5005_v30 = vadd.f32 %v7987_v2, %v4966_v57  ;;  %v4810_v22 = vadd.f32 %v7756_v43, %v4584_v44  ;;  %v4586_v47 = vpop.f32.mrb[37].mxu1 }
 0x543   : > { %5132 = vst [vmem:[%s7997_s26] sm:$0xff] %v5100_v14 }
 0x544   : > { %vm5037_vm2 = vcmp.ge.f32.partialorder %v5005_v30, 0.0  ;;  %v5069_v19 = vmul.f32 0.01, %v5005_v30  ;;  %v4967_v54 = vmul.f32 %v7981_v34, %v4810_v22 }
 0x545   : > { %v4589_v52 = vpop.f32.mrb[38].mxu1 }
 0x546   : > { %v5101_v6 = vsel %vm5037_vm2, %v5005_v30, %v5069_v19  ;;  %v5006_v9 = vadd.f32 %v7987_v2, %v4967_v54  ;;  %v4815_v15 = vadd.f32 %v7753_v55, %v4589_v52  ;;  %v4591_v49 = vpop.f32.mrb[39].mxu1 }
 0x547   : > { %5133 = vst [vmem:[%s7997_s26 + $0x8] sm:$0xff] %v5101_v6 }
 0x548   : > { %vm5038_vm3 = vcmp.ge.f32.partialorder %v5006_v9, 0.0  ;;  %v5070_v8 = vmul.f32 0.01, %v5006_v9  ;;  %v4968_v43 = vmul.f32 %v7981_v34, %v4815_v15 }
 0x549   : > { %v4594_v59 = vpop.f32.mrb[40].mxu1 }
 0x54a   : > { %v5102_v16 = vsel %vm5038_vm3, %v5006_v9, %v5070_v8  ;;  %v5007_v58 = vadd.f32 %v7987_v2, %v4968_v43  ;;  %v4820_v27 = vadd.f32 %v7772_v41, %v4594_v59  ;;  %v4596_v38 = vpop.f32.mrb[41].mxu1 }
 0x54b   : > { %5134 = vst [vmem:[%s7997_s26 + $0x10] sm:$0xff] %v5102_v16 }
 0x54c   : > { %vm5039_vm4 = vcmp.ge.f32.partialorder %v5007_v58, 0.0  ;;  %v5071_v60 = vmul.f32 0.01, %v5007_v58  ;;  %v4969_v55 = vmul.f32 %v7981_v34, %v4820_v27 }
 0x54d   : > { %v4599_v42 = vpop.f32.mrb[42].mxu1 }
 0x54e   : > { %v5103_v20 = vsel %vm5039_vm4, %v5007_v58, %v5071_v60  ;;  %v5008_v62 = vadd.f32 %v7987_v2, %v4969_v55  ;;  %v4825_v61 = vadd.f32 %v7767_v48, %v4599_v42  ;;  %v4601_v3 = vpop.f32.mrb[43].mxu1 }
 0x54f   : > { %5135 = vst [vmem:[%s7997_s26 + $0x18] sm:$0xff] %v5103_v20 }
 0x550   : > { %vm5040_vm5 = vcmp.ge.f32.partialorder %v5008_v62, 0.0  ;;  %v5072_v13 = vmul.f32 0.01, %v5008_v62  ;;  %v4970_v41 = vmul.f32 %v7981_v34, %v4825_v61 }
 0x551   : > { %v4604_v53 = vpop.f32.mrb[44].mxu1 }
 0x552   : > { %v5104_v39 = vsel %vm5040_vm5, %v5008_v62, %v5072_v13  ;;  %v5009_v46 = vadd.f32 %v7987_v2, %v4970_v41  ;;  %v4830_v11 = vadd.f32 %v7781_v26, %v4604_v53  ;;  %v4606_v17 = vpop.f32.mrb[45].mxu1 }
 0x553   : > { %5136 = vst [vmem:[%s7997_s26 + $0x20] sm:$0xff] %v5104_v39 }
 0x554   : > { %vm5041_vm6 = vcmp.ge.f32.partialorder %v5009_v46, 0.0  ;;  %v5073_v31 = vmul.f32 0.01, %v5009_v46  ;;  %v4971_v48 = vmul.f32 %v7981_v34, %v4830_v11 }
 0x555   : > { %v4609_v50 = vpop.f32.mrb[46].mxu1 }
 0x556   : > { %v5105_v0 = vsel %vm5041_vm6, %v5009_v46, %v5073_v31  ;;  %v5010_v23 = vadd.f32 %v7987_v2, %v4971_v48  ;;  %v4835_v1 = vadd.f32 %v7779_v33, %v4609_v50  ;;  %v4611_v45 = vpop.f32.mrb[47].mxu1 }
 0x557   : > { %5137 = vst [vmem:[%s7997_s26 + $0x28] sm:$0xff] %v5105_v0 }
 0x558   : > { %vm5042_vm7 = vcmp.ge.f32.partialorder %v5010_v23, 0.0  ;;  %v5074_v40 = vmul.f32 0.01, %v5010_v23  ;;  %v4972_v26 = vmul.f32 %v7981_v34, %v4835_v1 }
 0x559   : > { %v4614_v18 = vpop.f32.mrb[48].mxu1 }
 0x55a   : > { %v5106_v29 = vsel %vm5042_vm7, %v5010_v23, %v5074_v40  ;;  %v5011_v57 = vadd.f32 %v7987_v2, %v4972_v26  ;;  %v4840_v44 = vadd.f32 %v7791_v35, %v4614_v18  ;;  %v4616_v14 = vpop.f32.mrb[49].mxu1 }
 0x55b   : > { %5138 = vst [vmem:[%s7997_s26 + $0x30] sm:$0xff] %v5106_v29 }
 0x55c   : > { %vm5043_vm8 = vcmp.ge.f32.partialorder %v5011_v57, 0.0  ;;  %v5075_v30 = vmul.f32 0.01, %v5011_v57  ;;  %v4973_v33 = vmul.f32 %v7981_v34, %v4840_v44 }
 0x55d   : > { %v4619_v22 = vpop.f32.mrb[50].mxu1 }
 0x55e   : > { %v5107_v47 = vsel %vm5043_vm8, %v5011_v57, %v5075_v30  ;;  %v5012_v19 = vadd.f32 %v7987_v2, %v4973_v33  ;;  %v4845_v54 = vadd.f32 %v7788_v4, %v4619_v22  ;;  %v4621_v52 = vpop.f32.mrb[51].mxu1 }
 0x55f   : > { %5139 = vst [vmem:[%s7997_s26 + $0x38] sm:$0xff] %v5107_v47 }
 0x560   : > { %vm5044_vm9 = vcmp.ge.f32.partialorder %v5012_v19, 0.0  ;;  %v5076_v6 = vmul.f32 0.01, %v5012_v19  ;;  %v4974_v35 = vmul.f32 %v7981_v34, %v4845_v54 }
 0x561   : > { %v4624_v9 = vpop.f32.mrb[52].mxu1 }
 0x562   : > { %v5108_v15 = vsel %vm5044_vm9, %v5012_v19, %v5076_v6  ;;  %v5013_v49 = vadd.f32 %v7987_v2, %v4974_v35  ;;  %v4850_v8 = vadd.f32 %v7803_v32, %v4624_v9  ;;  %v4626_v43 = vpop.f32.mrb[53].mxu1 }
 0x563   : > { %5140 = vst [vmem:[%s7997_s26 + $0x40] sm:$0xff] %v5108_v15 }
 0x564   : > { %vm5045_vm10 = vcmp.ge.f32.partialorder %v5013_v49, 0.0  ;;  %v5077_v59 = vmul.f32 0.01, %v5013_v49  ;;  %v4975_v4 = vmul.f32 %v7981_v34, %v4850_v8 }
 0x565   : > { %v4629_v16 = vpop.f32.mrb[54].mxu1 }
 0x566   : > { %v5109_v58 = vsel %vm5045_vm10, %v5013_v49, %v5077_v59  ;;  %v5014_v27 = vadd.f32 %v7987_v2, %v4975_v4  ;;  %v4855_v38 = vadd.f32 %v7800_v63, %v4629_v16  ;;  %v4631_v60 = vpop.f32.mrb[55].mxu1 }
 0x567   : > { %5141 = vst [vmem:[%s7997_s26 + $0x48] sm:$0xff] %v5109_v58 }
 0x568   : > { %vm5046_vm11 = vcmp.ge.f32.partialorder %v5014_v27, 0.0  ;;  %v5078_v55 = vmul.f32 0.01, %v5014_v27  ;;  %v4976_v32 = vmul.f32 %v7981_v34, %v4855_v38 }
 0x569   : > { %v4634_v42 = vpop.f32.mrb[56].mxu1 }
 0x56a   : > { %v5110_v20 = vsel %vm5046_vm11, %v5014_v27, %v5078_v55  ;;  %v5015_v62 = vadd.f32 %v7987_v2, %v4976_v32  ;;  %v4860_v61 = vadd.f32 %v7815_v25, %v4634_v42  ;;  %v4636_v3 = vpop.f32.mrb[57].mxu1 }
 0x56b   : > { %5142 = vst [vmem:[%s7997_s26 + $0x50] sm:$0xff] %v5110_v20 }
 0x56c   : > { %vm5047_vm12 = vcmp.ge.f32.partialorder %v5015_v62, 0.0  ;;  %v5079_v13 = vmul.f32 0.01, %v5015_v62  ;;  %v4977_v63 = vmul.f32 %v7981_v34, %v4860_v61 }
 0x56d   : > { %v4639_v41 = vpop.f32.mrb[58].mxu1 }
 0x56e   : > { %v5111_v53 = vsel %vm5047_vm12, %v5015_v62, %v5079_v13  ;;  %v5016_v39 = vadd.f32 %v7987_v2, %v4977_v63  ;;  %v4865_v46 = vadd.f32 %v7812_v28, %v4639_v41  ;;  %v4641_v11 = vpop.f32.mrb[59].mxu1 }
 0x56f   : > { %5143 = vst [vmem:[%s7997_s26 + $0x58] sm:$0xff] %v5111_v53 }
 0x570   : > { %vm5048_vm13 = vcmp.ge.f32.partialorder %v5016_v39, 0.0  ;;  %v5080_v17 = vmul.f32 0.01, %v5016_v39  ;;  %v4978_v25 = vmul.f32 %v7981_v34, %v4865_v46 }
 0x571   : > { %v4644_v31 = vpop.f32.mrb[60].mxu1 }
 0x572   : > { %v5112_v48 = vsel %vm5048_vm13, %v5016_v39, %v5080_v17  ;;  %v5017_v50 = vadd.f32 %v7987_v2, %v4978_v25  ;;  %v4870_v0 = vadd.f32 %v7827_v24, %v4644_v31  ;;  %v4646_v23 = vpop.f32.mrb[61].mxu1 }
 0x573   : > { %5144 = vst [vmem:[%s7997_s26 + $0x60] sm:$0xff] %v5112_v48 }
 0x574   : > { %vm5049_vm14 = vcmp.ge.f32.partialorder %v5017_v50, 0.0  ;;  %v5081_v1 = vmul.f32 0.01, %v5017_v50  ;;  %v4979_v28 = vmul.f32 %v7981_v34, %v4870_v0 }
 0x575   : > { %v4649_v45 = vpop.f32.mrb[62].mxu1 }
 0x576   : > { %v5113_v40 = vsel %vm5049_vm14, %v5017_v50, %v5081_v1  ;;  %v5018_v26 = vadd.f32 %v7987_v2, %v4979_v28  ;;  %v4875_v18 = vadd.f32 %v7824_v36, %v4649_v45  ;;  %v4651_v29 = vpop.f32.mrb[63].mxu1 }
 0x577   : > { %5145 = vst [vmem:[%s7997_s26 + $0x68] sm:$0xff] %v5113_v40 }
 0x578   : > { %vm5050_vm15 = vcmp.ge.f32.partialorder %v5018_v26, 0.0  ;;  %v5082_v57 = vmul.f32 0.01, %v5018_v26  ;;  %v4980_v24 = vmul.f32 %v7981_v34, %v4875_v18 }
 0x579   : > { %v4654_v44 = vpop.f32.mrb[64].mxu1 }
 0x57a   : > { %v5114_v14 = vsel %vm5050_vm15, %v5018_v26, %v5082_v57  ;;  %v5019_v30 = vadd.f32 %v7987_v2, %v4980_v24  ;;  %v4880_v33 = vadd.f32 %v7839_v10, %v4654_v44  ;;  %v4656_v22 = vpop.f32.mrb[65].mxu1 }
 0x57b   : > { %5146 = vst [vmem:[%s7997_s26 + $0x70] sm:$0xff] %v5114_v14 }
 0x57c   : > { %vm5051_vm0 = vcmp.ge.f32.partialorder %v5019_v30, 0.0  ;;  %v5083_v47 = vmul.f32 0.01, %v5019_v30  ;;  %v4981_v36 = vmul.f32 %v7981_v34, %v4880_v33 }
 0x57d   : > { %v4659_v19 = vpop.f32.mrb[66].mxu1 }
 0x57e   : > { %v5115_v54 = vsel %vm5051_vm0, %v5019_v30, %v5083_v47  ;;  %v5020_v52 = vadd.f32 %v7987_v2, %v4981_v36  ;;  %v4885_v6 = vadd.f32 %v7836_v7, %v4659_v19  ;;  %v4661_v35 = vpop.f32.mrb[67].mxu1 }
 0x57f   : > { %5147 = vst [vmem:[%s7997_s26 + $0x78] sm:$0xff] %v5115_v54 }
 0x580   : > { %vm5052_vm1 = vcmp.ge.f32.partialorder %v5020_v52, 0.0  ;;  %v5084_v9 = vmul.f32 0.01, %v5020_v52  ;;  %v4982_v10 = vmul.f32 %v7981_v34, %v4885_v6 }
 0x581   : > { %v4664_v15 = vpop.f32.mrb[68].mxu1 }
 0x582   : > { %v5116_v49 = vsel %vm5052_vm1, %v5020_v52, %v5084_v9  ;;  %v5021_v8 = vadd.f32 %v7987_v2, %v4982_v10  ;;  %v4890_v43 = vadd.f32 %v7851_v5, %v4664_v15  ;;  %v4666_v59 = vpop.f32.mrb[69].mxu1 }
 0x583   : > { %5148 = vst [vmem:[%s7997_s26 + $0x80] sm:$0xff] %v5116_v49 }
 0x584   : > { %vm5053_vm2 = vcmp.ge.f32.partialorder %v5021_v8, 0.0  ;;  %v5085_v4 = vmul.f32 0.01, %v5021_v8  ;;  %v4983_v7 = vmul.f32 %v7981_v34, %v4890_v43 }
 0x585   : > { %v4669_v16 = vpop.f32.mrb[70].mxu1 }
 0x586   : > { %v5117_v58 = vsel %vm5053_vm2, %v5021_v8, %v5085_v4  ;;  %v5022_v27 = vadd.f32 %v7987_v2, %v4983_v7  ;;  %v4895_v38 = vadd.f32 %v7848_v51, %v4669_v16  ;;  %v4671_v60 = vpop.f32.mrb[71].mxu1 }
 0x587   : > { %5149 = vst [vmem:[%s7997_s26 + $0x88] sm:$0xff] %v5117_v58 }
 0x588   : > { %vm5054_vm3 = vcmp.ge.f32.partialorder %v5022_v27, 0.0  ;;  %v5086_v55 = vmul.f32 0.01, %v5022_v27  ;;  %v4984_v5 = vmul.f32 %v7981_v34, %v4895_v38 }
 0x589   : > { %v4674_v32 = vpop.f32.mrb[72].mxu1 }
 0x58a   : > { %v5118_v42 = vsel %vm5054_vm3, %v5022_v27, %v5086_v55  ;;  %v5023_v20 = vadd.f32 %v7987_v2, %v4984_v5  ;;  %v4900_v62 = vadd.f32 %v7863_v37, %v4674_v32  ;;  %v4676_v61 = vpop.f32.mrb[73].mxu1 }
 0x58b   : > { %5150 = vst [vmem:[%s7997_s26 + $0x90] sm:$0xff] %v5118_v42 }
 0x58c   : > { %vm5055_vm4 = vcmp.ge.f32.partialorder %v5023_v20, 0.0  ;;  %v5087_v3 = vmul.f32 0.01, %v5023_v20  ;;  %v4985_v51 = vmul.f32 %v7981_v34, %v4900_v62 }
 0x58d   : > { %v4679_v13 = vpop.f32.mrb[74].mxu1 }
 0x58e   : > { %v5119_v63 = vsel %vm5055_vm4, %v5023_v20, %v5087_v3  ;;  %v5024_v41 = vadd.f32 %v7987_v2, %v4985_v51  ;;  %v4905_v53 = vadd.f32 %v7860_v12, %v4679_v13  ;;  %v4681_v39 = vpop.f32.mrb[75].mxu1 }
 0x58f   : > { %5151 = vst [vmem:[%s7997_s26 + $0x98] sm:$0xff] %v5119_v63 }
 0x590   : > { %vm5056_vm5 = vcmp.ge.f32.partialorder %v5024_v41, 0.0  ;;  %v5088_v46 = vmul.f32 0.01, %v5024_v41  ;;  %v4986_v37 = vmul.f32 %v7981_v34, %v4905_v53 }
 0x591   : > { %v4684_v11 = vpop.f32.mrb[76].mxu1 }
 0x592   : > { %v5120_v17 = vsel %vm5056_vm5, %v5024_v41, %v5088_v46  ;;  %v5025_v25 = vadd.f32 %v7987_v2, %v4986_v37  ;;  %v4910_v31 = vadd.f32 %v7875_v21, %v4684_v11  ;;  %v4686_v48 = vpop.f32.mrb[77].mxu1 }
 0x593   : > { %5152 = vst [vmem:[%s7997_s26 + $0xa0] sm:$0xff] %v5120_v17 }
 0x594   : > { %vm5057_vm6 = vcmp.ge.f32.partialorder %v5025_v25, 0.0  ;;  %v5089_v50 = vmul.f32 0.01, %v5025_v25  ;;  %v4987_v12 = vmul.f32 %v7981_v34, %v4910_v31 }
 0x595   : > { %v4689_v0 = vpop.f32.mrb[78].mxu1 }
 0x596   : > { %v5121_v23 = vsel %vm5057_vm6, %v5025_v25, %v5089_v50  ;;  %v5026_v1 = vadd.f32 %v7987_v2, %v4987_v12  ;;  %v4915_v28 = vadd.f32 %v7872_v56, %v4689_v0  ;;  %v4691_v45 = vpop.f32.mrb[79].mxu1 }
 0x597   : > { %5153 = vst [vmem:[%s7997_s26 + $0xa8] sm:$0xff] %v5121_v23 }
 0x598   : > { %vm5058_vm7 = vcmp.ge.f32.partialorder %v5026_v1, 0.0  ;;  %v5090_v40 = vmul.f32 0.01, %v5026_v1  ;;  %v4988_v21 = vmul.f32 %v7981_v34, %v4915_v28 }
 0x599   : > { %v4694_v26 = vpop.f32.mrb[80].mxu1 }
 0x59a   : > { %v5122_v18 = vsel %vm5058_vm7, %v5026_v1, %v5090_v40  ;;  %v5027_v29 = vadd.f32 %v7987_v2, %v4988_v21  ;;  %v4696_v57 = vpop.f32.mrb[81].mxu1 }
 0x59b   : > { %5154 = vst [vmem:[%s7997_s26 + $0xb0] sm:$0xff] %v5122_v18 }
 0x59c   : > { %vm5059_vm8 = vcmp.ge.f32.partialorder %v5027_v29, 0.0  ;;  %v5091_v24 = vmul.f32 0.01, %v5027_v29 }
 0x59d   : > { %v4699_v44 = vpop.f32.mrb[82].mxu1 }
 0x59e   : > { %v5123_v14 = vsel %vm5059_vm8, %v5027_v29, %v5091_v24  ;;  %v4701_v30 = vpop.f32.mrb[83].mxu1 }
 0x59f   : > { %5155 = vst [vmem:[%s7997_s26 + $0xb8] sm:$0xff] %v5123_v14 }
 0x5a1   : > { %v4704_v56 = vpop.f32.mrb[84].mxu1 }
 0x5a2   : > { %v4706_v33 = vpop.f32.mrb[85].mxu1 }
 0x5a5   : > { %v4709_v22 = vpop.f32.mrb[86].mxu1 }
 0x5a6   : > { %v4711_v47 = vpop.f32.mrb[87].mxu1 }
 0x5a9   : > { %v4714_v36 = vpop.f32.mrb[88].mxu1 }
 0x5aa   : > { %v4716_v19 = vpop.f32.mrb[89].mxu1 }
 0x5ad   : > { %v4719_v54 = vpop.f32.mrb[90].mxu1 }
 0x5ae   : > { %v4721_v52 = vpop.f32.mrb[91].mxu1 }
 0x5b1   : > { %v4724_v6 = vpop.f32.mrb[92].mxu1 }
 0x5b2   : > { %v4726_v35 = vpop.f32.mrb[93].mxu1 }
 0x5b5   : > { %v4729_v9 = vpop.f32.mrb[94].mxu1 }
 0x5b6   : > { %v4731_v10 = vpop.f32.mrb[95].mxu1 }
 0x5b9   : > { %v5508_v15 = vpop.f32.mrb[96].mxu1 }
 0x5ba   : > { %v4925_v49 = vadd.f32 %v5508_v15, %v4699_v44  ;;  %v4919_v8 = vpop.f32.mrb[97].mxu1 }
 0x5bb   : > { %v4920_v43 = vadd.f32 %v4919_v8, %v4694_v26 }
 0x5bc   : > { %v4990_v59 = vmul.f32 %v7981_v34, %v4925_v49 }
 0x5bd   : > { %v4989_v4 = vmul.f32 %v7981_v34, %v4920_v43  ;;  %v5511_v7 = vpop.f32.mrb[98].mxu1 }
 0x5be   : > { %v5029_v16 = vadd.f32 %v7987_v2, %v4990_v59  ;;  %v4935_v58 = vadd.f32 %v5511_v7, %v4709_v22  ;;  %v4929_v27 = vpop.f32.mrb[99].mxu1 }
 0x5bf   : > { %v5028_v38 = vadd.f32 %v7987_v2, %v4989_v4  ;;  %v4930_v60 = vadd.f32 %v4929_v27, %v4704_v56 }
 0x5c0   : > { %vm5061_vm9 = vcmp.ge.f32.partialorder %v5029_v16, 0.0  ;;  %v5093_v55 = vmul.f32 0.01, %v5029_v16  ;;  %v4992_v5 = vmul.f32 %v7981_v34, %v4935_v58 }
 0x5c1   : > { %vm5060_vm10 = vcmp.ge.f32.partialorder %v5028_v38, 0.0  ;;  %v5092_v32 = vmul.f32 0.01, %v5028_v38  ;;  %v4991_v42 = vmul.f32 %v7981_v34, %v4930_v60  ;;  %v5514_v20 = vpop.f32.mrb[100].mxu1 }
 0x5c2   : > { %v5125_v62 = vsel %vm5061_vm9, %v5029_v16, %v5093_v55  ;;  %v5031_v61 = vadd.f32 %v7987_v2, %v4992_v5  ;;  %v4945_v3 = vadd.f32 %v5514_v20, %v4719_v54  ;;  %v4939_v51 = vpop.f32.mrb[101].mxu1 }
 0x5c3   : > { %5157 = vst [vmem:[%s7997_s26 + $0xc8] sm:$0xff] %v5125_v62  ;;  %v5124_v13 = vsel %vm5060_vm10, %v5028_v38, %v5092_v32  ;;  %v5030_v63 = vadd.f32 %v7987_v2, %v4991_v42  ;;  %v4940_v41 = vadd.f32 %v4939_v51, %v4714_v36 }
 0x5c4   : > { %5156 = vst [vmem:[%s7997_s26 + $0xc0] sm:$0xff] %v5124_v13  ;;  %vm5063_vm11 = vcmp.ge.f32.partialorder %v5031_v61, 0.0  ;;  %v5095_v53 = vmul.f32 0.01, %v5031_v61  ;;  %v4994_v39 = vmul.f32 %v7981_v34, %v4945_v3 }
 0x5c5   : > { %vm5062_vm12 = vcmp.ge.f32.partialorder %v5030_v63, 0.0  ;;  %v5094_v46 = vmul.f32 0.01, %v5030_v63  ;;  %v4993_v37 = vmul.f32 %v7981_v34, %v4940_v41  ;;  %v5517_v11 = vpop.f32.mrb[102].mxu1 }
 0x5c6   : > { %v5127_v17 = vsel %vm5063_vm11, %v5031_v61, %v5095_v53  ;;  %v5033_v25 = vadd.f32 %v7987_v2, %v4994_v39  ;;  %v4955_v31 = vadd.f32 %v5517_v11, %v4729_v9  ;;  %v4949_v48 = vpop.f32.mrb[103].mxu1 }
 0x5c7   : > { %5159 = vst [vmem:[%s7997_s26 + $0xd8] sm:$0xff] %v5127_v17  ;;  %v5126_v50 = vsel %vm5062_vm12, %v5030_v63, %v5094_v46  ;;  %v5032_v12 = vadd.f32 %v7987_v2, %v4993_v37  ;;  %v4950_v0 = vadd.f32 %v4949_v48, %v4724_v6 }
 0x5c8   : > { %5158 = vst [vmem:[%s7997_s26 + $0xd0] sm:$0xff] %v5126_v50  ;;  %vm5065_vm13 = vcmp.ge.f32.partialorder %v5033_v25, 0.0  ;;  %v5097_v23 = vmul.f32 0.01, %v5033_v25  ;;  %v4996_v1 = vmul.f32 %v7981_v34, %v4955_v31 }
 0x5c9   : > { %vm5064_vm14 = vcmp.ge.f32.partialorder %v5032_v12, 0.0  ;;  %v5096_v28 = vmul.f32 0.01, %v5032_v12  ;;  %v4995_v45 = vmul.f32 %v7981_v34, %v4950_v0 }
 0x5ca   : > { %v5129_v40 = vsel %vm5065_vm13, %v5033_v25, %v5097_v23  ;;  %v5035_v21 = vadd.f32 %v7987_v2, %v4996_v1 }
 0x5cb   : > { %5161 = vst [vmem:[%s7997_s26 + $0xe8] sm:$0xff] %v5129_v40  ;;  %v5128_v26 = vsel %vm5064_vm14, %v5032_v12, %v5096_v28  ;;  %v5034_v18 = vadd.f32 %v7987_v2, %v4995_v45 }
 0x5cc   : > { %5160 = vst [vmem:[%s7997_s26 + $0xe0] sm:$0xff] %v5128_v26  ;;  %vm5067_vm15 = vcmp.ge.f32.partialorder %v5035_v21, 0.0  ;;  %v5099_v29 = vmul.f32 0.01, %v5035_v21 }
 0x5cd   : > { %vm5066_vm0 = vcmp.ge.f32.partialorder %v5034_v18, 0.0  ;;  %v5098_v57 = vmul.f32 0.01, %v5034_v18 }
 0x5ce   : > { %v5131_v24 = vsel %vm5067_vm15, %v5035_v21, %v5099_v29 }
 0x5cf   : > { %5163 = vst [vmem:[%s7997_s26 + $0xf8] sm:$0xff] %v5131_v24  ;;  %v5130_v44 = vsel %vm5066_vm0, %v5034_v18, %v5098_v57 }
 0x5d0   : > { %5162 = vst [vmem:[%s7997_s26 + $0xf0] sm:$0xff] %v5130_v44 }
 0x5d1 PF: > { %s19_s24 = sadd.s32 1, %s6471_s24  }
 0x5d2   : > { %p16_p9 = scmp.ge.s32.totalorder %s19_s24, 4  }
 0x5d4   :  { %18 = sbr.rel (!%p16_p9) target bundleno = 2 (0x2), region = 91 }
 0x5db   :  { %5185 = vsyncpa [#allocation7], 1 }
 0x5dc   :  { %5187 = vsyncpa [#allocation7 + $0x1], 1 }
 0x5dd   :  { %5188 = vsyncpa [#allocation9], 1 }

</bundles_post_ra>
